<compile_context>
chip_gen: v7x
topology: tpu7x:2x2x1
jax: 0.10.0
libtpu: 0.0.40
codegen_flags: <defaults>
</compile_context>

<pallas_src>
import math
from functools import partial

import numpy as np
import jax
import jax.numpy as jnp
from jax.experimental import pallas as pl
from jax.experimental.pallas import tpu as pltpu

# ---------------- config (small, deterministic) ----------------
B = 2          # batch
L = 16         # sequence length
D = 32         # d_model
H = 4          # n_heads
E = D // H     # head dim
DFF = 64       # d_ff
MA_K = 5       # moving_avg kernel size (odd)
N_LAYERS = 2   # number of EncoderLayers
EPS = 1e-5     # LayerNorm eps

DP = 128       # lane-dense padded d_model
DFFP = 128     # lane-dense padded d_ff
QKVP = 128     # lane-dense padded 3*d_model (fused q|k|v output)


# ---------------- fused Pallas kernel (whole Encoder) ----------------
def _encoder_kernel(x_ref, wqkv_ref, bqkv_ref, wo_ref, w1_ref, w2_ref,
                    avg_ref, g_ref, bt_ref, o_ref, *, nb):
    f32, bf16 = jnp.float32, jnp.bfloat16
    scale = 1.0 / math.sqrt(E)
    _, lx, dp = x_ref.shape
    T = nb * lx                                    # tokens handled this grid step

    x = x_ref[...].reshape(T, dp).astype(f32)      # residual stream in f32
    avg = avg_ref[...]                             # (T, T) block-diag moving average

    for layer in range(N_LAYERS):                  # static unroll; weights stay in VMEM
        # --- fused Q|K|V projection: one (T,128)@(128,128) bf16 MXU op ---
        qkv = jnp.dot(x.astype(bf16), wqkv_ref[layer],
                      preferred_element_type=f32) + bqkv_ref[layer]

        # --- FullAttention per (batch, head); contexts reassembled along lanes ---
        ctx_rows = []
        for b in range(nb):                        # static (nb <= 2)
            rows = slice(b * lx, (b + 1) * lx)
            head_ctx = []
            for h in range(H):                     # static (H = 4)
                qh = qkv[rows, h * E:(h + 1) * E]
                kh = qkv[rows, D + h * E:D + (h + 1) * E]
                vh = qkv[rows, 2 * D + h * E:2 * D + (h + 1) * E]
                s = jax.lax.dot_general(qh, kh, (((1,), (1,)), ((), ())),
                                        preferred_element_type=f32) * scale
                s = s - jnp.max(s, axis=-1, keepdims=True)
                p = jnp.exp(s)
                p = p / jnp.sum(p, axis=-1, keepdims=True)   # exact divide
                head_ctx.append(jnp.dot(p, vh, preferred_element_type=f32))
            ctx_rows.append(jnp.concatenate(head_ctx, axis=-1))        # (L, D)
        ctx = ctx_rows[0] if nb == 1 else jnp.concatenate(ctx_rows, axis=0)  # (T, D)

        # --- single output projection (K = D) instead of 4 K=8 micro-matmuls ---
        attn_out = jnp.dot(ctx.astype(bf16), wo_ref[layer],
                           preferred_element_type=f32)                 # (T, DP)
        x1 = x + attn_out                                              # dropout p=0

        # --- decomp1: residual = x1 - moving_avg(x1) (f32) ---
        s1 = x1 - jnp.dot(avg, x1, preferred_element_type=f32)

        # --- feed-forward: Conv1d(k=1, no bias) -> relu -> Conv1d(k=1, no bias) ---
        y = jnp.maximum(jnp.dot(s1.astype(bf16), w1_ref[layer],
                                preferred_element_type=f32), 0.0)
        y = jnp.dot(y.astype(bf16), w2_ref[layer], preferred_element_type=f32)

        # --- decomp2: residual = (s1 + y) - moving_avg(s1 + y) ---
        z = s1 + y
        x = z - jnp.dot(avg, z, preferred_element_type=f32)

    # --- my_Layernorm: LayerNorm over the TRUE d_model (padded lanes are zero,
    #     so sums/D are exact), centered variance with the pad lanes masked,
    #     then subtract the per-sequence mean (torch dim=1). ---
    lane = jax.lax.broadcasted_iota(jnp.int32, (T, dp), 1)
    mu = jnp.sum(x, axis=-1, keepdims=True) * (1.0 / D)
    xc = x - mu
    var = jnp.sum(jnp.where(lane < D, xc, 0.0) ** 2,
                  axis=-1, keepdims=True) * (1.0 / D)
    x_hat = xc * jax.lax.rsqrt(var + EPS) * g_ref[...] + bt_ref[...]   # pads stay 0

    outs = []
    for b in range(nb):
        rows = slice(b * lx, (b + 1) * lx)
        xb = x_hat[rows, :]
        outs.append(xb - jnp.mean(xb, axis=0, keepdims=True))
    res = outs[0] if nb == 1 else jnp.concatenate(outs, axis=0)
    o_ref[...] = res.reshape(nb, lx, dp).astype(o_ref.dtype)


# ---------------- one-time host-side weight packing ----------------
def make_avg_block_diag(seq_len: int, k: int, nb: int) -> jnp.ndarray:
    """Block-diagonal (nb*L, nb*L) matrix: per-batch AvgPool1d(k, stride=1)
    with replicate padding, applied as a single matmul on the flattened tokens."""
    pad = (k - 1) // 2
    a = np.zeros((seq_len, seq_len), dtype=np.float32)
    for i in range(seq_len):
        for w in range(i - pad, i + pad + 1):
            j = min(max(w, 0), seq_len - 1)
            a[i, j] += 1.0 / k
    big = np.zeros((nb * seq_len, nb * seq_len), dtype=np.float32)
    for b in range(nb):
        big[b * seq_len:(b + 1) * seq_len, b * seq_len:(b + 1) * seq_len] = a
    return jnp.asarray(big)


def pack_encoder_params(layer_params, gamma, beta, seq_len, nb):
    """Pad / transpose / fuse / cast all weights ONCE.  Cache the result and
    reuse it for every forward (review item: hoist packing out of the call)."""
    def pad2(w, rows, cols):
        return jnp.pad(w, ((0, rows - w.shape[0]), (0, cols - w.shape[1])))

    wqkv, bqkv, wo, w1, w2 = [], [], [], [], []
    for p in layer_params:
        qkv_t = jnp.concatenate([p["wq"].T, p["wk"].T, p["wv"].T], axis=1)  # (D, 3D)
        wqkv.append(pad2(qkv_t, DP, QKVP))
        bqkv.append(pad2(jnp.concatenate([p["bq"], p["bk"], p["bv"]], axis=1), 1, QKVP))
        wo.append(pad2(p["wo"].T, D, DP))        # ctx only has D true lanes -> K=D
        w1.append(pad2(p["w1"].T, DP, DFFP))     # Conv1d(d_model->d_ff, k=1)
        w2.append(pad2(p["w2"].T, DFFP, DP))     # Conv1d(d_ff->d_model, k=1)

    packed = {
        "wqkv": jnp.stack(wqkv).astype(jnp.bfloat16),
        "bqkv": jnp.stack(bqkv).astype(jnp.float32),
        "wo":   jnp.stack(wo).astype(jnp.bfloat16),
        "w1":   jnp.stack(w1).astype(jnp.bfloat16),
        "w2":   jnp.stack(w2).astype(jnp.bfloat16),
        "avg":  make_avg_block_diag(seq_len, MA_K, nb),       # f32
        "gamma": pad2(gamma, 1, DP).astype(jnp.float32),      # pads are exactly 0
        "beta":  pad2(beta, 1, DP).astype(jnp.float32),
    }
    return jax.tree_util.tree_map(jax.block_until_ready, packed)


# ---------------- per-forward wrapper (single pallas_call) ----------------
@partial(jax.jit, static_argnames=("nb",))
def _encoder_forward_padded(x, packed, nb):
    bx, lx, dx = x.shape
    assert bx % nb == 0 and packed["avg"].shape[0] == nb * lx
    x_pad = jnp.pad(x, ((0, 0), (0, 0), (0, DP - dx))).astype(jnp.bfloat16)

    weights = (packed["wqkv"], packed["bqkv"], packed["wo"], packed["w1"],
               packed["w2"], packed["avg"], packed["gamma"], packed["beta"])

    def const_spec(a):
        n = a.ndim
        return pl.BlockSpec(a.shape, lambda i, _n=n: (0,) * _n)

    return pl.pallas_call(
        partial(_encoder_kernel, nb=nb),
        out_shape=jax.ShapeDtypeStruct((bx, lx, DP), jnp.float32),
        grid=(bx // nb,),
        in_specs=[pl.BlockSpec((nb, lx, DP), lambda i: (i, 0, 0))]
                 + [const_spec(w) for w in weights],
        out_specs=pl.BlockSpec((nb, lx, DP), lambda i: (i, 0, 0)),
        compiler_params=pltpu.CompilerParams(
            dimension_semantics=("parallel",)),   # v7x: one batch element per TC
    )(x_pad, *weights)


def encoder_forward(x, packed, nb, check_padding=False):
    """Encoder.forward (conv_layers=None, norm=my_Layernorm) -> (out, attns)."""
    out_pad = _encoder_forward_padded(x, packed, nb=nb)
    if check_padding:
        pad_max = float(jnp.max(jnp.abs(out_pad[:, :, D:])))
        assert pad_max == 0.0, f"padded output lanes are not zero: {pad_max}"
    attns = [None] * N_LAYERS        # FullAttention(output_attention=False) -> None
    return out_pad[:, :, :D], attns


def _tensorcores_per_chip() -> int:
    try:
        kind = jax.devices()[0].device_kind.lower()
    except Exception:
        return 1
    return 2 if ("v7" in kind or "tpu7" in kind) else 1


# ---------------- deterministic parameter init (torch layout) ----------------
def init_params(key):
    def w(k, shape, fan_in):
        lim = 1.0 / math.sqrt(fan_in)
        return jax.random.uniform(k, shape, jnp.float32, -lim, lim)

    layer_params = []
    for i in range(N_LAYERS):
        ks = jax.random.split(jax.random.fold_in(key, i), 10)
        layer_params.append({
            "wq": w(ks[0], (D, D), D), "bq": w(ks[1], (1, D), D),
            "wk": w(ks[2], (D, D), D), "bk": w(ks[3], (1, D), D),
            "wv": w(ks[4], (D, D), D), "bv": w(ks[5], (1, D), D),
            "wo": w(ks[6], (D, D), D), "bo": w(ks[7], (1, D), D),
            "w1": w(ks[8], (DFF, D), D),      # Conv1d(d_model->d_ff, k=1, bias=False)
            "w2": w(ks[9], (D, DFF), DFF),    # Conv1d(d_ff->d_model, k=1, bias=False)
        })
    gamma = jnp.ones((1, D), jnp.float32)
    beta = jnp.zeros((1, D), jnp.float32)
    return layer_params, gamma, beta


# ---------------- pure-JAX reference (for verification) ----------------
def _ref_layer(x, p, avg_mat):
    bx, lx, dx = x.shape
    q = (x @ p["wq"].T + p["bq"]).reshape(bx, lx, H, E)
    k = (x @ p["wk"].T + p["bk"]).reshape(bx, lx, H, E)
    v = (x @ p["wv"].T + p["bv"]).reshape(bx, lx, H, E)
    s = jnp.einsum("blhe,bshe->bhls", q, k) / math.sqrt(E)
    a = jax.nn.softmax(s, axis=-1)
    ctx = jnp.einsum("bhls,bshe->blhe", a, v).reshape(bx, lx, dx)
    x1 = x + (ctx @ p["wo"].T + p["bo"])
    s1 = x1 - jnp.einsum("ls,bsd->bld", avg_mat, x1)
    y = jax.nn.relu(s1 @ p["w1"].T) @ p["w2"].T
    z = s1 + y
    return z - jnp.einsum("ls,bsd->bld", avg_mat, z)


def _ref_encoder(x, layer_params, avg_mat, gamma, beta):
    for p in layer_params:
        x = _ref_layer(x, p, avg_mat)
    mu = x.mean(-1, keepdims=True)
    var = ((x - mu) ** 2).mean(-1, keepdims=True)
    xh = (x - mu) / jnp.sqrt(var + EPS) * gamma + beta
    return xh - xh.mean(axis=1, keepdims=True)


if __name__ == "__main__":
    key = jax.random.PRNGKey(0)
    kx, kp = jax.random.split(key)
    x = jax.random.normal(kx, (B, L, D), jnp.float32)
    layer_params, gamma, beta = init_params(kp)

    # nb = batch elements per grid step:
    #   single-core v5e/v6e -> fold the batch (one step, 32-row MXU fills)
    #   dual-core  v7x      -> one batch element per TensorCore (grid=(B,))
    nb = 1 if (_tensorcores_per_chip() >= 2 and B > 1) else B

    packed = pack_encoder_params(layer_params, gamma, beta, L, nb)   # one-time, cached
    out, attns = encoder_forward(x, packed, nb, check_padding=True)
    out = jax.block_until_ready(out)

    ref = jax.block_until_ready(
        _ref_encoder(x, layer_params, make_avg_block_diag(L, MA_K, 1), gamma, beta))

    assert out.shape == (B, L, D) and len(attns) == N_LAYERS
    max_err = float(jnp.max(jnp.abs(out - ref)))
    # Weights/activations feeding the MXU are bf16 (per perf review: halves
    # weight DMA); vs. the full-f32 reference this gives O(1e-2) absolute error.
    # Genuine layout / head-mapping / padding bugs produce O(0.3+) errors, and
    # the exact padded-lane zero check above catches packing regressions.
    assert max_err < 5e-2, f"max_err={max_err}"
    print("KERNEL_OK")
</pallas_src>

<mosaic_0001>
module attributes {stable_mosaic.version = 11 : i64} {
  func.func @_encoder_kernel(%arg0: i32, %arg1: memref<2x16x128xbf16, #tpu.memory_space<vmem>>, %arg2: memref<2x128x128xbf16, #tpu.memory_space<vmem>>, %arg3: memref<2x1x128xf32, #tpu.memory_space<vmem>>, %arg4: memref<2x32x128xbf16, #tpu.memory_space<vmem>>, %arg5: memref<2x128x128xbf16, #tpu.memory_space<vmem>>, %arg6: memref<2x128x128xbf16, #tpu.memory_space<vmem>>, %arg7: memref<32x32xf32, #tpu.memory_space<vmem>>, %arg8: memref<1x128xf32, #tpu.memory_space<vmem>>, %arg9: memref<1x128xf32, #tpu.memory_space<vmem>>, %arg10: memref<2x16x128xf32, #tpu.memory_space<vmem>>) attributes {dimension_semantics = [#tpu.dimension_semantics<parallel>], iteration_bounds = array<i64: 1>, scalar_prefetch = 0 : i64, scratch_operands = 0 : i64, tpu.core_type = #tpu.core_type<tc>, window_params = [{transform_indices = @transform_0, window_bounds = array<i64: 2, 16, 128>}, {pipeline_mode = #tpu.pipeline_mode<synchronous>, transform_indices = @transform_1, window_bounds = array<i64: 2, 128, 128>}, {pipeline_mode = #tpu.pipeline_mode<synchronous>, transform_indices = @transform_2, window_bounds = array<i64: 2, 1, 128>}, {pipeline_mode = #tpu.pipeline_mode<synchronous>, transform_indices = @transform_3, window_bounds = array<i64: 2, 32, 128>}, {pipeline_mode = #tpu.pipeline_mode<synchronous>, transform_indices = @transform_4, window_bounds = array<i64: 2, 128, 128>}, {pipeline_mode = #tpu.pipeline_mode<synchronous>, transform_indices = @transform_5, window_bounds = array<i64: 2, 128, 128>}, {pipeline_mode = #tpu.pipeline_mode<synchronous>, transform_indices = @transform_6, window_bounds = array<i64: 32, 32>}, {pipeline_mode = #tpu.pipeline_mode<synchronous>, transform_indices = @transform_7, window_bounds = array<i64: 1, 128>}, {pipeline_mode = #tpu.pipeline_mode<synchronous>, transform_indices = @transform_8, window_bounds = array<i64: 1, 128>}, {transform_indices = @transform_9, window_bounds = array<i64: 2, 16, 128>}]} {
    %c0 = arith.constant 0 : index
    %c0_0 = arith.constant 0 : index
    %c0_1 = arith.constant 0 : index
    %0 = vector.load %arg1[%c0, %c0_0, %c0_1] : memref<2x16x128xbf16, #tpu.memory_space<vmem>>, vector<2x16x128xbf16>
    %1 = vector.shape_cast %0 : vector<2x16x128xbf16> to vector<32x128xbf16>
    %2 = arith.extf %1 : vector<32x128xbf16> to vector<32x128xf32>
    %c0_2 = arith.constant 0 : index
    %c0_3 = arith.constant 0 : index
    %3 = vector.load %arg7[%c0_2, %c0_3] : memref<32x32xf32, #tpu.memory_space<vmem>>, vector<32x32xf32>
    %4 = arith.truncf %2 : vector<32x128xf32> to vector<32x128xbf16>
    %c0_4 = arith.constant 0 : index
    %c0_5 = arith.constant 0 : index
    %c0_6 = arith.constant 0 : index
    %5 = vector.load %arg2[%c0_4, %c0_5, %c0_6] : memref<2x128x128xbf16, #tpu.memory_space<vmem>>, vector<1x128x128xbf16>
    %6 = vector.shape_cast %5 : vector<1x128x128xbf16> to vector<128x128xbf16>
    %cst = arith.constant dense<0.000000e+00> : vector<32x128xf32>
    %7 = tpu.matmul %4, %6, %cst {dimension_numbers = #tpu.dot_dimension_numbers<[1], [0], [0], [1], [0, 0, 1, 1], [], []>} : vector<32x128xbf16>, vector<128x128xbf16>, vector<32x128xf32> -> vector<32x128xf32>
    %c0_7 = arith.constant 0 : index
    %c0_8 = arith.constant 0 : index
    %c0_9 = arith.constant 0 : index
    %8 = vector.load %arg3[%c0_7, %c0_8, %c0_9] : memref<2x1x128xf32, #tpu.memory_space<vmem>>, vector<1x1x128xf32>
    %9 = vector.shape_cast %8 : vector<1x1x128xf32> to vector<1x128xf32>
    %10 = vector.broadcast %9 : vector<1x128xf32> to vector<32x128xf32>
    %11 = arith.addf %7, %10 : vector<32x128xf32>
    %12 = vector.extract_strided_slice %11 {offsets = [0, 0], sizes = [16, 8], strides = [1, 1]} : vector<32x128xf32> to vector<16x8xf32>
    %13 = vector.extract_strided_slice %11 {offsets = [0, 32], sizes = [16, 8], strides = [1, 1]} : vector<32x128xf32> to vector<16x8xf32>
    %14 = vector.extract_strided_slice %11 {offsets = [0, 64], sizes = [16, 8], strides = [1, 1]} : vector<32x128xf32> to vector<16x8xf32>
    %cst_10 = arith.constant dense<0.000000e+00> : vector<16x16xf32>
    %15 = tpu.matmul %12, %13, %cst_10 {dimension_numbers = #tpu.dot_dimension_numbers<[1], [1], [0], [0], [0, 0, 1, 0], [], []>} : vector<16x8xf32>, vector<16x8xf32>, vector<16x16xf32> -> vector<16x16xf32>
    %cst_11 = arith.constant 0.353553385 : f32
    %16 = vector.broadcast %cst_11 : f32 to vector<16x16xf32>
    %17 = arith.mulf %15, %16 : vector<16x16xf32>
    %cst_12 = arith.constant dense<0xFF800000> : vector<16xf32>
    %18 = vector.multi_reduction <maximumf>, %17, %cst_12 [1] : vector<16x16xf32> to vector<16xf32>
    %19 = vector.shape_cast %18 : vector<16xf32> to vector<16x1xf32>
    %20 = vector.broadcast %19 : vector<16x1xf32> to vector<16x16xf32>
    %21 = arith.subf %17, %20 : vector<16x16xf32>
    %22 = math.exp %21 : vector<16x16xf32>
    %cst_13 = arith.constant dense<0.000000e+00> : vector<16xf32>
    %23 = vector.multi_reduction <add>, %22, %cst_13 [1] : vector<16x16xf32> to vector<16xf32>
    %24 = vector.shape_cast %23 : vector<16xf32> to vector<16x1xf32>
    %25 = vector.broadcast %24 : vector<16x1xf32> to vector<16x16xf32>
    %26 = arith.divf %22, %25 : vector<16x16xf32>
    %cst_14 = arith.constant dense<0.000000e+00> : vector<16x8xf32>
    %27 = tpu.matmul %26, %14, %cst_14 {dimension_numbers = #tpu.dot_dimension_numbers<[1], [0], [0], [1], [0, 0, 1, 1], [], []>} : vector<16x16xf32>, vector<16x8xf32>, vector<16x8xf32> -> vector<16x8xf32>
    %28 = vector.extract_strided_slice %11 {offsets = [0, 8], sizes = [16, 8], strides = [1, 1]} : vector<32x128xf32> to vector<16x8xf32>
    %29 = vector.extract_strided_slice %11 {offsets = [0, 40], sizes = [16, 8], strides = [1, 1]} : vector<32x128xf32> to vector<16x8xf32>
    %30 = vector.extract_strided_slice %11 {offsets = [0, 72], sizes = [16, 8], strides = [1, 1]} : vector<32x128xf32> to vector<16x8xf32>
    %cst_15 = arith.constant dense<0.000000e+00> : vector<16x16xf32>
    %31 = tpu.matmul %28, %29, %cst_15 {dimension_numbers = #tpu.dot_dimension_numbers<[1], [1], [0], [0], [0, 0, 1, 0], [], []>} : vector<16x8xf32>, vector<16x8xf32>, vector<16x16xf32> -> vector<16x16xf32>
    %cst_16 = arith.constant 0.353553385 : f32
    %32 = vector.broadcast %cst_16 : f32 to vector<16x16xf32>
    %33 = arith.mulf %31, %32 : vector<16x16xf32>
    %cst_17 = arith.constant dense<0xFF800000> : vector<16xf32>
    %34 = vector.multi_reduction <maximumf>, %33, %cst_17 [1] : vector<16x16xf32> to vector<16xf32>
    %35 = vector.shape_cast %34 : vector<16xf32> to vector<16x1xf32>
    %36 = vector.broadcast %35 : vector<16x1xf32> to vector<16x16xf32>
    %37 = arith.subf %33, %36 : vector<16x16xf32>
    %38 = math.exp %37 : vector<16x16xf32>
    %cst_18 = arith.constant dense<0.000000e+00> : vector<16xf32>
    %39 = vector.multi_reduction <add>, %38, %cst_18 [1] : vector<16x16xf32> to vector<16xf32>
    %40 = vector.shape_cast %39 : vector<16xf32> to vector<16x1xf32>
    %41 = vector.broadcast %40 : vector<16x1xf32> to vector<16x16xf32>
    %42 = arith.divf %38, %41 : vector<16x16xf32>
    %cst_19 = arith.constant dense<0.000000e+00> : vector<16x8xf32>
    %43 = tpu.matmul %42, %30, %cst_19 {dimension_numbers = #tpu.dot_dimension_numbers<[1], [0], [0], [1], [0, 0, 1, 1], [], []>} : vector<16x16xf32>, vector<16x8xf32>, vector<16x8xf32> -> vector<16x8xf32>
    %44 = vector.extract_strided_slice %11 {offsets = [0, 16], sizes = [16, 8], strides = [1, 1]} : vector<32x128xf32> to vector<16x8xf32>
    %45 = vector.extract_strided_slice %11 {offsets = [0, 48], sizes = [16, 8], strides = [1, 1]} : vector<32x128xf32> to vector<16x8xf32>
    %46 = vector.extract_strided_slice %11 {offsets = [0, 80], sizes = [16, 8], strides = [1, 1]} : vector<32x128xf32> to vector<16x8xf32>
    %cst_20 = arith.constant dense<0.000000e+00> : vector<16x16xf32>
    %47 = tpu.matmul %44, %45, %cst_20 {dimension_numbers = #tpu.dot_dimension_numbers<[1], [1], [0], [0], [0, 0, 1, 0], [], []>} : vector<16x8xf32>, vector<16x8xf32>, vector<16x16xf32> -> vector<16x16xf32>
    %cst_21 = arith.constant 0.353553385 : f32
    %48 = vector.broadcast %cst_21 : f32 to vector<16x16xf32>
    %49 = arith.mulf %47, %48 : vector<16x16xf32>
    %cst_22 = arith.constant dense<0xFF800000> : vector<16xf32>
    %50 = vector.multi_reduction <maximumf>, %49, %cst_22 [1] : vector<16x16xf32> to vector<16xf32>
    %51 = vector.shape_cast %50 : vector<16xf32> to vector<16x1xf32>
    %52 = vector.broadcast %51 : vector<16x1xf32> to vector<16x16xf32>
    %53 = arith.subf %49, %52 : vector<16x16xf32>
    %54 = math.exp %53 : vector<16x16xf32>
    %cst_23 = arith.constant dense<0.000000e+00> : vector<16xf32>
    %55 = vector.multi_reduction <add>, %54, %cst_23 [1] : vector<16x16xf32> to vector<16xf32>
    %56 = vector.shape_cast %55 : vector<16xf32> to vector<16x1xf32>
    %57 = vector.broadcast %56 : vector<16x1xf32> to vector<16x16xf32>
    %58 = arith.divf %54, %57 : vector<16x16xf32>
    %cst_24 = arith.constant dense<0.000000e+00> : vector<16x8xf32>
    %59 = tpu.matmul %58, %46, %cst_24 {dimension_numbers = #tpu.dot_dimension_numbers<[1], [0], [0], [1], [0, 0, 1, 1], [], []>} : vector<16x16xf32>, vector<16x8xf32>, vector<16x8xf32> -> vector<16x8xf32>
    %60 = vector.extract_strided_slice %11 {offsets = [0, 24], sizes = [16, 8], strides = [1, 1]} : vector<32x128xf32> to vector<16x8xf32>
    %61 = vector.extract_strided_slice %11 {offsets = [0, 56], sizes = [16, 8], strides = [1, 1]} : vector<32x128xf32> to vector<16x8xf32>
    %62 = vector.extract_strided_slice %11 {offsets = [0, 88], sizes = [16, 8], strides = [1, 1]} : vector<32x128xf32> to vector<16x8xf32>
    %cst_25 = arith.constant dense<0.000000e+00> : vector<16x16xf32>
    %63 = tpu.matmul %60, %61, %cst_25 {dimension_numbers = #tpu.dot_dimension_numbers<[1], [1], [0], [0], [0, 0, 1, 0], [], []>} : vector<16x8xf32>, vector<16x8xf32>, vector<16x16xf32> -> vector<16x16xf32>
    %cst_26 = arith.constant 0.353553385 : f32
    %64 = vector.broadcast %cst_26 : f32 to vector<16x16xf32>
    %65 = arith.mulf %63, %64 : vector<16x16xf32>
    %cst_27 = arith.constant dense<0xFF800000> : vector<16xf32>
    %66 = vector.multi_reduction <maximumf>, %65, %cst_27 [1] : vector<16x16xf32> to vector<16xf32>
    %67 = vector.shape_cast %66 : vector<16xf32> to vector<16x1xf32>
    %68 = vector.broadcast %67 : vector<16x1xf32> to vector<16x16xf32>
    %69 = arith.subf %65, %68 : vector<16x16xf32>
    %70 = math.exp %69 : vector<16x16xf32>
    %cst_28 = arith.constant dense<0.000000e+00> : vector<16xf32>
    %71 = vector.multi_reduction <add>, %70, %cst_28 [1] : vector<16x16xf32> to vector<16xf32>
    %72 = vector.shape_cast %71 : vector<16xf32> to vector<16x1xf32>
    %73 = vector.broadcast %72 : vector<16x1xf32> to vector<16x16xf32>
    %74 = arith.divf %70, %73 : vector<16x16xf32>
    %cst_29 = arith.constant dense<0.000000e+00> : vector<16x8xf32>
    %75 = tpu.matmul %74, %62, %cst_29 {dimension_numbers = #tpu.dot_dimension_numbers<[1], [0], [0], [1], [0, 0, 1, 1], [], []>} : vector<16x16xf32>, vector<16x8xf32>, vector<16x8xf32> -> vector<16x8xf32>
    %76 = tpu.concatenate %27, %43, %59, %75 in 1 : vector<16x8xf32>, vector<16x8xf32>, vector<16x8xf32>, vector<16x8xf32> -> vector<16x32xf32>
    %77 = vector.extract_strided_slice %11 {offsets = [16, 0], sizes = [16, 8], strides = [1, 1]} : vector<32x128xf32> to vector<16x8xf32>
    %78 = vector.extract_strided_slice %11 {offsets = [16, 32], sizes = [16, 8], strides = [1, 1]} : vector<32x128xf32> to vector<16x8xf32>
    %79 = vector.extract_strided_slice %11 {offsets = [16, 64], sizes = [16, 8], strides = [1, 1]} : vector<32x128xf32> to vector<16x8xf32>
    %cst_30 = arith.constant dense<0.000000e+00> : vector<16x16xf32>
    %80 = tpu.matmul %77, %78, %cst_30 {dimension_numbers = #tpu.dot_dimension_numbers<[1], [1], [0], [0], [0, 0, 1, 0], [], []>} : vector<16x8xf32>, vector<16x8xf32>, vector<16x16xf32> -> vector<16x16xf32>
    %cst_31 = arith.constant 0.353553385 : f32
    %81 = vector.broadcast %cst_31 : f32 to vector<16x16xf32>
    %82 = arith.mulf %80, %81 : vector<16x16xf32>
    %cst_32 = arith.constant dense<0xFF800000> : vector<16xf32>
    %83 = vector.multi_reduction <maximumf>, %82, %cst_32 [1] : vector<16x16xf32> to vector<16xf32>
    %84 = vector.shape_cast %83 : vector<16xf32> to vector<16x1xf32>
    %85 = vector.broadcast %84 : vector<16x1xf32> to vector<16x16xf32>
    %86 = arith.subf %82, %85 : vector<16x16xf32>
    %87 = math.exp %86 : vector<16x16xf32>
    %cst_33 = arith.constant dense<0.000000e+00> : vector<16xf32>
    %88 = vector.multi_reduction <add>, %87, %cst_33 [1] : vector<16x16xf32> to vector<16xf32>
    %89 = vector.shape_cast %88 : vector<16xf32> to vector<16x1xf32>
    %90 = vector.broadcast %89 : vector<16x1xf32> to vector<16x16xf32>
    %91 = arith.divf %87, %90 : vector<16x16xf32>
    %cst_34 = arith.constant dense<0.000000e+00> : vector<16x8xf32>
    %92 = tpu.matmul %91, %79, %cst_34 {dimension_numbers = #tpu.dot_dimension_numbers<[1], [0], [0], [1], [0, 0, 1, 1], [], []>} : vector<16x16xf32>, vector<16x8xf32>, vector<16x8xf32> -> vector<16x8xf32>
    %93 = vector.extract_strided_slice %11 {offsets = [16, 8], sizes = [16, 8], strides = [1, 1]} : vector<32x128xf32> to vector<16x8xf32>
    %94 = vector.extract_strided_slice %11 {offsets = [16, 40], sizes = [16, 8], strides = [1, 1]} : vector<32x128xf32> to vector<16x8xf32>
    %95 = vector.extract_strided_slice %11 {offsets = [16, 72], sizes = [16, 8], strides = [1, 1]} : vector<32x128xf32> to vector<16x8xf32>
    %cst_35 = arith.constant dense<0.000000e+00> : vector<16x16xf32>
    %96 = tpu.matmul %93, %94, %cst_35 {dimension_numbers = #tpu.dot_dimension_numbers<[1], [1], [0], [0], [0, 0, 1, 0], [], []>} : vector<16x8xf32>, vector<16x8xf32>, vector<16x16xf32> -> vector<16x16xf32>
    %cst_36 = arith.constant 0.353553385 : f32
    %97 = vector.broadcast %cst_36 : f32 to vector<16x16xf32>
    %98 = arith.mulf %96, %97 : vector<16x16xf32>
    %cst_37 = arith.constant dense<0xFF800000> : vector<16xf32>
    %99 = vector.multi_reduction <maximumf>, %98, %cst_37 [1] : vector<16x16xf32> to vector<16xf32>
    %100 = vector.shape_cast %99 : vector<16xf32> to vector<16x1xf32>
    %101 = vector.broadcast %100 : vector<16x1xf32> to vector<16x16xf32>
    %102 = arith.subf %98, %101 : vector<16x16xf32>
    %103 = math.exp %102 : vector<16x16xf32>
    %cst_38 = arith.constant dense<0.000000e+00> : vector<16xf32>
    %104 = vector.multi_reduction <add>, %103, %cst_38 [1] : vector<16x16xf32> to vector<16xf32>
    %105 = vector.shape_cast %104 : vector<16xf32> to vector<16x1xf32>
    %106 = vector.broadcast %105 : vector<16x1xf32> to vector<16x16xf32>
    %107 = arith.divf %103, %106 : vector<16x16xf32>
    %cst_39 = arith.constant dense<0.000000e+00> : vector<16x8xf32>
    %108 = tpu.matmul %107, %95, %cst_39 {dimension_numbers = #tpu.dot_dimension_numbers<[1], [0], [0], [1], [0, 0, 1, 1], [], []>} : vector<16x16xf32>, vector<16x8xf32>, vector<16x8xf32> -> vector<16x8xf32>
    %109 = vector.extract_strided_slice %11 {offsets = [16, 16], sizes = [16, 8], strides = [1, 1]} : vector<32x128xf32> to vector<16x8xf32>
    %110 = vector.extract_strided_slice %11 {offsets = [16, 48], sizes = [16, 8], strides = [1, 1]} : vector<32x128xf32> to vector<16x8xf32>
    %111 = vector.extract_strided_slice %11 {offsets = [16, 80], sizes = [16, 8], strides = [1, 1]} : vector<32x128xf32> to vector<16x8xf32>
    %cst_40 = arith.constant dense<0.000000e+00> : vector<16x16xf32>
    %112 = tpu.matmul %109, %110, %cst_40 {dimension_numbers = #tpu.dot_dimension_numbers<[1], [1], [0], [0], [0, 0, 1, 0], [], []>} : vector<16x8xf32>, vector<16x8xf32>, vector<16x16xf32> -> vector<16x16xf32>
    %cst_41 = arith.constant 0.353553385 : f32
    %113 = vector.broadcast %cst_41 : f32 to vector<16x16xf32>
    %114 = arith.mulf %112, %113 : vector<16x16xf32>
    %cst_42 = arith.constant dense<0xFF800000> : vector<16xf32>
    %115 = vector.multi_reduction <maximumf>, %114, %cst_42 [1] : vector<16x16xf32> to vector<16xf32>
    %116 = vector.shape_cast %115 : vector<16xf32> to vector<16x1xf32>
    %117 = vector.broadcast %116 : vector<16x1xf32> to vector<16x16xf32>
    %118 = arith.subf %114, %117 : vector<16x16xf32>
    %119 = math.exp %118 : vector<16x16xf32>
    %cst_43 = arith.constant dense<0.000000e+00> : vector<16xf32>
    %120 = vector.multi_reduction <add>, %119, %cst_43 [1] : vector<16x16xf32> to vector<16xf32>
    %121 = vector.shape_cast %120 : vector<16xf32> to vector<16x1xf32>
    %122 = vector.broadcast %121 : vector<16x1xf32> to vector<16x16xf32>
    %123 = arith.divf %119, %122 : vector<16x16xf32>
    %cst_44 = arith.constant dense<0.000000e+00> : vector<16x8xf32>
    %124 = tpu.matmul %123, %111, %cst_44 {dimension_numbers = #tpu.dot_dimension_numbers<[1], [0], [0], [1], [0, 0, 1, 1], [], []>} : vector<16x16xf32>, vector<16x8xf32>, vector<16x8xf32> -> vector<16x8xf32>
    %125 = vector.extract_strided_slice %11 {offsets = [16, 24], sizes = [16, 8], strides = [1, 1]} : vector<32x128xf32> to vector<16x8xf32>
    %126 = vector.extract_strided_slice %11 {offsets = [16, 56], sizes = [16, 8], strides = [1, 1]} : vector<32x128xf32> to vector<16x8xf32>
    %127 = vector.extract_strided_slice %11 {offsets = [16, 88], sizes = [16, 8], strides = [1, 1]} : vector<32x128xf32> to vector<16x8xf32>
    %cst_45 = arith.constant dense<0.000000e+00> : vector<16x16xf32>
    %128 = tpu.matmul %125, %126, %cst_45 {dimension_numbers = #tpu.dot_dimension_numbers<[1], [1], [0], [0], [0, 0, 1, 0], [], []>} : vector<16x8xf32>, vector<16x8xf32>, vector<16x16xf32> -> vector<16x16xf32>
    %cst_46 = arith.constant 0.353553385 : f32
    %129 = vector.broadcast %cst_46 : f32 to vector<16x16xf32>
    %130 = arith.mulf %128, %129 : vector<16x16xf32>
    %cst_47 = arith.constant dense<0xFF800000> : vector<16xf32>
    %131 = vector.multi_reduction <maximumf>, %130, %cst_47 [1] : vector<16x16xf32> to vector<16xf32>
    %132 = vector.shape_cast %131 : vector<16xf32> to vector<16x1xf32>
    %133 = vector.broadcast %132 : vector<16x1xf32> to vector<16x16xf32>
    %134 = arith.subf %130, %133 : vector<16x16xf32>
    %135 = math.exp %134 : vector<16x16xf32>
    %cst_48 = arith.constant dense<0.000000e+00> : vector<16xf32>
    %136 = vector.multi_reduction <add>, %135, %cst_48 [1] : vector<16x16xf32> to vector<16xf32>
    %137 = vector.shape_cast %136 : vector<16xf32> to vector<16x1xf32>
    %138 = vector.broadcast %137 : vector<16x1xf32> to vector<16x16xf32>
    %139 = arith.divf %135, %138 : vector<16x16xf32>
    %cst_49 = arith.constant dense<0.000000e+00> : vector<16x8xf32>
    %140 = tpu.matmul %139, %127, %cst_49 {dimension_numbers = #tpu.dot_dimension_numbers<[1], [0], [0], [1], [0, 0, 1, 1], [], []>} : vector<16x16xf32>, vector<16x8xf32>, vector<16x8xf32> -> vector<16x8xf32>
    %141 = tpu.concatenate %92, %108, %124, %140 in 1 : vector<16x8xf32>, vector<16x8xf32>, vector<16x8xf32>, vector<16x8xf32> -> vector<16x32xf32>
    %142 = tpu.concatenate %76, %141 in 0 : vector<16x32xf32>, vector<16x32xf32> -> vector<32x32xf32>
    %143 = arith.truncf %142 : vector<32x32xf32> to vector<32x32xbf16>
    %c0_50 = arith.constant 0 : index
    %c0_51 = arith.constant 0 : index
    %c0_52 = arith.constant 0 : index
    %144 = vector.load %arg4[%c0_50, %c0_51, %c0_52] : memref<2x32x128xbf16, #tpu.memory_space<vmem>>, vector<1x32x128xbf16>
    %145 = vector.shape_cast %144 : vector<1x32x128xbf16> to vector<32x128xbf16>
    %cst_53 = arith.constant dense<0.000000e+00> : vector<32x128xf32>
    %146 = tpu.matmul %143, %145, %cst_53 {dimension_numbers = #tpu.dot_dimension_numbers<[1], [0], [0], [1], [0, 0, 1, 1], [], []>} : vector<32x32xbf16>, vector<32x128xbf16>, vector<32x128xf32> -> vector<32x128xf32>
    %147 = arith.addf %2, %146 : vector<32x128xf32>
    %cst_54 = arith.constant dense<0.000000e+00> : vector<32x128xf32>
    %148 = tpu.matmul %3, %147, %cst_54 {dimension_numbers = #tpu.dot_dimension_numbers<[1], [0], [0], [1], [0, 0, 1, 1], [], []>} : vector<32x32xf32>, vector<32x128xf32>, vector<32x128xf32> -> vector<32x128xf32>
    %149 = arith.subf %147, %148 : vector<32x128xf32>
    %150 = arith.truncf %149 : vector<32x128xf32> to vector<32x128xbf16>
    %c0_55 = arith.constant 0 : index
    %c0_56 = arith.constant 0 : index
    %c0_57 = arith.constant 0 : index
    %151 = vector.load %arg5[%c0_55, %c0_56, %c0_57] : memref<2x128x128xbf16, #tpu.memory_space<vmem>>, vector<1x128x128xbf16>
    %152 = vector.shape_cast %151 : vector<1x128x128xbf16> to vector<128x128xbf16>
    %cst_58 = arith.constant dense<0.000000e+00> : vector<32x128xf32>
    %153 = tpu.matmul %150, %152, %cst_58 {dimension_numbers = #tpu.dot_dimension_numbers<[1], [0], [0], [1], [0, 0, 1, 1], [], []>} : vector<32x128xbf16>, vector<128x128xbf16>, vector<32x128xf32> -> vector<32x128xf32>
    %cst_59 = arith.constant 0.000000e+00 : f32
    %154 = vector.broadcast %cst_59 : f32 to vector<32x128xf32>
    %155 = arith.maximumf %153, %154 : vector<32x128xf32>
    %156 = arith.truncf %155 : vector<32x128xf32> to vector<32x128xbf16>
    %c0_60 = arith.constant 0 : index
    %c0_61 = arith.constant 0 : index
    %c0_62 = arith.constant 0 : index
    %157 = vector.load %arg6[%c0_60, %c0_61, %c0_62] : memref<2x128x128xbf16, #tpu.memory_space<vmem>>, vector<1x128x128xbf16>
    %158 = vector.shape_cast %157 : vector<1x128x128xbf16> to vector<128x128xbf16>
    %cst_63 = arith.constant dense<0.000000e+00> : vector<32x128xf32>
    %159 = tpu.matmul %156, %158, %cst_63 {dimension_numbers = #tpu.dot_dimension_numbers<[1], [0], [0], [1], [0, 0, 1, 1], [], []>} : vector<32x128xbf16>, vector<128x128xbf16>, vector<32x128xf32> -> vector<32x128xf32>
    %160 = arith.addf %149, %159 : vector<32x128xf32>
    %cst_64 = arith.constant dense<0.000000e+00> : vector<32x128xf32>
    %161 = tpu.matmul %3, %160, %cst_64 {dimension_numbers = #tpu.dot_dimension_numbers<[1], [0], [0], [1], [0, 0, 1, 1], [], []>} : vector<32x32xf32>, vector<32x128xf32>, vector<32x128xf32> -> vector<32x128xf32>
    %162 = arith.subf %160, %161 : vector<32x128xf32>
    %163 = arith.truncf %162 : vector<32x128xf32> to vector<32x128xbf16>
    %c1 = arith.constant 1 : index
    %c0_65 = arith.constant 0 : index
    %c0_66 = arith.constant 0 : index
    %164 = vector.load %arg2[%c1, %c0_65, %c0_66] : memref<2x128x128xbf16, #tpu.memory_space<vmem>>, vector<1x128x128xbf16>
    %165 = vector.shape_cast %164 : vector<1x128x128xbf16> to vector<128x128xbf16>
    %cst_67 = arith.constant dense<0.000000e+00> : vector<32x128xf32>
    %166 = tpu.matmul %163, %165, %cst_67 {dimension_numbers = #tpu.dot_dimension_numbers<[1], [0], [0], [1], [0, 0, 1, 1], [], []>} : vector<32x128xbf16>, vector<128x128xbf16>, vector<32x128xf32> -> vector<32x128xf32>
    %c1_68 = arith.constant 1 : index
    %c0_69 = arith.constant 0 : index
    %c0_70 = arith.constant 0 : index
    %167 = vector.load %arg3[%c1_68, %c0_69, %c0_70] : memref<2x1x128xf32, #tpu.memory_space<vmem>>, vector<1x1x128xf32>
    %168 = vector.shape_cast %167 : vector<1x1x128xf32> to vector<1x128xf32>
    %169 = vector.broadcast %168 : vector<1x128xf32> to vector<32x128xf32>
    %170 = arith.addf %166, %169 : vector<32x128xf32>
    %171 = vector.extract_strided_slice %170 {offsets = [0, 0], sizes = [16, 8], strides = [1, 1]} : vector<32x128xf32> to vector<16x8xf32>
    %172 = vector.extract_strided_slice %170 {offsets = [0, 32], sizes = [16, 8], strides = [1, 1]} : vector<32x128xf32> to vector<16x8xf32>
    %173 = vector.extract_strided_slice %170 {offsets = [0, 64], sizes = [16, 8], strides = [1, 1]} : vector<32x128xf32> to vector<16x8xf32>
    %cst_71 = arith.constant dense<0.000000e+00> : vector<16x16xf32>
    %174 = tpu.matmul %171, %172, %cst_71 {dimension_numbers = #tpu.dot_dimension_numbers<[1], [1], [0], [0], [0, 0, 1, 0], [], []>} : vector<16x8xf32>, vector<16x8xf32>, vector<16x16xf32> -> vector<16x16xf32>
    %cst_72 = arith.constant 0.353553385 : f32
    %175 = vector.broadcast %cst_72 : f32 to vector<16x16xf32>
    %176 = arith.mulf %174, %175 : vector<16x16xf32>
    %cst_73 = arith.constant dense<0xFF800000> : vector<16xf32>
    %177 = vector.multi_reduction <maximumf>, %176, %cst_73 [1] : vector<16x16xf32> to vector<16xf32>
    %178 = vector.shape_cast %177 : vector<16xf32> to vector<16x1xf32>
    %179 = vector.broadcast %178 : vector<16x1xf32> to vector<16x16xf32>
    %180 = arith.subf %176, %179 : vector<16x16xf32>
    %181 = math.exp %180 : vector<16x16xf32>
    %cst_74 = arith.constant dense<0.000000e+00> : vector<16xf32>
    %182 = vector.multi_reduction <add>, %181, %cst_74 [1] : vector<16x16xf32> to vector<16xf32>
    %183 = vector.shape_cast %182 : vector<16xf32> to vector<16x1xf32>
    %184 = vector.broadcast %183 : vector<16x1xf32> to vector<16x16xf32>
    %185 = arith.divf %181, %184 : vector<16x16xf32>
    %cst_75 = arith.constant dense<0.000000e+00> : vector<16x8xf32>
    %186 = tpu.matmul %185, %173, %cst_75 {dimension_numbers = #tpu.dot_dimension_numbers<[1], [0], [0], [1], [0, 0, 1, 1], [], []>} : vector<16x16xf32>, vector<16x8xf32>, vector<16x8xf32> -> vector<16x8xf32>
    %187 = vector.extract_strided_slice %170 {offsets = [0, 8], sizes = [16, 8], strides = [1, 1]} : vector<32x128xf32> to vector<16x8xf32>
    %188 = vector.extract_strided_slice %170 {offsets = [0, 40], sizes = [16, 8], strides = [1, 1]} : vector<32x128xf32> to vector<16x8xf32>
    %189 = vector.extract_strided_slice %170 {offsets = [0, 72], sizes = [16, 8], strides = [1, 1]} : vector<32x128xf32> to vector<16x8xf32>
    %cst_76 = arith.constant dense<0.000000e+00> : vector<16x16xf32>
    %190 = tpu.matmul %187, %188, %cst_76 {dimension_numbers = #tpu.dot_dimension_numbers<[1], [1], [0], [0], [0, 0, 1, 0], [], []>} : vector<16x8xf32>, vector<16x8xf32>, vector<16x16xf32> -> vector<16x16xf32>
    %cst_77 = arith.constant 0.353553385 : f32
    %191 = vector.broadcast %cst_77 : f32 to vector<16x16xf32>
    %192 = arith.mulf %190, %191 : vector<16x16xf32>
    %cst_78 = arith.constant dense<0xFF800000> : vector<16xf32>
    %193 = vector.multi_reduction <maximumf>, %192, %cst_78 [1] : vector<16x16xf32> to vector<16xf32>
    %194 = vector.shape_cast %193 : vector<16xf32> to vector<16x1xf32>
    %195 = vector.broadcast %194 : vector<16x1xf32> to vector<16x16xf32>
    %196 = arith.subf %192, %195 : vector<16x16xf32>
    %197 = math.exp %196 : vector<16x16xf32>
    %cst_79 = arith.constant dense<0.000000e+00> : vector<16xf32>
    %198 = vector.multi_reduction <add>, %197, %cst_79 [1] : vector<16x16xf32> to vector<16xf32>
    %199 = vector.shape_cast %198 : vector<16xf32> to vector<16x1xf32>
    %200 = vector.broadcast %199 : vector<16x1xf32> to vector<16x16xf32>
    %201 = arith.divf %197, %200 : vector<16x16xf32>
    %cst_80 = arith.constant dense<0.000000e+00> : vector<16x8xf32>
    %202 = tpu.matmul %201, %189, %cst_80 {dimension_numbers = #tpu.dot_dimension_numbers<[1], [0], [0], [1], [0, 0, 1, 1], [], []>} : vector<16x16xf32>, vector<16x8xf32>, vector<16x8xf32> -> vector<16x8xf32>
    %203 = vector.extract_strided_slice %170 {offsets = [0, 16], sizes = [16, 8], strides = [1, 1]} : vector<32x128xf32> to vector<16x8xf32>
    %204 = vector.extract_strided_slice %170 {offsets = [0, 48], sizes = [16, 8], strides = [1, 1]} : vector<32x128xf32> to vector<16x8xf32>
    %205 = vector.extract_strided_slice %170 {offsets = [0, 80], sizes = [16, 8], strides = [1, 1]} : vector<32x128xf32> to vector<16x8xf32>
    %cst_81 = arith.constant dense<0.000000e+00> : vector<16x16xf32>
    %206 = tpu.matmul %203, %204, %cst_81 {dimension_numbers = #tpu.dot_dimension_numbers<[1], [1], [0], [0], [0, 0, 1, 0], [], []>} : vector<16x8xf32>, vector<16x8xf32>, vector<16x16xf32> -> vector<16x16xf32>
    %cst_82 = arith.constant 0.353553385 : f32
    %207 = vector.broadcast %cst_82 : f32 to vector<16x16xf32>
    %208 = arith.mulf %206, %207 : vector<16x16xf32>
    %cst_83 = arith.constant dense<0xFF800000> : vector<16xf32>
    %209 = vector.multi_reduction <maximumf>, %208, %cst_83 [1] : vector<16x16xf32> to vector<16xf32>
    %210 = vector.shape_cast %209 : vector<16xf32> to vector<16x1xf32>
    %211 = vector.broadcast %210 : vector<16x1xf32> to vector<16x16xf32>
    %212 = arith.subf %208, %211 : vector<16x16xf32>
    %213 = math.exp %212 : vector<16x16xf32>
    %cst_84 = arith.constant dense<0.000000e+00> : vector<16xf32>
    %214 = vector.multi_reduction <add>, %213, %cst_84 [1] : vector<16x16xf32> to vector<16xf32>
    %215 = vector.shape_cast %214 : vector<16xf32> to vector<16x1xf32>
    %216 = vector.broadcast %215 : vector<16x1xf32> to vector<16x16xf32>
    %217 = arith.divf %213, %216 : vector<16x16xf32>
    %cst_85 = arith.constant dense<0.000000e+00> : vector<16x8xf32>
    %218 = tpu.matmul %217, %205, %cst_85 {dimension_numbers = #tpu.dot_dimension_numbers<[1], [0], [0], [1], [0, 0, 1, 1], [], []>} : vector<16x16xf32>, vector<16x8xf32>, vector<16x8xf32> -> vector<16x8xf32>
    %219 = vector.extract_strided_slice %170 {offsets = [0, 24], sizes = [16, 8], strides = [1, 1]} : vector<32x128xf32> to vector<16x8xf32>
    %220 = vector.extract_strided_slice %170 {offsets = [0, 56], sizes = [16, 8], strides = [1, 1]} : vector<32x128xf32> to vector<16x8xf32>
    %221 = vector.extract_strided_slice %170 {offsets = [0, 88], sizes = [16, 8], strides = [1, 1]} : vector<32x128xf32> to vector<16x8xf32>
    %cst_86 = arith.constant dense<0.000000e+00> : vector<16x16xf32>
    %222 = tpu.matmul %219, %220, %cst_86 {dimension_numbers = #tpu.dot_dimension_numbers<[1], [1], [0], [0], [0, 0, 1, 0], [], []>} : vector<16x8xf32>, vector<16x8xf32>, vector<16x16xf32> -> vector<16x16xf32>
    %cst_87 = arith.constant 0.353553385 : f32
    %223 = vector.broadcast %cst_87 : f32 to vector<16x16xf32>
    %224 = arith.mulf %222, %223 : vector<16x16xf32>
    %cst_88 = arith.constant dense<0xFF800000> : vector<16xf32>
    %225 = vector.multi_reduction <maximumf>, %224, %cst_88 [1] : vector<16x16xf32> to vector<16xf32>
    %226 = vector.shape_cast %225 : vector<16xf32> to vector<16x1xf32>
    %227 = vector.broadcast %226 : vector<16x1xf32> to vector<16x16xf32>
    %228 = arith.subf %224, %227 : vector<16x16xf32>
    %229 = math.exp %228 : vector<16x16xf32>
    %cst_89 = arith.constant dense<0.000000e+00> : vector<16xf32>
    %230 = vector.multi_reduction <add>, %229, %cst_89 [1] : vector<16x16xf32> to vector<16xf32>
    %231 = vector.shape_cast %230 : vector<16xf32> to vector<16x1xf32>
    %232 = vector.broadcast %231 : vector<16x1xf32> to vector<16x16xf32>
    %233 = arith.divf %229, %232 : vector<16x16xf32>
    %cst_90 = arith.constant dense<0.000000e+00> : vector<16x8xf32>
    %234 = tpu.matmul %233, %221, %cst_90 {dimension_numbers = #tpu.dot_dimension_numbers<[1], [0], [0], [1], [0, 0, 1, 1], [], []>} : vector<16x16xf32>, vector<16x8xf32>, vector<16x8xf32> -> vector<16x8xf32>
    %235 = tpu.concatenate %186, %202, %218, %234 in 1 : vector<16x8xf32>, vector<16x8xf32>, vector<16x8xf32>, vector<16x8xf32> -> vector<16x32xf32>
    %236 = vector.extract_strided_slice %170 {offsets = [16, 0], sizes = [16, 8], strides = [1, 1]} : vector<32x128xf32> to vector<16x8xf32>
    %237 = vector.extract_strided_slice %170 {offsets = [16, 32], sizes = [16, 8], strides = [1, 1]} : vector<32x128xf32> to vector<16x8xf32>
    %238 = vector.extract_strided_slice %170 {offsets = [16, 64], sizes = [16, 8], strides = [1, 1]} : vector<32x128xf32> to vector<16x8xf32>
    %cst_91 = arith.constant dense<0.000000e+00> : vector<16x16xf32>
    %239 = tpu.matmul %236, %237, %cst_91 {dimension_numbers = #tpu.dot_dimension_numbers<[1], [1], [0], [0], [0, 0, 1, 0], [], []>} : vector<16x8xf32>, vector<16x8xf32>, vector<16x16xf32> -> vector<16x16xf32>
    %cst_92 = arith.constant 0.353553385 : f32
    %240 = vector.broadcast %cst_92 : f32 to vector<16x16xf32>
    %241 = arith.mulf %239, %240 : vector<16x16xf32>
    %cst_93 = arith.constant dense<0xFF800000> : vector<16xf32>
    %242 = vector.multi_reduction <maximumf>, %241, %cst_93 [1] : vector<16x16xf32> to vector<16xf32>
    %243 = vector.shape_cast %242 : vector<16xf32> to vector<16x1xf32>
    %244 = vector.broadcast %243 : vector<16x1xf32> to vector<16x16xf32>
    %245 = arith.subf %241, %244 : vector<16x16xf32>
    %246 = math.exp %245 : vector<16x16xf32>
    %cst_94 = arith.constant dense<0.000000e+00> : vector<16xf32>
    %247 = vector.multi_reduction <add>, %246, %cst_94 [1] : vector<16x16xf32> to vector<16xf32>
    %248 = vector.shape_cast %247 : vector<16xf32> to vector<16x1xf32>
    %249 = vector.broadcast %248 : vector<16x1xf32> to vector<16x16xf32>
    %250 = arith.divf %246, %249 : vector<16x16xf32>
    %cst_95 = arith.constant dense<0.000000e+00> : vector<16x8xf32>
    %251 = tpu.matmul %250, %238, %cst_95 {dimension_numbers = #tpu.dot_dimension_numbers<[1], [0], [0], [1], [0, 0, 1, 1], [], []>} : vector<16x16xf32>, vector<16x8xf32>, vector<16x8xf32> -> vector<16x8xf32>
    %252 = vector.extract_strided_slice %170 {offsets = [16, 8], sizes = [16, 8], strides = [1, 1]} : vector<32x128xf32> to vector<16x8xf32>
    %253 = vector.extract_strided_slice %170 {offsets = [16, 40], sizes = [16, 8], strides = [1, 1]} : vector<32x128xf32> to vector<16x8xf32>
    %254 = vector.extract_strided_slice %170 {offsets = [16, 72], sizes = [16, 8], strides = [1, 1]} : vector<32x128xf32> to vector<16x8xf32>
    %cst_96 = arith.constant dense<0.000000e+00> : vector<16x16xf32>
    %255 = tpu.matmul %252, %253, %cst_96 {dimension_numbers = #tpu.dot_dimension_numbers<[1], [1], [0], [0], [0, 0, 1, 0], [], []>} : vector<16x8xf32>, vector<16x8xf32>, vector<16x16xf32> -> vector<16x16xf32>
    %cst_97 = arith.constant 0.353553385 : f32
    %256 = vector.broadcast %cst_97 : f32 to vector<16x16xf32>
    %257 = arith.mulf %255, %256 : vector<16x16xf32>
    %cst_98 = arith.constant dense<0xFF800000> : vector<16xf32>
    %258 = vector.multi_reduction <maximumf>, %257, %cst_98 [1] : vector<16x16xf32> to vector<16xf32>
    %259 = vector.shape_cast %258 : vector<16xf32> to vector<16x1xf32>
    %260 = vector.broadcast %259 : vector<16x1xf32> to vector<16x16xf32>
    %261 = arith.subf %257, %260 : vector<16x16xf32>
    %262 = math.exp %261 : vector<16x16xf32>
    %cst_99 = arith.constant dense<0.000000e+00> : vector<16xf32>
    %263 = vector.multi_reduction <add>, %262, %cst_99 [1] : vector<16x16xf32> to vector<16xf32>
    %264 = vector.shape_cast %263 : vector<16xf32> to vector<16x1xf32>
    %265 = vector.broadcast %264 : vector<16x1xf32> to vector<16x16xf32>
    %266 = arith.divf %262, %265 : vector<16x16xf32>
    %cst_100 = arith.constant dense<0.000000e+00> : vector<16x8xf32>
    %267 = tpu.matmul %266, %254, %cst_100 {dimension_numbers = #tpu.dot_dimension_numbers<[1], [0], [0], [1], [0, 0, 1, 1], [], []>} : vector<16x16xf32>, vector<16x8xf32>, vector<16x8xf32> -> vector<16x8xf32>
    %268 = vector.extract_strided_slice %170 {offsets = [16, 16], sizes = [16, 8], strides = [1, 1]} : vector<32x128xf32> to vector<16x8xf32>
    %269 = vector.extract_strided_slice %170 {offsets = [16, 48], sizes = [16, 8], strides = [1, 1]} : vector<32x128xf32> to vector<16x8xf32>
    %270 = vector.extract_strided_slice %170 {offsets = [16, 80], sizes = [16, 8], strides = [1, 1]} : vector<32x128xf32> to vector<16x8xf32>
    %cst_101 = arith.constant dense<0.000000e+00> : vector<16x16xf32>
    %271 = tpu.matmul %268, %269, %cst_101 {dimension_numbers = #tpu.dot_dimension_numbers<[1], [1], [0], [0], [0, 0, 1, 0], [], []>} : vector<16x8xf32>, vector<16x8xf32>, vector<16x16xf32> -> vector<16x16xf32>
    %cst_102 = arith.constant 0.353553385 : f32
    %272 = vector.broadcast %cst_102 : f32 to vector<16x16xf32>
    %273 = arith.mulf %271, %272 : vector<16x16xf32>
    %cst_103 = arith.constant dense<0xFF800000> : vector<16xf32>
    %274 = vector.multi_reduction <maximumf>, %273, %cst_103 [1] : vector<16x16xf32> to vector<16xf32>
    %275 = vector.shape_cast %274 : vector<16xf32> to vector<16x1xf32>
    %276 = vector.broadcast %275 : vector<16x1xf32> to vector<16x16xf32>
    %277 = arith.subf %273, %276 : vector<16x16xf32>
    %278 = math.exp %277 : vector<16x16xf32>
    %cst_104 = arith.constant dense<0.000000e+00> : vector<16xf32>
    %279 = vector.multi_reduction <add>, %278, %cst_104 [1] : vector<16x16xf32> to vector<16xf32>
    %280 = vector.shape_cast %279 : vector<16xf32> to vector<16x1xf32>
    %281 = vector.broadcast %280 : vector<16x1xf32> to vector<16x16xf32>
    %282 = arith.divf %278, %281 : vector<16x16xf32>
    %cst_105 = arith.constant dense<0.000000e+00> : vector<16x8xf32>
    %283 = tpu.matmul %282, %270, %cst_105 {dimension_numbers = #tpu.dot_dimension_numbers<[1], [0], [0], [1], [0, 0, 1, 1], [], []>} : vector<16x16xf32>, vector<16x8xf32>, vector<16x8xf32> -> vector<16x8xf32>
    %284 = vector.extract_strided_slice %170 {offsets = [16, 24], sizes = [16, 8], strides = [1, 1]} : vector<32x128xf32> to vector<16x8xf32>
    %285 = vector.extract_strided_slice %170 {offsets = [16, 56], sizes = [16, 8], strides = [1, 1]} : vector<32x128xf32> to vector<16x8xf32>
    %286 = vector.extract_strided_slice %170 {offsets = [16, 88], sizes = [16, 8], strides = [1, 1]} : vector<32x128xf32> to vector<16x8xf32>
    %cst_106 = arith.constant dense<0.000000e+00> : vector<16x16xf32>
    %287 = tpu.matmul %284, %285, %cst_106 {dimension_numbers = #tpu.dot_dimension_numbers<[1], [1], [0], [0], [0, 0, 1, 0], [], []>} : vector<16x8xf32>, vector<16x8xf32>, vector<16x16xf32> -> vector<16x16xf32>
    %cst_107 = arith.constant 0.353553385 : f32
    %288 = vector.broadcast %cst_107 : f32 to vector<16x16xf32>
    %289 = arith.mulf %287, %288 : vector<16x16xf32>
    %cst_108 = arith.constant dense<0xFF800000> : vector<16xf32>
    %290 = vector.multi_reduction <maximumf>, %289, %cst_108 [1] : vector<16x16xf32> to vector<16xf32>
    %291 = vector.shape_cast %290 : vector<16xf32> to vector<16x1xf32>
    %292 = vector.broadcast %291 : vector<16x1xf32> to vector<16x16xf32>
    %293 = arith.subf %289, %292 : vector<16x16xf32>
    %294 = math.exp %293 : vector<16x16xf32>
    %cst_109 = arith.constant dense<0.000000e+00> : vector<16xf32>
    %295 = vector.multi_reduction <add>, %294, %cst_109 [1] : vector<16x16xf32> to vector<16xf32>
    %296 = vector.shape_cast %295 : vector<16xf32> to vector<16x1xf32>
    %297 = vector.broadcast %296 : vector<16x1xf32> to vector<16x16xf32>
    %298 = arith.divf %294, %297 : vector<16x16xf32>
    %cst_110 = arith.constant dense<0.000000e+00> : vector<16x8xf32>
    %299 = tpu.matmul %298, %286, %cst_110 {dimension_numbers = #tpu.dot_dimension_numbers<[1], [0], [0], [1], [0, 0, 1, 1], [], []>} : vector<16x16xf32>, vector<16x8xf32>, vector<16x8xf32> -> vector<16x8xf32>
    %300 = tpu.concatenate %251, %267, %283, %299 in 1 : vector<16x8xf32>, vector<16x8xf32>, vector<16x8xf32>, vector<16x8xf32> -> vector<16x32xf32>
    %301 = tpu.concatenate %235, %300 in 0 : vector<16x32xf32>, vector<16x32xf32> -> vector<32x32xf32>
    %302 = arith.truncf %301 : vector<32x32xf32> to vector<32x32xbf16>
    %c1_111 = arith.constant 1 : index
    %c0_112 = arith.constant 0 : index
    %c0_113 = arith.constant 0 : index
    %303 = vector.load %arg4[%c1_111, %c0_112, %c0_113] : memref<2x32x128xbf16, #tpu.memory_space<vmem>>, vector<1x32x128xbf16>
    %304 = vector.shape_cast %303 : vector<1x32x128xbf16> to vector<32x128xbf16>
    %cst_114 = arith.constant dense<0.000000e+00> : vector<32x128xf32>
    %305 = tpu.matmul %302, %304, %cst_114 {dimension_numbers = #tpu.dot_dimension_numbers<[1], [0], [0], [1], [0, 0, 1, 1], [], []>} : vector<32x32xbf16>, vector<32x128xbf16>, vector<32x128xf32> -> vector<32x128xf32>
    %306 = arith.addf %162, %305 : vector<32x128xf32>
    %cst_115 = arith.constant dense<0.000000e+00> : vector<32x128xf32>
    %307 = tpu.matmul %3, %306, %cst_115 {dimension_numbers = #tpu.dot_dimension_numbers<[1], [0], [0], [1], [0, 0, 1, 1], [], []>} : vector<32x32xf32>, vector<32x128xf32>, vector<32x128xf32> -> vector<32x128xf32>
    %308 = arith.subf %306, %307 : vector<32x128xf32>
    %309 = arith.truncf %308 : vector<32x128xf32> to vector<32x128xbf16>
    %c1_116 = arith.constant 1 : index
    %c0_117 = arith.constant 0 : index
    %c0_118 = arith.constant 0 : index
    %310 = vector.load %arg5[%c1_116, %c0_117, %c0_118] : memref<2x128x128xbf16, #tpu.memory_space<vmem>>, vector<1x128x128xbf16>
    %311 = vector.shape_cast %310 : vector<1x128x128xbf16> to vector<128x128xbf16>
    %cst_119 = arith.constant dense<0.000000e+00> : vector<32x128xf32>
    %312 = tpu.matmul %309, %311, %cst_119 {dimension_numbers = #tpu.dot_dimension_numbers<[1], [0], [0], [1], [0, 0, 1, 1], [], []>} : vector<32x128xbf16>, vector<128x128xbf16>, vector<32x128xf32> -> vector<32x128xf32>
    %cst_120 = arith.constant 0.000000e+00 : f32
    %313 = vector.broadcast %cst_120 : f32 to vector<32x128xf32>
    %314 = arith.maximumf %312, %313 : vector<32x128xf32>
    %315 = arith.truncf %314 : vector<32x128xf32> to vector<32x128xbf16>
    %c1_121 = arith.constant 1 : index
    %c0_122 = arith.constant 0 : index
    %c0_123 = arith.constant 0 : index
    %316 = vector.load %arg6[%c1_121, %c0_122, %c0_123] : memref<2x128x128xbf16, #tpu.memory_space<vmem>>, vector<1x128x128xbf16>
    %317 = vector.shape_cast %316 : vector<1x128x128xbf16> to vector<128x128xbf16>
    %cst_124 = arith.constant dense<0.000000e+00> : vector<32x128xf32>
    %318 = tpu.matmul %315, %317, %cst_124 {dimension_numbers = #tpu.dot_dimension_numbers<[1], [0], [0], [1], [0, 0, 1, 1], [], []>} : vector<32x128xbf16>, vector<128x128xbf16>, vector<32x128xf32> -> vector<32x128xf32>
    %319 = arith.addf %308, %318 : vector<32x128xf32>
    %cst_125 = arith.constant dense<0.000000e+00> : vector<32x128xf32>
    %320 = tpu.matmul %3, %319, %cst_125 {dimension_numbers = #tpu.dot_dimension_numbers<[1], [0], [0], [1], [0, 0, 1, 1], [], []>} : vector<32x32xf32>, vector<32x128xf32>, vector<32x128xf32> -> vector<32x128xf32>
    %321 = arith.subf %319, %320 : vector<32x128xf32>
    %322 = tpu.iota {dimensions = array<i32: 1>} : vector<32x128xi32>
    %cst_126 = arith.constant dense<0.000000e+00> : vector<32xf32>
    %323 = vector.multi_reduction <add>, %321, %cst_126 [1] : vector<32x128xf32> to vector<32xf32>
    %324 = vector.shape_cast %323 : vector<32xf32> to vector<32x1xf32>
    %cst_127 = arith.constant 3.125000e-02 : f32
    %325 = vector.broadcast %cst_127 : f32 to vector<32x1xf32>
    %326 = arith.mulf %324, %325 : vector<32x1xf32>
    %327 = vector.broadcast %326 : vector<32x1xf32> to vector<32x128xf32>
    %328 = arith.subf %321, %327 : vector<32x128xf32>
    %c32_i32 = arith.constant 32 : i32
    %329 = vector.broadcast %c32_i32 : i32 to vector<32x128xi32>
    %330 = arith.cmpi slt, %322, %329 : vector<32x128xi32>
    %cst_128 = arith.constant 0.000000e+00 : f32
    %331 = vector.broadcast %cst_128 : f32 to vector<32x128xf32>
    %332 = arith.select %330, %328, %331 : vector<32x128xi1>, vector<32x128xf32>
    %333 = arith.mulf %332, %332 : vector<32x128xf32>
    %cst_129 = arith.constant dense<0.000000e+00> : vector<32xf32>
    %334 = vector.multi_reduction <add>, %333, %cst_129 [1] : vector<32x128xf32> to vector<32xf32>
    %335 = vector.shape_cast %334 : vector<32xf32> to vector<32x1xf32>
    %cst_130 = arith.constant 3.125000e-02 : f32
    %336 = vector.broadcast %cst_130 : f32 to vector<32x1xf32>
    %337 = arith.mulf %335, %336 : vector<32x1xf32>
    %cst_131 = arith.constant 9.99999974E-6 : f32
    %338 = vector.broadcast %cst_131 : f32 to vector<32x1xf32>
    %339 = arith.addf %337, %338 : vector<32x1xf32>
    %340 = math.rsqrt %339 : vector<32x1xf32>
    %341 = vector.broadcast %340 : vector<32x1xf32> to vector<32x128xf32>
    %342 = arith.mulf %328, %341 : vector<32x128xf32>
    %c0_132 = arith.constant 0 : index
    %c0_133 = arith.constant 0 : index
    %343 = vector.load %arg8[%c0_132, %c0_133] : memref<1x128xf32, #tpu.memory_space<vmem>>, vector<1x128xf32>
    %344 = vector.broadcast %343 : vector<1x128xf32> to vector<32x128xf32>
    %345 = arith.mulf %342, %344 : vector<32x128xf32>
    %c0_134 = arith.constant 0 : index
    %c0_135 = arith.constant 0 : index
    %346 = vector.load %arg9[%c0_134, %c0_135] : memref<1x128xf32, #tpu.memory_space<vmem>>, vector<1x128xf32>
    %347 = vector.broadcast %346 : vector<1x128xf32> to vector<32x128xf32>
    %348 = arith.addf %345, %347 : vector<32x128xf32>
    %349 = vector.extract_strided_slice %348 {offsets = [0, 0], sizes = [16, 128], strides = [1, 1]} : vector<32x128xf32> to vector<16x128xf32>
    %cst_136 = arith.constant dense<0.000000e+00> : vector<128xf32>
    %350 = vector.multi_reduction <add>, %349, %cst_136 [0] : vector<16x128xf32> to vector<128xf32>
    %351 = vector.shape_cast %350 : vector<128xf32> to vector<1x128xf32>
    %cst_137 = arith.constant 1.600000e+01 : f32
    %352 = vector.broadcast %cst_137 : f32 to vector<1x128xf32>
    %353 = arith.divf %351, %352 : vector<1x128xf32>
    %354 = vector.broadcast %353 : vector<1x128xf32> to vector<16x128xf32>
    %355 = arith.subf %349, %354 : vector<16x128xf32>
    %356 = vector.extract_strided_slice %348 {offsets = [16, 0], sizes = [16, 128], strides = [1, 1]} : vector<32x128xf32> to vector<16x128xf32>
    %cst_138 = arith.constant dense<0.000000e+00> : vector<128xf32>
    %357 = vector.multi_reduction <add>, %356, %cst_138 [0] : vector<16x128xf32> to vector<128xf32>
    %358 = vector.shape_cast %357 : vector<128xf32> to vector<1x128xf32>
    %cst_139 = arith.constant 1.600000e+01 : f32
    %359 = vector.broadcast %cst_139 : f32 to vector<1x128xf32>
    %360 = arith.divf %358, %359 : vector<1x128xf32>
    %361 = vector.broadcast %360 : vector<1x128xf32> to vector<16x128xf32>
    %362 = arith.subf %356, %361 : vector<16x128xf32>
    %363 = tpu.concatenate %355, %362 in 0 : vector<16x128xf32>, vector<16x128xf32> -> vector<32x128xf32>
    %364 = vector.shape_cast %363 : vector<32x128xf32> to vector<2x16x128xf32>
    %c0_140 = arith.constant 0 : index
    %c0_141 = arith.constant 0 : index
    %c0_142 = arith.constant 0 : index
    %365 = vector.load %arg10[%c0_140, %c0_141, %c0_142] : memref<2x16x128xf32, #tpu.memory_space<vmem>>, vector<2x16x128xf32>
    tpu.vector_store %arg10[%c0_140, %c0_141, %c0_142], %364 {strides = array<i32>} : memref<2x16x128xf32, #tpu.memory_space<vmem>>, vector<2x16x128xf32>,
    return
  }
  func.func @transform_0(%arg0: i32) -> (i32, i32, i32) {
    %c0_i32 = arith.constant 0 : i32
    %c0_i32_0 = arith.constant 0 : i32
    %c0_i32_1 = arith.constant 0 : i32
    return %arg0, %c0_i32, %c0_i32_0 : i32, i32, i32
  }
  func.func @transform_1(%arg0: i32) -> (i32, i32, i32) {
    %c0_i32 = arith.constant 0 : i32
    %c0_i32_0 = arith.constant 0 : i32
    %c0_i32_1 = arith.constant 0 : i32
    %c0_i32_2 = arith.constant 0 : i32
    return %c0_i32, %c0_i32_0, %c0_i32_1 : i32, i32, i32
  }
  func.func @transform_2(%arg0: i32) -> (i32, i32, i32) {
    %c0_i32 = arith.constant 0 : i32
    %c0_i32_0 = arith.constant 0 : i32
    %c0_i32_1 = arith.constant 0 : i32
    %c0_i32_2 = arith.constant 0 : i32
    return %c0_i32, %c0_i32_0, %c0_i32_1 : i32, i32, i32
  }
  func.func @transform_3(%arg0: i32) -> (i32, i32, i32) {
    %c0_i32 = arith.constant 0 : i32
    %c0_i32_0 = arith.constant 0 : i32
    %c0_i32_1 = arith.constant 0 : i32
    %c0_i32_2 = arith.constant 0 : i32
    return %c0_i32, %c0_i32_0, %c0_i32_1 : i32, i32, i32
  }
  func.func @transform_4(%arg0: i32) -> (i32, i32, i32) {
    %c0_i32 = arith.constant 0 : i32
    %c0_i32_0 = arith.constant 0 : i32
    %c0_i32_1 = arith.constant 0 : i32
    %c0_i32_2 = arith.constant 0 : i32
    return %c0_i32, %c0_i32_0, %c0_i32_1 : i32, i32, i32
  }
  func.func @transform_5(%arg0: i32) -> (i32, i32, i32) {
    %c0_i32 = arith.constant 0 : i32
    %c0_i32_0 = arith.constant 0 : i32
    %c0_i32_1 = arith.constant 0 : i32
    %c0_i32_2 = arith.constant 0 : i32
    return %c0_i32, %c0_i32_0, %c0_i32_1 : i32, i32, i32
  }
  func.func @transform_6(%arg0: i32) -> (i32, i32) {
    %c0_i32 = arith.constant 0 : i32
    %c0_i32_0 = arith.constant 0 : i32
    %c0_i32_1 = arith.constant 0 : i32
    return %c0_i32, %c0_i32_0 : i32, i32
  }
  func.func @transform_7(%arg0: i32) -> (i32, i32) {
    %c0_i32 = arith.constant 0 : i32
    %c0_i32_0 = arith.constant 0 : i32
    %c0_i32_1 = arith.constant 0 : i32
    return %c0_i32, %c0_i32_0 : i32, i32
  }
  func.func @transform_8(%arg0: i32) -> (i32, i32) {
    %c0_i32 = arith.constant 0 : i32
    %c0_i32_0 = arith.constant 0 : i32
    %c0_i32_1 = arith.constant 0 : i32
    return %c0_i32, %c0_i32_0 : i32, i32
  }
  func.func @transform_9(%arg0: i32) -> (i32, i32, i32) {
    %c0_i32 = arith.constant 0 : i32
    %c0_i32_0 = arith.constant 0 : i32
    %c0_i32_1 = arith.constant 0 : i32
    return %arg0, %c0_i32, %c0_i32_0 : i32, i32, i32
  }
}

</mosaic_0001>

<bundles_post_ra>
// kernel: _encoder_forward_padded.1
= control target key start
LH: loop header
LB: loop body
LE: loop exit
PB: predicated region body
PF: predicated region fallthrough
CT: control target
= control target key end

     0   :  { %14 = vsyncpa [#allocation3], 0  ;;  %s7116_s0 = inlined_call_operand.vmem [shape: bf16[2,16,128], index: 0, kind: input, shape index: {}]   ;;  %s7117_s1 = inlined_call_operand.hbm [shape: bf16[2,128,128], index: 1, kind: input, shape index: {}]   ;;  %s7118_s2 = inlined_call_operand.vmem [shape: f32[2,1,128], index: 2, kind: input, shape index: {}]   ;;  %s7119_s3 = inlined_call_operand.vmem [shape: bf16[2,32,128], index: 3, kind: input, shape index: {}]   ;;  %s7120_s4 = inlined_call_operand.hbm [shape: bf16[2,128,128], index: 4, kind: input, shape index: {}]   ;;  %s7121_s5 = inlined_call_operand.hbm [shape: bf16[2,128,128], index: 5, kind: input, shape index: {}]   ;;  %s7122_s6 = inlined_call_operand.vmem [shape: f32[32,32], index: 6, kind: input, shape index: {}]   ;;  %s7123_s7 = inlined_call_operand.vmem [shape: f32[1,128], index: 7, kind: input, shape index: {}]   ;;  %s7124_s8 = inlined_call_operand.vmem [shape: f32[1,128], index: 8, kind: input, shape index: {}]   ;;  %s7125_s9 = inlined_call_operand.hbm [shape: f32[2,16,128], index: 9, kind: output, shape index: {}]  }
   0x1   :  { %15 = vsyncpa [#allocation6], 0 }
   0x2   :  { %16 = vsyncpa [#allocation4], 0  ;;  %s6355_s30 = smov [#allocation5]   ;;  %s6356_s11 = smov [#allocation2]  }
   0x3   :  { %s40_s10 = sshll.u32 %s6355_s30, 4  ;;  %s24_s12 = sshll.u32 %s6356_s11, 4  ;;  %s41_s10 = int_to_ptr.vmem [resolvable:$true] %s40_s10  ;;  %s6425_s12 = int_to_ptr.vmem [resolvable:$true] %s24_s12 }
   0x4   :  { %s6261_s15 = scalar_lea.hbm %s7120_s4, 2048 }
   0x5   :  { %p6262_p0 = scmp.ne.s32.totalorder %s7120_s4, %s6261_s15  ;;  %p6265_p1 = scmp.lt.u32.totalorder %s6261_s15, %s7120_s4 }
   0x7   :  { %p6267_p2 = pnand %p6265_p1, %p6262_p0 }
   0x9   :  { %6270 = shalt.err (!%p6267_p2)
}
   0xa   :  { %s6271_s20 = scalar_lea.vmem %s41_s10, 2048  ;;  %p6276_p4 = scmp.lt.s32.totalorder %s41_s10, %s41_s10 }
   0xb   :  { %p6272_p3 = scmp.ne.s32.totalorder %s41_s10, %s6271_s20  ;;  %p6277_p5 = scmp.lt.s32.totalorder %s6271_s20, %s6271_s20 }
   0xd   :  { %p6278_p6 = por %p6277_p5, %p6276_p4 }
   0xf   :  { %p6279_p7 = pnand %p6278_p6, %p6272_p3 }
  0x11   :  { %6282 = shalt.err (!%p6279_p7)
}
  0x12   :  { %s6357_s21 = smov 64   ;;  %s6358_s22 = smov 4  }
  0x13   :  { %46 = dma.hbm_to_vmem [thread:$0]  %s7120_s4, 2048, %s41_s10, [#allocation6], %s6357_s21, %s6357_s21, %s6358_s22  }
  0x14   :  { %s6283_s27 = scalar_lea.hbm %s7117_s1, 2048 }
  0x15   :  { %p6284_p8 = scmp.ne.s32.totalorder %s7117_s1, %s6283_s27  ;;  %p6287_p9 = scmp.lt.u32.totalorder %s6283_s27, %s7117_s1 }
  0x17   :  { %p6289_p10 = pnand %p6287_p9, %p6284_p8 }
  0x19   :  { %6292 = shalt.err (!%p6289_p10)
}
  0x1a   :  { %s6293_s13 = scalar_lea.vmem %s6425_s12, 2048  ;;  %p6298_p12 = scmp.lt.s32.totalorder %s6425_s12, %s6425_s12 }
  0x1b   :  { %p6294_p11 = scmp.ne.s32.totalorder %s6425_s12, %s6293_s13  ;;  %p6299_p13 = scmp.lt.s32.totalorder %s6293_s13, %s6293_s13 }
  0x1d   :  { %p6300_p0 = por %p6299_p13, %p6298_p12 }
  0x1f   :  { %p6301_p1 = pnand %p6300_p0, %p6294_p11 }
  0x21   :  { %6304 = shalt.err (!%p6301_p1)
}
  0x22   :  { %30 = dma.hbm_to_vmem [thread:$0]  %s7117_s1, 2048, %s6425_s12, [#allocation3], %s6357_s21, %s6357_s21, %s6358_s22  }
  0x23   :  { %s6359_s14 = smov [#allocation7]   ;;  %s6305_s18 = scalar_lea.hbm %s7121_s5, 2048 }
  0x24   :  { %s52_s15 = sshll.u32 %s6359_s14, 4  ;;  %p6306_p2 = scmp.ne.s32.totalorder %s7121_s5, %s6305_s18  ;;  %s53_s15 = int_to_ptr.vmem [resolvable:$true] %s52_s15 }
  0x25   :  { %p6309_p3 = scmp.lt.u32.totalorder %s6305_s18, %s7121_s5 }
  0x27   :  { %p6311_p4 = pnand %p6309_p3, %p6306_p2 }
  0x29   :  { %6314 = shalt.err (!%p6311_p4)
}
  0x2a   :  { %s6315_s25 = scalar_lea.vmem %s53_s15, 2048  ;;  %p6320_p6 = scmp.lt.s32.totalorder %s53_s15, %s53_s15 }
  0x2b   :  { %p6316_p5 = scmp.ne.s32.totalorder %s53_s15, %s6315_s25  ;;  %p6321_p7 = scmp.lt.s32.totalorder %s6315_s25, %s6315_s25 }
  0x2d   :  { %p6322_p8 = por %p6321_p7, %p6320_p6 }
  0x2f   :  { %p6323_p9 = pnand %p6322_p8, %p6316_p5 }
  0x31   :  { %6326 = shalt.err (!%p6323_p9)
}
  0x32   :  { %58 = dma.hbm_to_vmem [thread:$0]  %s7121_s5, 2048, %s53_s15, [#allocation6], %s6357_s21, %s6357_s21, %s6358_s22  }
  0x33   :  { %6349 = dma.done.wait [#allocation3], 2048  }
  0x34   :  { %6350 = vsyncadd [#allocation3], 4294965248 }
  0x35   :  { %6351 = dma.done.wait [#allocation6], 4096  }
  0x36   :  { %6352 = vsyncadd [#allocation6], 4294963200  ;;  %v6063_v0 = vld [vmem:[#allocation2] sm:$0xff]   ;;  %v6064_v1 = vld [vmem:[#allocation2 + $0x8] sm:$0xff]   ;;  %vm225_vm0 = vcmask 64512   ;;  %s6360_s30 = smov 96  }
  0x37   :  { %5215 = vmatprep.subr.bf16.mxu0 %v6063_v0  ;;  %v6065_v2 = vld [vmem:[#allocation2 + $0x10] sm:$0xff]   ;;  %v6066_v3 = vld [vmem:[#allocation2 + $0x18] sm:$0xff]   ;;  %v75_v4 = vld [vmem:[%s7116_s0] sm:$0xff]   ;;  %vm311_vm2 = vcmask 130048   ;;  %s6361_s11 = smov 88   ;;  %s6362_s13 = smov 120  }
  0x38   :  { %5216 = vmatpush3.bf16.msra.mxu0 %v6063_v0  ;;  %v6067_v5 = vld [vmem:[#allocation2 + $0x20] sm:$0xff]   ;;  %5231 = vmatprep.mubr.bf16.mxu0 %v75_v4  ;;  %v6068_v6 = vld [vmem:[#allocation2 + $0x28] sm:$0xff]   ;;  %v6069_v7 = vld [vmem:[#allocation2 + $0x30] sm:$0xff]   ;;  %s6363_s4 = smov 56   ;;  %s6364_s10 = smov 80   ;;  %vm1055_vm3 = vcmask 195584  }
  0x39   :  { %5217 = vmatprep.subr.bf16.mxu0 %v6064_v1  ;;  %v6070_v8 = vld [vmem:[#allocation2 + $0x38] sm:$0xff]   ;;  %v77_v9 = vld [vmem:[%s7116_s0 + $0x8] sm:$0xff]   ;;  %v4808_v10 = vld [vmem:[%s7118_s2] ss:$0 sm:$0xff]  ;;  %s6365_s14 = smov 72   ;;  %s6366_s15 = smov 104  }
  0x3a   :  { %vm6504_vm1 = vmpackc.low %vm225_vm0, %vm225_vm0  ;;  %s6367_s16 = smov 112   ;;  %s6368_s17 = smov 40   ;;  %vm1912_vm4 = vcmask 261120  }
  0x3b   :  { %s6369_s18 = smov 48   ;;  %s6370_s19 = smov 8  }
  0x3c   :  { %5218 = vmatpush3.bf16.msra.mxu0 %v6064_v1  ;;  %s6371_s20 = smov 16   ;;  %s6372_s23 = smov 24  }
  0x3d   :  { %5219 = vmatprep.subr.bf16.mxu0 %v6065_v2 }
  0x40   :  { %5220 = vmatpush3.bf16.msra.mxu0 %v6065_v2 }
  0x41   :  { %5221 = vmatprep.subr.bf16.mxu0 %v6066_v3 }
  0x44   :  { %5222 = vmatpush3.bf16.msra.mxu0 %v6066_v3 }
  0x45   :  { %5223 = vmatprep.subr.bf16.mxu0 %v6067_v5 }
  0x48   :  { %5224 = vmatpush3.bf16.msra.mxu0 %v6067_v5 }
  0x49   :  { %5225 = vmatprep.subr.bf16.mxu0 %v6068_v6 }
  0x4c   :  { %5226 = vmatpush3.bf16.msra.mxu0 %v6068_v6 }
  0x4d   :  { %5227 = vmatprep.subr.bf16.mxu0 %v6069_v7 }
  0x50   :  { %5228 = vmatpush3.bf16.msra.mxu0 %v6069_v7 }
  0x51   :  { %5229 = vmatprep.subr.bf16.mxu0 %v6070_v8 }
  0x54   :  { %5230 = vmatpush3.bf16.msra.mxu0 %v6070_v8 }
  0x57   :  { %5232 = vmatmul.mubr.bf16.vlgmr.msra.gmra.mrb[0].mxu0 %v77_v9 }
 0x12a   :  { %v5233_v11 = vpop.f32.mrb[0].mxu0 }
 0x12b   :  { %v6486_v12 = vadd.f32 %v5233_v11, %v4808_v10  ;;  %v204_v13 = vpop.f32.mrb[1].mxu0 }
 0x12c   :  { %v6488_v14 = vadd.f32 %v4808_v10, %v204_v13  ;;  %v5234_v15 = vpop.f32.mrb[2].mxu0 }
 0x12d   :  { %v6490_v16 = vadd.f32 %v5234_v15, %v4808_v10  ;;  %v207_v17 = vpop.f32.mrb[3].mxu0 }
 0x12e   :  { %v6492_v18 = vadd.f32 %v4808_v10, %v207_v17  ;;  %5239 = vmatprep.mubr.msk.f32.mxu1 %vm225_vm0, %v6488_v14 }
 0x130   :  { %v6498_v19 = vpack.i.bf16 %v6492_v18, %v6488_v14 }
 0x132   :  { %5844 = vrot.lane.b32.xlu0 %v6498_v19, %s6360_s30 }
 0x1a4   :  { %v5845_v20 = vpop.permute.xlu0 %5844 }
 0x1a5   :  { %v5847_v21 = vunpack.i.h.bf16 %v5845_v20  ;;  %v5846_v22 = vunpack.i.l.bf16 %v5845_v20 }
 0x1a7   :  { %v5631_v24 = vpack.c.bf16 %v5847_v21, %v5846_v22 }
 0x1a9   :  { %5633 = vmatprep.subr.msk.bf16.mxu1 %vm6504_vm1, %v5631_v24 }
 0x1aa   :  { %5636 = vmatpush3.bf16.xpose.msk.msra.mxu1 %vm6504_vm1, %v5631_v24 }
 0x1b1   :  { %5240 = vmatmul.mubr.msk.f32.vlgmr.msra.gmra.mrb[0].mxu1 %vm225_vm0, %v6492_v18 }
 0x284   :  { %v5241_v25 = vpop.f32.mrb[0].mxu1 }
 0x285   :  { %v310_v26 = vmul.f32 0.35355338, %v5241_v25  ;;  %v300_v27 = vpop.f32.mrb[1].mxu1 }
 0x286   :  { %v309_v28 = vmul.f32 0.35355338, %v300_v27 }
 0x287   :  { %v315_v29 = vsel %vm311_vm2, %v310_v26, -inf }
 0x288   :  { %316 = vmax.xlane.f32.xlu1 %v315_v29  ;;  %v312_v30 = vsel %vm311_vm2, %v309_v28, -inf }
 0x289   :  { %313 = vmax.xlane.f32.xlu0 %v312_v30  ;;  %v6568_v30 = vpack.i.bf16 %v6490_v16, %v6486_v12 }
 0x299   :  { %5849 = vrot.lane.b32.xlu1 %v6498_v19, %s6357_s21 }
 0x29d   :  { %5854 = vrot.lane.b32.xlu1 %v6498_v19, %s6361_s11 }
 0x29f   :  { %423 = vrot.lane.b32.xlu0 %v6492_v18, %s6362_s13 }
 0x315   :  { %v317_v31 = vpop.xlane.xlu1 %316 }
 0x316   :  { %v319_v32 = vsub.f32 %v310_v26, %v317_v31  ;;  %v314_v33 = vpop.xlane.xlu0 %313 }
 0x317   :  { %v318_v34 = vsub.f32 %v309_v28, %v314_v33 }
 0x318   :  { %v322_v35 = vmul.f32 1.442695, %v319_v32 }
 0x319   :  { %v320_v36 = vmul.f32 1.442695, %v318_v34  ;;  %v5850_v37 = vpop.permute.xlu1 %5849 }
 0x31a   :  { %6119 = vpow2.f32 %v322_v35  ;;  %v5852_v38 = vunpack.i.h.bf16 %v5850_v37  ;;  %v5851_v39 = vunpack.i.l.bf16 %v5850_v37  ;;  %v424_v56 = vpop.permute.xlu0 %423 }
 0x31b   :  { %6121 = vpow2.f32 %v320_v36 }
 0x31c   :  { %v5637_v40 = vpack.c.bf16 %v5852_v38, %v5851_v39 }
 0x31d   :  { %v5855_v41 = vpop.permute.xlu1 %5854 }
 0x31e   :  { %v5857_v42 = vunpack.i.h.bf16 %v5855_v41  ;;  %v5856_v43 = vunpack.i.l.bf16 %v5855_v41  ;;  %5638 = vmatprep.subr.bf16.mxu1 %v5637_v40 }
 0x31f   :  { %5640 = vmatpush3.bf16.msra.mxu1 %v5637_v40 }
 0x320   :  { %v5641_v44 = vpack.c.bf16 %v5857_v42, %v5856_v43 }
 0x322   :  { %5643 = vmatprep.subr.msk.bf16.mxu1 %vm6504_vm1, %v5641_v44 }
 0x324   :  { %v6120_v45 = vpop.eup %6119 }
 0x325   :  { %v327_v46 = vsel %vm311_vm2, %v6120_v45, 0.0  ;;  %v6122_v47 = vpop.eup %6121 }
 0x326   :  { %328 = vadd.xlane.f32.xlu1 %v327_v46  ;;  %v324_v48 = vsel %vm311_vm2, %v6122_v47, 0.0 }
 0x32a   :  { %325 = vadd.xlane.f32.xlu1 %v324_v48 }
 0x33b   :  { %421 = vrot.lane.b32.xlu1 %v6488_v14, %s6362_s13 }
 0x3b3   :  { %v329_v49 = vpop.xlane.xlu1 %328 }
 0x3b4   :  { %6123 = vrcp.f32 %v329_v49 }
 0x3b7   :  { %v326_v50 = vpop.xlane.xlu1 %325 }
 0x3b8   :  { %6125 = vrcp.f32 %v326_v50 }
 0x3bb   :  { %v422_v55 = vpop.permute.xlu1 %421 }
 0x3be   :  { %v6124_v51 = vpop.eup %6123 }
 0x3bf   :  { %v333_v54 = vmul.f32 %v6124_v51, %v6120_v45 }
 0x3c2   :  { %v6126_v52 = vpop.eup %6125 }
 0x3c3   :  { %v331_v53 = vmul.f32 %v6126_v52, %v6122_v47 }
 0x3c5   :  { %5246 = vmatprep.mubr.msk.f32.mxu1 %vm311_vm2, %v331_v53 }
 0x3c6   :  { %5247 = vmatmul.mubr.msk.f32.vlgmr.msra.gmra.mrb[2].mxu1 %vm311_vm2, %v333_v54 }
 0x3c7   :  { %5646 = vmatpush3.bf16.xpose.msk.msra.mxu1 %vm6504_vm1, %v5641_v44  ;;  %5253 = vmatprep.mubr.msk.f32.mxu1 %vm225_vm0, %v422_v55 }
 0x3ce   :  { %5254 = vmatmul.mubr.msk.f32.vlgmr.msra.gmra.mrb[4].mxu1 %vm225_vm0, %v424_v56 }
 0x499   :  { %v6534_v57 = vpop.f32.mrb[2].mxu1 }
 0x49a   :  { %v6536_v58 = vpop.f32.mrb[3].mxu1 }
 0x4a1   :  { %v5255_v59 = vpop.f32.mrb[4].mxu1 }
 0x4a2   :  { %v513_v60 = vmul.f32 0.35355338, %v5255_v59  ;;  %v503_v61 = vpop.f32.mrb[5].mxu1 }
 0x4a3   :  { %v512_v62 = vmul.f32 0.35355338, %v503_v61 }
 0x4a4   :  { %v517_v63 = vsel %vm311_vm2, %v513_v60, -inf }
 0x4a5   :  { %518 = vmax.xlane.f32.xlu0 %v517_v63  ;;  %v514_v0 = vsel %vm311_vm2, %v512_v62, -inf }
 0x4a6   :  { %515 = vmax.xlane.f32.xlu1 %v514_v0 }
 0x4b7   :  { %5859 = vrot.lane.b32.xlu1 %v6498_v19, %s6363_s4 }
 0x4bb   :  { %5864 = vrot.lane.b32.xlu0 %v6498_v19, %s6364_s10  ;;  %5869 = vrot.lane.b32.xlu1 %v6498_v19, %s6365_s14 }
 0x4bf   :  { %825 = vrot.lane.b32.xlu0 %v6488_v14, %s6366_s15  ;;  %623 = vrot.lane.b32.xlu1 %v6488_v14, %s6367_s16 }
 0x4c3   :  { %827 = vrot.lane.b32.xlu0 %v6492_v18, %s6366_s15 }
 0x532   :  { %v519_v1 = vpop.xlane.xlu0 %518 }
 0x533   :  { %v521_v2 = vsub.f32 %v513_v60, %v519_v1  ;;  %v516_v3 = vpop.xlane.xlu1 %515 }
 0x534   :  { %v520_v4 = vsub.f32 %v512_v62, %v516_v3 }
 0x535   :  { %v524_v5 = vmul.f32 1.442695, %v521_v2 }
 0x536   :  { %v522_v6 = vmul.f32 1.442695, %v520_v4  ;;  %v5865_v7 = vpop.permute.xlu0 %5864 }
 0x537   :  { %6127 = vpow2.f32 %v524_v5  ;;  %v5860_v8 = vpop.permute.xlu1 %5859  ;;  %v5867_v9 = vunpack.i.h.bf16 %v5865_v7  ;;  %v5866_v10 = vunpack.i.l.bf16 %v5865_v7 }
 0x538   :  { %v5862_v11 = vunpack.i.h.bf16 %v5860_v8  ;;  %v5861_v13 = vunpack.i.l.bf16 %v5860_v8  ;;  %6129 = vpow2.f32 %v522_v6 }
 0x539   :  { %v5651_v20 = vpack.c.bf16 %v5867_v9, %v5866_v10 }
 0x53a   :  { %v826_v15 = vpop.permute.xlu0 %825  ;;  %v5647_v17 = vpack.c.bf16 %v5862_v11, %v5861_v13 }
 0x53b   :  { %5281 = vmatprep.mubr.msk.f32.mxu0 %vm225_vm0, %v826_v15  ;;  %v5870_v14 = vpop.permute.xlu1 %5869 }
 0x53c   :  { %v5872_v21 = vunpack.i.h.bf16 %v5870_v14  ;;  %v5871_v22 = vunpack.i.l.bf16 %v5870_v14  ;;  %5648 = vmatprep.subr.bf16.mxu1 %v5647_v17 }
 0x53d   :  { %5650 = vmatpush3.bf16.msra.mxu1 %v5647_v17 }
 0x53e   :  { %v5661_v24 = vpack.c.bf16 %v5872_v21, %v5871_v22  ;;  %5653 = vmatprep.subr.msk.bf16.mxu1 %vm6504_vm1, %v5651_v20  ;;  %v828_v29 = vpop.permute.xlu0 %827 }
 0x53f   :  { %v624_v31 = vpop.permute.xlu1 %623 }
 0x540   :  { %5663 = vmatprep.subr.msk.bf16.mxu0 %vm6504_vm1, %v5661_v24 }
 0x541   :  { %v6128_v25 = vpop.eup %6127  ;;  %5666 = vmatpush3.bf16.xpose.msk.msra.mxu0 %vm6504_vm1, %v5661_v24 }
 0x542   :  { %v529_v26 = vsel %vm311_vm2, %v6128_v25, 0.0  ;;  %v6130_v27 = vpop.eup %6129 }
 0x543   :  { %530 = vadd.xlane.f32.xlu1 %v529_v26  ;;  %v526_v28 = vsel %vm311_vm2, %v6130_v27, 0.0 }
 0x547   :  { %527 = vadd.xlane.f32.xlu1 %v526_v28 }
 0x548   :  { %5282 = vmatmul.mubr.msk.f32.vlgmr.msra.gmra.mrb[4].mxu0 %vm225_vm0, %v828_v29 }
 0x549   :  { %5295 = vmatprep.mubr.msk.f32.mxu0 %vm225_vm0, %v6486_v12 }
 0x558   :  { %625 = vrot.lane.b32.xlu1 %v6492_v18, %s6367_s16 }
 0x55c   :  { %5874 = vrot.lane.b32.xlu1 %v6568_v30, %s6360_s30 }
 0x5d0   :  { %v531_v32 = vpop.xlane.xlu1 %530 }
 0x5d1   :  { %6131 = vrcp.f32 %v531_v32 }
 0x5d4   :  { %v528_v33 = vpop.xlane.xlu1 %527 }
 0x5d5   :  { %6133 = vrcp.f32 %v528_v33 }
 0x5d8   :  { %v626_v34 = vpop.permute.xlu1 %625 }
 0x5db   :  { %v6132_v38 = vpop.eup %6131 }
 0x5dc   :  { %v5875_v35 = vpop.permute.xlu1 %5874  ;;  %v535_v41 = vmul.f32 %v6132_v38, %v6128_v25 }
 0x5dd   :  { %v5877_v36 = vunpack.i.h.bf16 %v5875_v35  ;;  %v5876_v37 = vunpack.i.l.bf16 %v5875_v35 }
 0x5df   :  { %v6134_v39 = vpop.eup %6133  ;;  %v5671_v40 = vpack.c.bf16 %v5877_v36, %v5876_v37 }
 0x5e0   :  { %v533_v18 = vmul.f32 %v6134_v39, %v6130_v27 }
 0x5e1   :  { %5673 = vmatprep.subr.msk.bf16.mxu0 %vm6504_vm1, %v5671_v40 }
 0x5e2   :  { %5260 = vmatprep.mubr.msk.f32.mxu1 %vm311_vm2, %v533_v18  ;;  %5676 = vmatpush3.bf16.xpose.msk.msra.mxu0 %vm6504_vm1, %v5671_v40 }
 0x5e3   :  { %5261 = vmatmul.mubr.msk.f32.vlgmr.msra.gmra.mrb[6].mxu1 %vm311_vm2, %v535_v41 }
 0x5e4   :  { %5656 = vmatpush3.bf16.xpose.msk.msra.mxu1 %vm6504_vm1, %v5651_v20  ;;  %5267 = vmatprep.mubr.msk.f32.mxu1 %vm225_vm0, %v624_v31 }
 0x5e9   :  { %5296 = vmatmul.mubr.msk.f32.vlgmr.msra.gmra.mrb[6].mxu0 %vm225_vm0, %v6490_v16 }
 0x5eb   :  { %5268 = vmatmul.mubr.msk.f32.vlgmr.msra.gmra.mrb[8].mxu1 %vm225_vm0, %v626_v34 }
 0x61b   :  { %v5283_v42 = vpop.f32.mrb[4].mxu0 }
 0x61c   :  { %v907_v43 = vpop.f32.mrb[5].mxu0  ;;  %v917_v55 = vmul.f32 0.35355338, %v5283_v42 }
 0x61d   :  { %v916_v53 = vmul.f32 0.35355338, %v907_v43 }
 0x61e   :  { %v921_v62 = vsel %vm311_vm2, %v917_v55, -inf }
 0x61f   :  { %v918_v60 = vsel %vm311_vm2, %v916_v53, -inf }
 0x6b6   :  { %v6584_v44 = vpop.f32.mrb[6].mxu1 }
 0x6b7   :  { %v6586_v45 = vpop.f32.mrb[7].mxu1 }
 0x6b8   :  { %v5923_v46 = vpack.i.bf16 %v6584_v44, %v6586_v45 }
 0x6bc   :  { %v5297_v47 = vpop.f32.mrb[6].mxu0 }
 0x6bd   :  { %v1138_v48 = vpop.f32.mrb[7].mxu0  ;;  %v1148_v61 = vmul.f32 0.35355338, %v5297_v47 }
 0x6be   :  { %v5269_v49 = vpop.f32.mrb[8].mxu1  ;;  %v1147_v59 = vmul.f32 0.35355338, %v1138_v48 }
 0x6bf   :  { %v715_v50 = vmul.f32 0.35355338, %v5269_v49  ;;  %v705_v51 = vpop.f32.mrb[9].mxu1  ;;  %v1152_v0 = vsel %vm311_vm2, %v1148_v61, -inf }
 0x6c0   :  { %v714_v52 = vmul.f32 0.35355338, %v705_v51  ;;  %v1149_v63 = vsel %vm311_vm2, %v1147_v59, -inf }
 0x6c1   :  { %v719_v54 = vsel %vm311_vm2, %v715_v50, -inf }
 0x6c2   :  { %720 = vmax.xlane.f32.xlu0 %v719_v54  ;;  %v716_v56 = vsel %vm311_vm2, %v714_v52, -inf }
 0x6c3   :  { %717 = vmax.xlane.f32.xlu1 %v716_v56 }
 0x6c6   :  { %919 = vmax.xlane.f32.xlu0 %v918_v60 }
 0x6c7   :  { %922 = vmax.xlane.f32.xlu1 %v921_v62 }
 0x6ca   :  { %1150 = vmax.xlane.f32.xlu0 %v1149_v63 }
 0x6cb   :  { %1153 = vmax.xlane.f32.xlu1 %v1152_v0 }
 0x74f   :  { %v721_v1 = vpop.xlane.xlu0 %720 }
 0x750   :  { %v718_v2 = vpop.xlane.xlu1 %717  ;;  %v723_v9 = vsub.f32 %v715_v50, %v721_v1 }
 0x751   :  { %v722_v7 = vsub.f32 %v714_v52, %v718_v2 }
 0x752   :  { %v726_v21 = vmul.f32 1.442695, %v723_v9 }
 0x753   :  { %v920_v3 = vpop.xlane.xlu0 %919  ;;  %v724_v14 = vmul.f32 1.442695, %v722_v7 }
 0x754   :  { %v924_v4 = vsub.f32 %v916_v53, %v920_v3  ;;  %v923_v5 = vpop.xlane.xlu1 %922 }
 0x755   :  { %v925_v6 = vsub.f32 %v917_v55, %v923_v5 }
 0x756   :  { %v926_v8 = vmul.f32 1.442695, %v924_v4 }
 0x757   :  { %v928_v10 = vmul.f32 1.442695, %v925_v6  ;;  %v1151_v11 = vpop.xlane.xlu0 %1150 }
 0x758   :  { %6135 = vpow2.f32 %v926_v8  ;;  %v1155_v13 = vsub.f32 %v1147_v59, %v1151_v11  ;;  %v1154_v15 = vpop.xlane.xlu1 %1153 }
 0x759   :  { %6137 = vpow2.f32 %v928_v10  ;;  %v1156_v17 = vsub.f32 %v1148_v61, %v1154_v15 }
 0x75a   :  { %v1157_v20 = vmul.f32 1.442695, %v1155_v13 }
 0x75b   :  { %v1159_v22 = vmul.f32 1.442695, %v1156_v17 }
 0x75c   :  { %6139 = vpow2.f32 %v1157_v20 }
 0x75d   :  { %6141 = vpow2.f32 %v1159_v22 }
 0x75e   :  { %6143 = vpow2.f32 %v724_v14 }
 0x75f   :  { %6145 = vpow2.f32 %v726_v21 }
 0x762   :  { %v6136_v24 = vpop.eup %6135 }
 0x763   :  { %v6596_v25 = vpop.eup %6137  ;;  %v930_v26 = vsel %vm311_vm2, %v6136_v24, 0.0 }
 0x764   :  { %931 = vadd.xlane.f32.xlu0 %v930_v26  ;;  %v933_v27 = vsel %vm311_vm2, %v6596_v25, 0.0 }
 0x765   :  { %934 = vadd.xlane.f32.xlu1 %v933_v27 }
 0x766   :  { %v6601_v28 = vpop.eup %6139 }
 0x767   :  { %v6603_v29 = vpop.eup %6141  ;;  %v1161_v31 = vsel %vm311_vm2, %v6601_v28, 0.0 }
 0x768   :  { %v6144_v32 = vpop.eup %6143  ;;  %1162 = vadd.xlane.f32.xlu0 %v1161_v31  ;;  %v1164_v33 = vsel %vm311_vm2, %v6603_v29, 0.0 }
 0x769   :  { %v6146_v34 = vpop.eup %6145  ;;  %1165 = vadd.xlane.f32.xlu1 %v1164_v33  ;;  %v728_v35 = vsel %vm311_vm2, %v6144_v32, 0.0 }
 0x76a   :  { %v731_v36 = vsel %vm311_vm2, %v6146_v34, 0.0 }
 0x76c   :  { %729 = vadd.xlane.f32.xlu0 %v728_v35 }
 0x76d   :  { %732 = vadd.xlane.f32.xlu1 %v731_v36 }
 0x77e   :  { %5884 = vrot.lane.b32.xlu1 %v6498_v19, %s6368_s17 }
 0x782   :  { %5879 = vrot.lane.b32.xlu0 %v6498_v19, %s6369_s18  ;;  %5889 = vrot.lane.b32.xlu1 %v6568_v30, %s6357_s21 }
 0x786   :  { %5894 = vrot.lane.b32.xlu0 %v6568_v30, %s6361_s11  ;;  %1258 = vrot.lane.b32.xlu1 %v6486_v12, %s6362_s13 }
 0x78a   :  { %1260 = vrot.lane.b32.xlu0 %v6490_v16, %s6362_s13 }
 0x7f1   :  { %v932_v37 = vpop.xlane.xlu0 %931 }
 0x7f2   :  { %v935_v38 = vpop.xlane.xlu1 %934  ;;  %6147 = vrcp.f32 %v932_v37 }
 0x7f5   :  { %v1163_v39 = vpop.xlane.xlu0 %1162 }
 0x7f6   :  { %v1166_v40 = vpop.xlane.xlu1 %1165 }
 0x7f9   :  { %v730_v18 = vpop.xlane.xlu0 %729 }
 0x7fa   :  { %6149 = vrcp.f32 %v730_v18  ;;  %v733_v19 = vpop.xlane.xlu1 %732 }
 0x7fb   :  { %6151 = vrcp.f32 %v733_v19 }
 0x7fc   :  { %6153 = vrcp.f32 %v935_v38  ;;  %v6148_v53 = vpop.eup %6147 }
 0x7fd   :  { %v5880_v41 = vpop.permute.xlu0 %5879  ;;  %6155 = vrcp.f32 %v1163_v39  ;;  %v937_v0 = vmul.f32 %v6148_v53, %v6136_v24 }
 0x7fe   :  { %v5882_v42 = vunpack.i.h.bf16 %v5880_v41  ;;  %v5881_v43 = vunpack.i.l.bf16 %v5880_v41  ;;  %v5885_v47 = vpop.permute.xlu1 %5884  ;;  %6157 = vrcp.f32 %v1166_v40 }
 0x7ff   :  { %v5887_v48 = vunpack.i.h.bf16 %v5885_v47  ;;  %v5886_v49 = vunpack.i.l.bf16 %v5885_v47 }
 0x800   :  { %v5657_v50 = vpack.c.bf16 %v5882_v42, %v5881_v43 }
 0x801   :  { %v5667_v51 = vpack.c.bf16 %v5887_v48, %v5886_v49  ;;  %v5895_v60 = vpop.permute.xlu0 %5894 }
 0x802   :  { %5658 = vmatprep.subr.bf16.mxu1 %v5657_v50  ;;  %v5890_v52 = vpop.permute.xlu1 %5889  ;;  %v5897_v2 = vunpack.i.h.bf16 %v5895_v60  ;;  %v5896_v3 = vunpack.i.l.bf16 %v5895_v60 }
 0x803   :  { %5660 = vmatpush3.bf16.msra.mxu1 %v5657_v50  ;;  %v5892_v55 = vunpack.i.h.bf16 %v5890_v52  ;;  %v5891_v56 = vunpack.i.l.bf16 %v5890_v52 }
 0x804   :  { %v6150_v54 = vpop.eup %6149  ;;  %5668 = vmatprep.subr.bf16.mxu1 %v5667_v51  ;;  %v5681_v8 = vpack.c.bf16 %v5897_v2, %v5896_v3 }
 0x805   :  { %v6152_v59 = vpop.eup %6151  ;;  %v735_v61 = vmul.f32 %v6150_v54, %v6144_v32  ;;  %v5677_v4 = vpack.c.bf16 %v5892_v55, %v5891_v56  ;;  %v1261_v11 = vpop.permute.xlu0 %1260 }
 0x806   :  { %v737_v62 = vmul.f32 %v6152_v59, %v6146_v34  ;;  %v6154_v63 = vpop.eup %6153  ;;  %v1259_v10 = vpop.permute.xlu1 %1258 }
 0x807   :  { %5274 = vmatprep.mubr.msk.f32.mxu1 %vm311_vm2, %v735_v61  ;;  %v6156_v1 = vpop.eup %6155  ;;  %v939_v5 = vmul.f32 %v6154_v63, %v6596_v25 }
 0x808   :  { %5275 = vmatmul.mubr.msk.f32.vlgmr.msra.gmra.mrb[10].mxu1 %vm311_vm2, %v737_v62  ;;  %v6158_v6 = vpop.eup %6157  ;;  %v1168_v7 = vmul.f32 %v6156_v1, %v6601_v28 }
 0x809   :  { %5670 = vmatpush3.bf16.msra.mxu1 %v5667_v51  ;;  %5288 = vmatprep.mubr.msk.f32.mxu1 %vm311_vm2, %v937_v0  ;;  %v1170_v9 = vmul.f32 %v6158_v6, %v6603_v29 }
 0x80a   :  { %5678 = vmatprep.subr.bf16.mxu1 %v5677_v4 }
 0x80c   :  { %5289 = vmatmul.mubr.msk.f32.vlgmr.msra.gmra.mrb[12].mxu1 %vm311_vm2, %v939_v5 }
 0x80d   :  { %5680 = vmatpush3.bf16.msra.mxu1 %v5677_v4  ;;  %5302 = vmatprep.mubr.msk.f32.mxu1 %vm311_vm2, %v1168_v7 }
 0x80e   :  { %5683 = vmatprep.subr.msk.bf16.mxu1 %vm6504_vm1, %v5681_v8 }
 0x810   :  { %5303 = vmatmul.mubr.msk.f32.vlgmr.msra.gmra.mrb[14].mxu1 %vm311_vm2, %v1170_v9 }
 0x811   :  { %5309 = vmatprep.mubr.msk.f32.mxu1 %vm225_vm0, %v1259_v10 }
 0x816   :  { %5686 = vmatpush3.bf16.xpose.msk.msra.mxu1 %vm6504_vm1, %v5681_v8 }
 0x81d   :  { %5310 = vmatmul.mubr.msk.f32.vlgmr.msra.gmra.mrb[16].mxu1 %vm225_vm0, %v1261_v11 }
 0x8db   :  { %v6638_v13 = vpop.f32.mrb[10].mxu1 }
 0x8dc   :  { %v6640_v15 = vpop.f32.mrb[11].mxu1 }
 0x8dd   :  { %v5928_v17 = vpack.i.bf16 %v6638_v13, %v6640_v15 }
 0x8df   :  { %v6644_v14 = vpop.f32.mrb[12].mxu1 }
 0x8e0   :  { %v6646_v20 = vpop.f32.mrb[13].mxu1 }
 0x8e1   :  { %v5938_v21 = vpack.i.bf16 %v6644_v14, %v6646_v20 }
 0x8e3   :  { %v6650_v22 = vpop.f32.mrb[14].mxu1 }
 0x8e4   :  { %v6652_v24 = vpop.f32.mrb[15].mxu1 }
 0x8f0   :  { %v5311_v25 = vpop.f32.mrb[16].mxu1 }
 0x8f1   :  { %v1350_v26 = vmul.f32 0.35355338, %v5311_v25  ;;  %v1340_v27 = vpop.f32.mrb[17].mxu1 }
 0x8f2   :  { %v1349_v28 = vmul.f32 0.35355338, %v1340_v27 }
 0x8f3   :  { %v1354_v29 = vsel %vm311_vm2, %v1350_v26, -inf }
 0x8f4   :  { %1355 = vmax.xlane.f32.xlu0 %v1354_v29  ;;  %v1351_v31 = vsel %vm311_vm2, %v1349_v28, -inf }
 0x8f5   :  { %1352 = vmax.xlane.f32.xlu1 %v1351_v31 }
 0x981   :  { %v1356_v32 = vpop.xlane.xlu0 %1355 }
 0x982   :  { %v1358_v33 = vsub.f32 %v1350_v26, %v1356_v32  ;;  %v1353_v34 = vpop.xlane.xlu1 %1352 }
 0x983   :  { %v1357_v35 = vsub.f32 %v1349_v28, %v1353_v34 }
 0x984   :  { %v1361_v36 = vmul.f32 1.442695, %v1358_v33 }
 0x985   :  { %v1359_v37 = vmul.f32 1.442695, %v1357_v35 }
 0x986   :  { %6159 = vpow2.f32 %v1361_v36 }
 0x987   :  { %6161 = vpow2.f32 %v1359_v37 }
 0x990   :  { %v6160_v38 = vpop.eup %6159 }
 0x991   :  { %v6162_v39 = vpop.eup %6161  ;;  %v1366_v40 = vsel %vm311_vm2, %v6160_v38, 0.0 }
 0x992   :  { %1367 = vadd.xlane.f32.xlu1 %v1366_v40  ;;  %v1363_v18 = vsel %vm311_vm2, %v6162_v39, 0.0 }
 0x993   :  { %1364 = vadd.xlane.f32.xlu0 %v1363_v18 }
 0x9a3   :  { %5904 = vrot.lane.b32.xlu1 %v6568_v30, %s6364_s10 }
 0x9a7   :  { %1460 = vrot.lane.b32.xlu1 %v6486_v12, %s6367_s16 }
 0x9a9   :  { %5899 = vrot.lane.b32.xlu0 %v6568_v30, %s6363_s4 }
 0x9ad   :  { %1462 = vrot.lane.b32.xlu0 %v6490_v16, %s6367_s16 }
 0xa1f   :  { %v1368_v19 = vpop.xlane.xlu1 %1367 }
 0xa20   :  { %6163 = vrcp.f32 %v1368_v19  ;;  %v1365_v41 = vpop.xlane.xlu0 %1364 }
 0xa21   :  { %6165 = vrcp.f32 %v1365_v41 }
 0xa23   :  { %v5905_v42 = vpop.permute.xlu1 %5904 }
 0xa24   :  { %v5900_v43 = vpop.permute.xlu0 %5899  ;;  %v5907_v47 = vunpack.i.h.bf16 %v5905_v42  ;;  %v5906_v48 = vunpack.i.l.bf16 %v5905_v42 }
 0xa25   :  { %v5902_v49 = vunpack.i.h.bf16 %v5900_v43  ;;  %v5901_v50 = vunpack.i.l.bf16 %v5900_v43 }
 0xa26   :  { %v5691_v52 = vpack.c.bf16 %v5907_v47, %v5906_v48 }
 0xa27   :  { %v5687_v51 = vpack.c.bf16 %v5902_v49, %v5901_v50  ;;  %v1461_v59 = vpop.permute.xlu1 %1460 }
 0xa28   :  { %v1463_v60 = vpop.permute.xlu0 %1462 }
 0xa29   :  { %5688 = vmatprep.subr.bf16.mxu0 %v5687_v51 }
 0xa2a   :  { %v6164_v53 = vpop.eup %6163  ;;  %5690 = vmatpush3.bf16.msra.mxu0 %v5687_v51 }
 0xa2b   :  { %v6166_v54 = vpop.eup %6165  ;;  %5693 = vmatprep.subr.msk.bf16.mxu0 %vm6504_vm1, %v5691_v52  ;;  %v1372_v56 = vmul.f32 %v6164_v53, %v6160_v38 }
 0xa2c   :  { %v1370_v55 = vmul.f32 %v6166_v54, %v6162_v39 }
 0xa2e   :  { %5316 = vmatprep.mubr.msk.f32.mxu0 %vm311_vm2, %v1370_v55 }
 0xa2f   :  { %5317 = vmatmul.mubr.msk.f32.vlgmr.msra.gmra.mrb[8].mxu0 %vm311_vm2, %v1372_v56 }
 0xa30   :  { %5323 = vmatprep.mubr.msk.f32.mxu0 %vm225_vm0, %v1461_v59 }
 0xa33   :  { %5696 = vmatpush3.bf16.xpose.msk.msra.mxu0 %vm6504_vm1, %v5691_v52 }
 0xa3a   :  { %5324 = vmatmul.mubr.msk.f32.vlgmr.msra.gmra.mrb[10].mxu0 %vm225_vm0, %v1463_v60 }
 0xb02   :  { %v6674_v61 = vpop.f32.mrb[8].mxu0 }
 0xb03   :  { %v6676_v62 = vpop.f32.mrb[9].mxu0 }
 0xb04   :  { %v5933_v63 = vpack.i.bf16 %v6674_v61, %v6676_v62 }
 0xb0d   :  { %v5325_v0 = vpop.f32.mrb[10].mxu0 }
 0xb0e   :  { %v1552_v1 = vmul.f32 0.35355338, %v5325_v0  ;;  %v1542_v2 = vpop.f32.mrb[11].mxu0 }
 0xb0f   :  { %v1551_v3 = vmul.f32 0.35355338, %v1542_v2 }
 0xb10   :  { %v1556_v4 = vsel %vm311_vm2, %v1552_v1, -inf }
 0xb11   :  { %1557 = vmax.xlane.f32.xlu0 %v1556_v4  ;;  %v1553_v5 = vsel %vm311_vm2, %v1551_v3, -inf }
 0xb12   :  { %1554 = vmax.xlane.f32.xlu1 %v1553_v5 }
 0xb9e   :  { %v1558_v6 = vpop.xlane.xlu0 %1557 }
 0xb9f   :  { %v1560_v7 = vsub.f32 %v1552_v1, %v1558_v6  ;;  %v1555_v8 = vpop.xlane.xlu1 %1554 }
 0xba0   :  { %v1559_v9 = vsub.f32 %v1551_v3, %v1555_v8 }
 0xba1   :  { %v1563_v10 = vmul.f32 1.442695, %v1560_v7 }
 0xba2   :  { %v1561_v11 = vmul.f32 1.442695, %v1559_v9 }
 0xba3   :  { %6167 = vpow2.f32 %v1563_v10 }
 0xba4   :  { %6169 = vpow2.f32 %v1561_v11 }
 0xbad   :  { %v6168_v25 = vpop.eup %6167 }
 0xbae   :  { %v6170_v26 = vpop.eup %6169  ;;  %v1568_v27 = vsel %vm311_vm2, %v6168_v25, 0.0 }
 0xbaf   :  { %1569 = vadd.xlane.f32.xlu1 %v1568_v27  ;;  %v1565_v28 = vsel %vm311_vm2, %v6170_v26, 0.0 }
 0xbb0   :  { %1566 = vadd.xlane.f32.xlu0 %v1565_v28 }
 0xbc0   :  { %5914 = vrot.lane.b32.xlu1 %v6568_v30, %s6365_s14 }
 0xbc4   :  { %1662 = vrot.lane.b32.xlu1 %v6486_v12, %s6366_s15 }
 0xbc6   :  { %5909 = vrot.lane.b32.xlu0 %v6568_v30, %s6369_s18 }
 0xbca   :  { %1664 = vrot.lane.b32.xlu0 %v6490_v16, %s6366_s15 }
 0xc3c   :  { %v1570_v29 = vpop.xlane.xlu1 %1569 }
 0xc3d   :  { %6171 = vrcp.f32 %v1570_v29  ;;  %v1567_v31 = vpop.xlane.xlu0 %1566 }
 0xc3e   :  { %6173 = vrcp.f32 %v1567_v31  ;;  %v6074_v31 = vld [vmem:[%s7119_s3 + $0x8] sm:$0xff]  }
 0xc40   :  { %v5915_v32 = vpop.permute.xlu1 %5914 }
 0xc41   :  { %v5910_v33 = vpop.permute.xlu0 %5909  ;;  %v5917_v34 = vunpack.i.h.bf16 %v5915_v32  ;;  %v5916_v35 = vunpack.i.l.bf16 %v5915_v32 }
 0xc42   :  { %v5912_v36 = vunpack.i.h.bf16 %v5910_v33  ;;  %v5911_v37 = vunpack.i.l.bf16 %v5910_v33 }
 0xc43   :  { %v5701_v39 = vpack.c.bf16 %v5917_v34, %v5916_v35 }
 0xc44   :  { %v5697_v38 = vpack.c.bf16 %v5912_v36, %v5911_v37  ;;  %v1663_v19 = vpop.permute.xlu1 %1662 }
 0xc45   :  { %v1665_v41 = vpop.permute.xlu0 %1664 }
 0xc46   :  { %5698 = vmatprep.subr.bf16.mxu1 %v5697_v38 }
 0xc47   :  { %v6172_v12 = vpop.eup %6171  ;;  %5700 = vmatpush3.bf16.msra.mxu1 %v5697_v38 }
 0xc48   :  { %v6174_v40 = vpop.eup %6173  ;;  %5703 = vmatprep.subr.msk.bf16.mxu1 %vm6504_vm1, %v5701_v39  ;;  %v1574_v18 = vmul.f32 %v6172_v12, %v6168_v25 }
 0xc49   :  { %v1572_v16 = vmul.f32 %v6174_v40, %v6170_v26 }
 0xc4b   :  { %5330 = vmatprep.mubr.msk.f32.mxu1 %vm311_vm2, %v1572_v16 }
 0xc4c   :  { %5331 = vmatmul.mubr.msk.f32.vlgmr.msra.gmra.mrb[18].mxu1 %vm311_vm2, %v1574_v18 }
 0xc4d   :  { %5337 = vmatprep.mubr.msk.f32.mxu1 %vm225_vm0, %v1663_v19 }
 0xc50   :  { %5706 = vmatpush3.bf16.xpose.msk.msra.mxu1 %vm6504_vm1, %v5701_v39 }
 0xc57   :  { %5338 = vmatmul.mubr.msk.f32.vlgmr.msra.gmra.mrb[20].mxu1 %vm225_vm0, %v1665_v41 }
 0xd1f   :  { %v5332_v42 = vpop.f32.mrb[18].mxu1 }
 0xd20   :  { %v1653_v43 = vpop.f32.mrb[19].mxu1 }
 0xd21   :  { %v5943_v47 = vpack.i.bf16 %v5332_v42, %v1653_v43 }
 0xd2a   :  { %v5339_v48 = vpop.f32.mrb[20].mxu1 }
 0xd2b   :  { %v1754_v49 = vmul.f32 0.35355338, %v5339_v48  ;;  %v1744_v50 = vpop.f32.mrb[21].mxu1 }
 0xd2c   :  { %v1753_v51 = vmul.f32 0.35355338, %v1744_v50  ;;  %v6076_v50 = vld [vmem:[#allocation5 + $0x8] sm:$0xff]  }
 0xd2d   :  { %v1758_v52 = vsel %vm311_vm2, %v1754_v49, -inf }
 0xd2e   :  { %1759 = vmax.xlane.f32.xlu0 %v1758_v52  ;;  %v1755_v53 = vsel %vm311_vm2, %v1753_v51, -inf  ;;  %v6078_v52 = vld [vmem:[#allocation5 + $0x18] sm:$0xff]  }
 0xd2f   :  { %1756 = vmax.xlane.f32.xlu1 %v1755_v53  ;;  %v6079_v53 = vld [vmem:[#allocation5 + $0x20] sm:$0xff]  }
 0xdbb   :  { %v1760_v54 = vpop.xlane.xlu0 %1759 }
 0xdbc   :  { %v1762_v55 = vsub.f32 %v1754_v49, %v1760_v54  ;;  %v1757_v56 = vpop.xlane.xlu1 %1756  ;;  %v6080_v54 = vld [vmem:[#allocation5 + $0x28] sm:$0xff]  }
 0xdbd   :  { %v1761_v59 = vsub.f32 %v1753_v51, %v1757_v56  ;;  %v6077_v51 = vld [vmem:[#allocation5 + $0x10] sm:$0xff]  }
 0xdbe   :  { %v1765_v60 = vmul.f32 1.442695, %v1762_v55  ;;  %v6255_v55 = vld [vmem:[%s7116_s0] sm:$0xff]  }
 0xdbf   :  { %v1763_v0 = vmul.f32 1.442695, %v1761_v59  ;;  %v79_v56 = vunpack.c.l.bf16 %v6255_v55  ;;  %v80_v59 = vunpack.c.h.bf16 %v6255_v55 }
 0xdc0   :  { %6175 = vpow2.f32 %v1765_v60 }
 0xdc1   :  { %6177 = vpow2.f32 %v1763_v0  ;;  %v6256_v0 = vld [vmem:[%s7116_s0 + $0x8] sm:$0xff]  }
 0xdca   :  { %v6176_v1 = vpop.eup %6175 }
 0xdcb   :  { %v6178_v2 = vpop.eup %6177  ;;  %v1770_v3 = vsel %vm311_vm2, %v6176_v1, 0.0 }
 0xdcc   :  { %1771 = vadd.xlane.f32.xlu1 %v1770_v3  ;;  %v1767_v4 = vsel %vm311_vm2, %v6178_v2, 0.0  ;;  %v81_v3 = vunpack.c.l.bf16 %v6256_v0 }
 0xdcd   :  { %1768 = vadd.xlane.f32.xlu0 %v1767_v4 }
 0xddd   :  { %5924 = vrot.lane.b32.xlu1 %v5923_v46, %s6370_s19 }
 0xde1   :  { %5929 = vrot.lane.b32.xlu1 %v5928_v17, %s6371_s20 }
 0xde3   :  { %5919 = vrot.lane.b32.xlu0 %v6568_v30, %s6368_s17 }
 0xde5   :  { %5939 = vrot.lane.b32.xlu1 %v5938_v21, %s6372_s23 }
 0xde7   :  { %5934 = vrot.lane.b32.xlu0 %v5933_v63, %s6370_s19 }
 0xdeb   :  { %5944 = vrot.lane.b32.xlu0 %v5943_v47, %s6371_s20 }
 0xe59   :  { %v1772_v44 = vpop.xlane.xlu1 %1771 }
 0xe5a   :  { %6179 = vrcp.f32 %v1772_v44  ;;  %v1769_v45 = vpop.xlane.xlu0 %1768 }
 0xe5b   :  { %6181 = vrcp.f32 %v1769_v45 }
 0xe5d   :  { %v5925_v46 = vpop.permute.xlu1 %5924 }
 0xe5e   :  { %v5920_v13 = vpop.permute.xlu0 %5919  ;;  %v5927_v17 = vunpack.i.h.bf16 %v5925_v46  ;;  %v5926_v14 = vunpack.i.l.bf16 %v5925_v46 }
 0xe5f   :  { %v5922_v30 = vunpack.i.h.bf16 %v5920_v13  ;;  %v5921_v15 = vunpack.i.l.bf16 %v5920_v13 }
 0xe60   :  { %v1052_v62 = vsel %vm225_vm0, %v6534_v57, %v5927_v17  ;;  %v1051_v8 = vsel %vm225_vm0, %v6536_v58, %v5926_v14  ;;  %v6073_v58 = vld [vmem:[%s7119_s3] sm:$0xff]   ;;  %v6780_v14 = vld [vmem:[%s7122_s6 + $0x18] sm:$0xff] }
 0xe61   :  { %v5707_v5 = vpack.c.bf16 %v5922_v30, %v5921_v15  ;;  %v5930_v6 = vpop.permute.xlu1 %5929 }
 0xe62   :  { %v5932_v20 = vunpack.i.h.bf16 %v5930_v6  ;;  %v5931_v21 = vunpack.i.l.bf16 %v5930_v6  ;;  %v5935_v35 = vpop.permute.xlu0 %5934  ;;  %v6771_v6 = vld [vmem:[%s7122_s6 + $0x10] sm:$0xff] }
 0xe63   :  { %5708 = vmatprep.subr.bf16.mxu0 %v5707_v5  ;;  %v5937_v37 = vunpack.i.h.bf16 %v5935_v35  ;;  %v5936_v38 = vunpack.i.l.bf16 %v5935_v35 }
 0xe64   :  { %v6180_v7 = vpop.eup %6179  ;;  %5710 = vmatpush3.bf16.msra.mxu0 %v5707_v5  ;;  %v1053_v26 = vsel %vm311_vm2, %v1051_v8, %v5931_v21  ;;  %v1054_v27 = vsel %vm311_vm2, %v1052_v62, %v5932_v20  ;;  %v6766_v5 = vld [vmem:[%s7122_s6 + $0x8] sm:$0xff]  ;;  %v6081_v20 = vld [vmem:[#allocation5 + $0x30] sm:$0xff]   ;;  %v6082_v21 = vld [vmem:[#allocation5 + $0x38] sm:$0xff]  }
 0xe65   :  { %v6182_v61 = vpop.eup %6181  ;;  %v5940_v63 = vpop.permute.xlu1 %5939  ;;  %v1776_v25 = vmul.f32 %v6180_v7, %v6176_v1  ;;  %5347 = vmatprep.subr.bf16.mxu0 %v6073_v58  ;;  %v1889_v16 = vsel %vm225_vm0, %v6650_v22, %v5937_v37  ;;  %v1888_v18 = vsel %vm225_vm0, %v6652_v24, %v5936_v38  ;;  %v6753_v22 = vld [vmem:[%s7122_s6] sm:$0xff]  ;;  %v82_v1 = vunpack.c.h.bf16 %v6256_v0  ;;  %v6085_v62 = vld [vmem:[#allocation7 + $0x10] sm:$0xff]  }
 0xe66   :  { %v5942_v9 = vunpack.i.h.bf16 %v5940_v63  ;;  %v5941_v10 = vunpack.i.l.bf16 %v5940_v63  ;;  %v1774_v11 = vmul.f32 %v6182_v61, %v6178_v2  ;;  %v5945_v36 = vpop.permute.xlu0 %5944  ;;  %5363 = vmatprep.mubr.msk.f32.mxu1 %vm1912_vm4, %v6753_v22  ;;  %v6075_v24 = vld [vmem:[#allocation5] sm:$0xff]   ;;  %v6084_v61 = vld [vmem:[#allocation7 + $0x8] sm:$0xff]   ;;  %v6086_v63 = vld [vmem:[#allocation7 + $0x18] sm:$0xff]  }
 0xe67   :  { %v5947_v39 = vunpack.i.h.bf16 %v5945_v36  ;;  %v5946_v12 = vunpack.i.l.bf16 %v5945_v36  ;;  %v6083_v7 = vld [vmem:[#allocation7] sm:$0xff]  }
 0xe68   :  { %v1056_v28 = vsel %vm1055_vm3, %v1053_v26, %v5941_v10  ;;  %v1057_v29 = vsel %vm1055_vm3, %v1054_v27, %v5942_v9  ;;  %5344 = vmatprep.mubr.msk.f32.mxu0 %vm311_vm2, %v1774_v11  ;;  %v6087_v8 = vld [vmem:[#allocation7 + $0x20] sm:$0xff]   ;;  %v6088_v9 = vld [vmem:[#allocation7 + $0x28] sm:$0xff]  }
 0xe69   :  { %v1894_v57 = vpack.c.bf16 %v1057_v29, %v1056_v28  ;;  %5345 = vmatmul.mubr.msk.f32.vlgmr.msra.gmra.mrb[12].mxu0 %vm311_vm2, %v1776_v25  ;;  %v1890_v42 = vsel %vm311_vm2, %v1888_v18, %v5946_v12  ;;  %v1891_v43 = vsel %vm311_vm2, %v1889_v16, %v5947_v39 }
 0xe6a   :  { %5348 = vmatpush3.bf16.msra.mxu0 %v6073_v58 }
 0xe6b   :  { %5351 = vmatprep.mubr.msk.bf16.mxu0 %vm1912_vm4, %v1894_v57  ;;  %5349 = vmatprep.subr.bf16.mxu0 %v6074_v31 }
 0xe6e   :  { %5350 = vmatpush3.bf16.msra.mxu0 %v6074_v31 }
 0xe6f   :  { %5369 = vmatprep.subr.bf16.mxu0 %v6075_v24 }
 0xf3c   :  { %v5346_v32 = vpop.f32.mrb[12].mxu0 }
 0xf3d   :  { %v1855_v33 = vpop.f32.mrb[13].mxu0 }
 0xf3e   :  { %v5948_v34 = vpack.i.bf16 %v5346_v32, %v1855_v33  ;;  %v6089_v32 = vld [vmem:[#allocation7 + $0x30] sm:$0xff]   ;;  %v6090_v33 = vld [vmem:[#allocation7 + $0x38] sm:$0xff]  }
 0xf40   :  { %5949 = vrot.lane.b32.xlu1 %v5948_v34, %s6372_s23 }
 0xfb2   :  { %v5950_v40 = vpop.permute.xlu1 %5949 }
 0xfb3   :  { %v5952_v19 = vunpack.i.h.bf16 %v5950_v40  ;;  %v5951_v41 = vunpack.i.l.bf16 %v5950_v40 }
 0xfb5   :  { %v1893_v47 = vsel %vm1055_vm3, %v1891_v43, %v5952_v19  ;;  %v1892_v48 = vsel %vm1055_vm3, %v1890_v42, %v5951_v41  ;;  %v6091_v19 = vld [vmem:[#allocation2 + $0x40] sm:$0xff]   ;;  %v6092_v41 = vld [vmem:[#allocation2 + $0x48] sm:$0xff]   ;;  %v6093_v42 = vld [vmem:[#allocation2 + $0x50] sm:$0xff]  }
 0xfb6   :  { %v1895_v49 = vpack.c.bf16 %v1893_v47, %v1892_v48  ;;  %v6094_v43 = vld [vmem:[#allocation2 + $0x58] sm:$0xff]   ;;  %v6095_v47 = vld [vmem:[#allocation2 + $0x60] sm:$0xff]   ;;  %v6096_v48 = vld [vmem:[#allocation2 + $0x68] sm:$0xff]  }
 0xfb8   :  { %5352 = vmatmul.mubr.msk.bf16.vlgmr.msra.gmra.mrb[16].mxu0 %vm1912_vm4, %v1895_v49 }
 0xfb9   :  { %5370 = vmatpush3.bf16.msra.mxu0 %v6075_v24 }
 0xfba   :  { %5371 = vmatprep.subr.bf16.mxu0 %v6076_v50 }
 0xfbd   :  { %5372 = vmatpush3.bf16.msra.mxu0 %v6076_v50 }
 0xfbe   :  { %5373 = vmatprep.subr.bf16.mxu0 %v6077_v51 }
 0xfc1   :  { %5374 = vmatpush3.bf16.msra.mxu0 %v6077_v51 }
 0xfc2   :  { %5375 = vmatprep.subr.bf16.mxu0 %v6078_v52 }
 0xfc5   :  { %5376 = vmatpush3.bf16.msra.mxu0 %v6078_v52 }
 0xfc6   :  { %5377 = vmatprep.subr.bf16.mxu0 %v6079_v53 }
 0xfc9   :  { %5378 = vmatpush3.bf16.msra.mxu0 %v6079_v53 }
 0xfca   :  { %5379 = vmatprep.subr.bf16.mxu0 %v6080_v54 }
 0xfcd   :  { %5380 = vmatpush3.bf16.msra.mxu0 %v6080_v54 }
 0xfce   :  { %5381 = vmatprep.subr.bf16.mxu0 %v6081_v20 }
 0xfd1   :  { %5382 = vmatpush3.bf16.msra.mxu0 %v6081_v20 }
 0xfd2   :  { %5383 = vmatprep.subr.bf16.mxu0 %v6082_v21 }
 0xfd5   :  { %5384 = vmatpush3.bf16.msra.mxu0 %v6082_v21 }
0x108b   :  { %v5353_v60 = vpop.f32.mrb[16].mxu0 }
0x108c   :  { %v1953_v2 = vpop.f32.mrb[17].mxu0  ;;  %v1970_v30 = vadd.f32 %v5353_v60, %v81_v3  ;;  %v6098_v60 = vld [vmem:[#allocation2 + $0x78] sm:$0xff]  }
0x108d   :  { %v1968_v4 = vadd.f32 %v1953_v2, %v79_v56  ;;  %v5354_v44 = vpop.f32.mrb[18].mxu0 }
0x108e   :  { %v1956_v45 = vpop.f32.mrb[19].mxu0  ;;  %v1971_v46 = vadd.f32 %v5354_v44, %v82_v1 }
0x108f   :  { %v1969_v13 = vadd.f32 %v1956_v45, %v80_v59  ;;  %v6097_v59 = vld [vmem:[#allocation2 + $0x70] sm:$0xff]  }
0x1090   :  { %v5715_v17 = vpack.c.bf16 %v1971_v46, %v1970_v30 }
0x1091   :  { %v5711_v15 = vpack.c.bf16 %v1969_v13, %v1968_v4 }
0x1093   :  { %5712 = vmatprep.subr.bf16.mxu1 %v5711_v15 }
0x1094   :  { %5714 = vmatpush3.bf16.msra.mxu1 %v5711_v15  ;;  %v4896_v15 = vld [vmem:[%s7118_s2 + $0x1] ss:$0 sm:$0xff] }
0x1095   :  { %5716 = vmatprep.subr.bf16.mxu1 %v5715_v17 }
0x1098   :  { %5718 = vmatpush3.bf16.msra.mxu1 %v5715_v17 }
0x1099   :  { %5389 = vmatprep.subr.bf16.mxu1 %v6083_v7 }
0x109b   :  { %5364 = vmatmul.mubr.msk.f32.vlgmr.msra.gmra.mrb[22].mxu1 %vm1912_vm4, %v6766_v5 }
0x109c   :  { %5366 = vmatprep.mubr.msk.f32.mxu1 %vm1912_vm4, %v6771_v6  ;;  %5390 = vmatpush3.bf16.msra.mxu1 %v6083_v7 }
0x109d   :  { %5391 = vmatprep.subr.bf16.mxu1 %v6084_v61 }
0x109f   :  { %5367 = vmatmul.mubr.msk.f32.gmra.mrb[24].mxu1 %vm1912_vm4, %v6780_v14 }
0x10a0   :  { %5392 = vmatpush3.bf16.msra.mxu1 %v6084_v61 }
0x10a1   :  { %5393 = vmatprep.subr.bf16.mxu1 %v6085_v62 }
0x10a4   :  { %5394 = vmatpush3.bf16.msra.mxu1 %v6085_v62 }
0x10a5   :  { %5395 = vmatprep.subr.bf16.mxu1 %v6086_v63 }
0x10a8   :  { %5396 = vmatpush3.bf16.msra.mxu1 %v6086_v63 }
0x10a9   :  { %5397 = vmatprep.subr.bf16.mxu1 %v6087_v8 }
0x10ac   :  { %5398 = vmatpush3.bf16.msra.mxu1 %v6087_v8 }
0x10ad   :  { %5399 = vmatprep.subr.bf16.mxu1 %v6088_v9 }
0x10b0   :  { %5400 = vmatpush3.bf16.msra.mxu1 %v6088_v9 }
0x10b1   :  { %5401 = vmatprep.subr.bf16.mxu1 %v6089_v32 }
0x10b4   :  { %5402 = vmatpush3.bf16.msra.mxu1 %v6089_v32 }
0x10b5   :  { %5403 = vmatprep.subr.bf16.mxu1 %v6090_v33 }
0x10b8   :  { %5404 = vmatpush3.bf16.msra.mxu1 %v6090_v33 }
0x10b9   :  { %5423 = vmatprep.subr.bf16.mxu1 %v6091_v19 }
0x116e   :  { %v5365_v10 = vpop.f32.mrb[22].mxu1 }
0x116f   :  { %v2070_v11 = vsub.f32 %v1969_v13, %v5365_v10  ;;  %v2050_v25 = vpop.f32.mrb[23].mxu1 }
0x1170   :  { %v2069_v26 = vsub.f32 %v1968_v4, %v2050_v25 }
0x1172   :  { %v2073_v27 = vpack.c.bf16 %v2070_v11, %v2069_v26  ;;  %v5368_v28 = vpop.f32.mrb[24].mxu1 }
0x1173   :  { %v2072_v29 = vsub.f32 %v1971_v46, %v5368_v28  ;;  %v2060_v57 = vpop.f32.mrb[25].mxu1 }
0x1174   :  { %v2071_v58 = vsub.f32 %v1970_v30, %v2060_v57  ;;  %5385 = vmatprep.mubr.bf16.mxu0 %v2073_v27 }
0x1176   :  { %v2074_v31 = vpack.c.bf16 %v2072_v29, %v2071_v58 }
0x1178   :  { %5386 = vmatmul.mubr.bf16.vlgmr.msra.gmra.mrb[20].mxu0 %v2074_v31 }
0x1179   :  { %5417 = vmatprep.mubr.msk.f32.mxu0 %vm1912_vm4, %v6753_v22 }
0x124b   :  { %v5387_v34 = vpop.f32.mrb[20].mxu0 }
0x124c   :  { %v2173_v35 = vpop.f32.mrb[21].mxu0  ;;  %v2190_v37 = vmax.f32 %v5387_v34, 0.0 }
0x124d   :  { %v5388_v36 = vpop.f32.mrb[22].mxu0  ;;  %v2188_v12 = vmax.f32 %v2173_v35, 0.0 }
0x124e   :  { %v2191_v38 = vmax.f32 %v5388_v36, 0.0  ;;  %v2176_v39 = vpop.f32.mrb[23].mxu0 }
0x124f   :  { %v2189_v40 = vmax.f32 %v2176_v39, 0.0 }
0x1250   :  { %v2193_v16 = vpack.c.bf16 %v2191_v38, %v2190_v37 }
0x1251   :  { %v2192_v18 = vpack.c.bf16 %v2189_v40, %v2188_v12 }
0x1253   :  { %5405 = vmatprep.mubr.bf16.mxu1 %v2192_v18 }
0x1254   :  { %5406 = vmatmul.mubr.bf16.vlgmr.msra.gmra.mrb[28].mxu1 %v2193_v16 }
0x1255   :  { %5424 = vmatpush3.bf16.msra.mxu1 %v6091_v19 }
0x1256   :  { %5425 = vmatprep.subr.bf16.mxu1 %v6092_v41 }
0x1259   :  { %5426 = vmatpush3.bf16.msra.mxu1 %v6092_v41 }
0x125a   :  { %5427 = vmatprep.subr.bf16.mxu1 %v6093_v42 }
0x125d   :  { %5428 = vmatpush3.bf16.msra.mxu1 %v6093_v42 }
0x125e   :  { %5429 = vmatprep.subr.bf16.mxu1 %v6094_v43 }
0x1261   :  { %5430 = vmatpush3.bf16.msra.mxu1 %v6094_v43 }
0x1262   :  { %5431 = vmatprep.subr.bf16.mxu1 %v6095_v47 }
0x1265   :  { %5432 = vmatpush3.bf16.msra.mxu1 %v6095_v47 }
0x1266   :  { %5433 = vmatprep.subr.bf16.mxu1 %v6096_v48 }
0x1269   :  { %5434 = vmatpush3.bf16.msra.mxu1 %v6096_v48 }
0x126a   :  { %5435 = vmatprep.subr.bf16.mxu1 %v6097_v59 }
0x126d   :  { %5436 = vmatpush3.bf16.msra.mxu1 %v6097_v59 }
0x126e   :  { %5437 = vmatprep.subr.bf16.mxu1 %v6098_v60 }
0x1271   :  { %5438 = vmatpush3.bf16.msra.mxu1 %v6098_v60 }
0x1327   :  { %v5407_v49 = vpop.f32.mrb[28].mxu1 }
0x1328   :  { %v2292_v22 = vpop.f32.mrb[29].mxu1  ;;  %v2309_v54 = vadd.f32 %v5407_v49, %v2071_v58 }
0x1329   :  { %v5408_v24 = vpop.f32.mrb[30].mxu1  ;;  %v2307_v51 = vadd.f32 %v2292_v22, %v2069_v26 }
0x132a   :  { %v2295_v50 = vpop.f32.mrb[31].mxu1  ;;  %v2310_v52 = vadd.f32 %v5408_v24, %v2072_v29 }
0x132b   :  { %v2308_v53 = vadd.f32 %v2295_v50, %v2070_v11 }
0x132c   :  { %v5723_v56 = vpack.c.bf16 %v2310_v52, %v2309_v54 }
0x132d   :  { %v5719_v55 = vpack.c.bf16 %v2308_v53, %v2307_v51 }
0x132f   :  { %5720 = vmatprep.subr.bf16.mxu0 %v5719_v55 }
0x1330   :  { %5722 = vmatpush3.bf16.msra.mxu0 %v5719_v55 }
0x1331   :  { %5724 = vmatprep.subr.bf16.mxu0 %v5723_v56 }
0x1334   :  { %5726 = vmatpush3.bf16.msra.mxu0 %v5723_v56 }
0x1337   :  { %5418 = vmatmul.mubr.msk.f32.vlgmr.msra.gmra.mrb[14].mxu0 %vm1912_vm4, %v6766_v5 }
0x1338   :  { %5420 = vmatprep.mubr.msk.f32.mxu0 %vm1912_vm4, %v6771_v6 }
0x133b   :  { %5421 = vmatmul.mubr.msk.f32.gmra.mrb[24].mxu0 %vm1912_vm4, %v6780_v14 }
0x140a   :  { %v5419_v0 = vpop.f32.mrb[14].mxu0 }
0x140b   :  { %v6792_v1 = vsub.f32 %v2308_v53, %v5419_v0  ;;  %v2377_v2 = vpop.f32.mrb[15].mxu0 }
0x140c   :  { %v6794_v3 = vsub.f32 %v2307_v51, %v2377_v2 }
0x140e   :  { %v2400_v4 = vpack.c.bf16 %v6792_v1, %v6794_v3  ;;  %v5422_v44 = vpop.f32.mrb[24].mxu0 }
0x140f   :  { %v6798_v45 = vsub.f32 %v2310_v52, %v5422_v44  ;;  %v2387_v46 = vpop.f32.mrb[25].mxu0 }
0x1410   :  { %v6800_v13 = vsub.f32 %v2309_v54, %v2387_v46  ;;  %5439 = vmatprep.mubr.bf16.mxu1 %v2400_v4 }
0x1412   :  { %v2401_v30 = vpack.c.bf16 %v6798_v45, %v6800_v13 }
0x1414   :  { %5440 = vmatmul.mubr.bf16.vlgmr.msra.gmra.mrb[32].mxu1 %v2401_v30 }
0x14e7   :  { %v5441_v17 = vpop.f32.mrb[32].mxu1 }
0x14e8   :  { %v6807_v5 = vadd.f32 %v5441_v17, %v4896_v15  ;;  %v2509_v6 = vpop.f32.mrb[33].mxu1 }
0x14e9   :  { %v6809_v14 = vadd.f32 %v4896_v15, %v2509_v6  ;;  %v5442_v20 = vpop.f32.mrb[34].mxu1 }
0x14ea   :  { %v6811_v21 = vadd.f32 %v5442_v20, %v4896_v15  ;;  %v2512_v7 = vpop.f32.mrb[35].mxu1 }
0x14eb   :  { %v6813_v61 = vadd.f32 %v4896_v15, %v2512_v7  ;;  %5447 = vmatprep.mubr.msk.f32.mxu0 %vm225_vm0, %v6809_v14 }
0x14ed   :  { %v6819_v62 = vpack.i.bf16 %v6813_v61, %v6809_v14 }
0x14ef   :  { %5954 = vrot.lane.b32.xlu0 %v6819_v62, %s6360_s30 }
0x1561   :  { %v5955_v63 = vpop.permute.xlu0 %5954 }
0x1562   :  { %v5957_v8 = vunpack.i.h.bf16 %v5955_v63  ;;  %v5956_v9 = vunpack.i.l.bf16 %v5955_v63 }
0x1564   :  { %v5727_v10 = vpack.c.bf16 %v5957_v8, %v5956_v9 }
0x1566   :  { %5729 = vmatprep.subr.msk.bf16.mxu0 %vm6504_vm1, %v5727_v10 }
0x1567   :  { %5732 = vmatpush3.bf16.xpose.msk.msra.mxu0 %vm6504_vm1, %v5727_v10 }
0x156e   :  { %5448 = vmatmul.mubr.msk.f32.vlgmr.msra.gmra.mrb[26].mxu0 %vm225_vm0, %v6813_v61 }
0x1641   :  { %v5449_v11 = vpop.f32.mrb[26].mxu0 }
0x1642   :  { %v2614_v25 = vmul.f32 0.35355338, %v5449_v11  ;;  %v2604_v26 = vpop.f32.mrb[27].mxu0 }
0x1643   :  { %v2613_v27 = vmul.f32 0.35355338, %v2604_v26 }
0x1644   :  { %v2618_v28 = vsel %vm311_vm2, %v2614_v25, -inf }
0x1645   :  { %2619 = vmax.xlane.f32.xlu0 %v2618_v28  ;;  %v2615_v29 = vsel %vm311_vm2, %v2613_v27, -inf }
0x1646   :  { %2616 = vmax.xlane.f32.xlu1 %v2615_v29 }
0x16d2   :  { %v2620_v57 = vpop.xlane.xlu0 %2619 }
0x16d3   :  { %v2622_v58 = vsub.f32 %v2614_v25, %v2620_v57  ;;  %v2617_v31 = vpop.xlane.xlu1 %2616 }
0x16d4   :  { %v2621_v32 = vsub.f32 %v2613_v27, %v2617_v31 }
0x16d5   :  { %v2625_v33 = vmul.f32 1.442695, %v2622_v58 }
0x16d6   :  { %v2623_v34 = vmul.f32 1.442695, %v2621_v32 }
0x16d7   :  { %6183 = vpow2.f32 %v2625_v33 }
0x16d8   :  { %6185 = vpow2.f32 %v2623_v34 }
0x16e1   :  { %v6184_v35 = vpop.eup %6183 }
0x16e2   :  { %v6186_v36 = vpop.eup %6185  ;;  %v2630_v37 = vsel %vm311_vm2, %v6184_v35, 0.0 }
0x16e3   :  { %2631 = vadd.xlane.f32.xlu1 %v2630_v37  ;;  %v2627_v38 = vsel %vm311_vm2, %v6186_v36, 0.0 }
0x16e4   :  { %2628 = vadd.xlane.f32.xlu0 %v2627_v38 }
0x16f4   :  { %5964 = vrot.lane.b32.xlu1 %v6819_v62, %s6361_s11 }
0x16f8   :  { %2724 = vrot.lane.b32.xlu1 %v6809_v14, %s6362_s13 }
0x16fa   :  { %5959 = vrot.lane.b32.xlu0 %v6819_v62, %s6357_s21 }
0x16fe   :  { %2726 = vrot.lane.b32.xlu0 %v6813_v61, %s6362_s13 }
0x1770   :  { %v2632_v39 = vpop.xlane.xlu1 %2631 }
0x1771   :  { %6187 = vrcp.f32 %v2632_v39  ;;  %v2629_v12 = vpop.xlane.xlu0 %2628 }
0x1772   :  { %6189 = vrcp.f32 %v2629_v12 }
0x1774   :  { %v5965_v40 = vpop.permute.xlu1 %5964 }
0x1775   :  { %v5960_v16 = vpop.permute.xlu0 %5959  ;;  %v5967_v18 = vunpack.i.h.bf16 %v5965_v40  ;;  %v5966_v19 = vunpack.i.l.bf16 %v5965_v40 }
0x1776   :  { %v5962_v41 = vunpack.i.h.bf16 %v5960_v16  ;;  %v5961_v42 = vunpack.i.l.bf16 %v5960_v16 }
0x1777   :  { %v5737_v47 = vpack.c.bf16 %v5967_v18, %v5966_v19 }
0x1778   :  { %v5733_v43 = vpack.c.bf16 %v5962_v41, %v5961_v42  ;;  %v2725_v50 = vpop.permute.xlu1 %2724 }
0x1779   :  { %v2727_v51 = vpop.permute.xlu0 %2726 }
0x177a   :  { %5734 = vmatprep.subr.bf16.mxu0 %v5733_v43 }
0x177b   :  { %v6188_v48 = vpop.eup %6187  ;;  %5736 = vmatpush3.bf16.msra.mxu0 %v5733_v43 }
0x177c   :  { %v6190_v49 = vpop.eup %6189  ;;  %5739 = vmatprep.subr.msk.bf16.mxu0 %vm6504_vm1, %v5737_v47  ;;  %v2636_v24 = vmul.f32 %v6188_v48, %v6184_v35 }
0x177d   :  { %v2634_v22 = vmul.f32 %v6190_v49, %v6186_v36 }
0x177f   :  { %5454 = vmatprep.mubr.msk.f32.mxu0 %vm311_vm2, %v2634_v22 }
0x1780   :  { %5455 = vmatmul.mubr.msk.f32.vlgmr.msra.gmra.mrb[28].mxu0 %vm311_vm2, %v2636_v24 }
0x1781   :  { %5461 = vmatprep.mubr.msk.f32.mxu0 %vm225_vm0, %v2725_v50 }
0x1784   :  { %5742 = vmatpush3.bf16.xpose.msk.msra.mxu0 %vm6504_vm1, %v5737_v47 }
0x178b   :  { %5462 = vmatmul.mubr.msk.f32.vlgmr.msra.gmra.mrb[30].mxu0 %vm225_vm0, %v2727_v51 }
0x1853   :  { %v6849_v52 = vpop.f32.mrb[28].mxu0 }
0x1854   :  { %v6851_v53 = vpop.f32.mrb[29].mxu0 }
0x185e   :  { %v5463_v54 = vpop.f32.mrb[30].mxu0 }
0x185f   :  { %v2816_v55 = vmul.f32 0.35355338, %v5463_v54  ;;  %v2806_v56 = vpop.f32.mrb[31].mxu0 }
0x1860   :  { %v2815_v59 = vmul.f32 0.35355338, %v2806_v56 }
0x1861   :  { %v2820_v60 = vsel %vm311_vm2, %v2816_v55, -inf }
0x1862   :  { %2821 = vmax.xlane.f32.xlu0 %v2820_v60  ;;  %v2817_v0 = vsel %vm311_vm2, %v2815_v59, -inf }
0x1863   :  { %2818 = vmax.xlane.f32.xlu1 %v2817_v0 }
0x18ef   :  { %v2822_v2 = vpop.xlane.xlu0 %2821 }
0x18f0   :  { %v2824_v4 = vsub.f32 %v2816_v55, %v2822_v2  ;;  %v2819_v44 = vpop.xlane.xlu1 %2818 }
0x18f1   :  { %v2823_v46 = vsub.f32 %v2815_v59, %v2819_v44 }
0x18f2   :  { %v2827_v30 = vmul.f32 1.442695, %v2824_v4 }
0x18f3   :  { %v2825_v15 = vmul.f32 1.442695, %v2823_v46 }
0x18f4   :  { %6191 = vpow2.f32 %v2827_v30 }
0x18f5   :  { %6193 = vpow2.f32 %v2825_v15 }
0x18fe   :  { %v6192_v17 = vpop.eup %6191 }
0x18ff   :  { %v6194_v6 = vpop.eup %6193  ;;  %v2832_v20 = vsel %vm311_vm2, %v6192_v17, 0.0 }
0x1900   :  { %2833 = vadd.xlane.f32.xlu1 %v2832_v20  ;;  %v2829_v7 = vsel %vm311_vm2, %v6194_v6, 0.0 }
0x1901   :  { %2830 = vadd.xlane.f32.xlu0 %v2829_v7 }
0x1911   :  { %5974 = vrot.lane.b32.xlu1 %v6819_v62, %s6364_s10 }
0x1915   :  { %2926 = vrot.lane.b32.xlu1 %v6809_v14, %s6367_s16 }
0x1917   :  { %5969 = vrot.lane.b32.xlu0 %v6819_v62, %s6363_s4 }
0x1919   :  { %2928 = vrot.lane.b32.xlu1 %v6813_v61, %s6367_s16 }
0x191b   :  { %5979 = vrot.lane.b32.xlu0 %v6819_v62, %s6365_s14 }
0x191d   :  { %3130 = vrot.lane.b32.xlu1 %v6813_v61, %s6366_s15 }
0x191f   :  { %3128 = vrot.lane.b32.xlu0 %v6809_v14, %s6366_s15 }
0x198d   :  { %v2834_v63 = vpop.xlane.xlu1 %2833 }
0x198e   :  { %6195 = vrcp.f32 %v2834_v63  ;;  %v2831_v8 = vpop.xlane.xlu0 %2830 }
0x198f   :  { %6197 = vrcp.f32 %v2831_v8 }
0x1991   :  { %v5975_v9 = vpop.permute.xlu1 %5974 }
0x1992   :  { %v5970_v10 = vpop.permute.xlu0 %5969  ;;  %v5977_v11 = vunpack.i.h.bf16 %v5975_v9  ;;  %v5976_v25 = vunpack.i.l.bf16 %v5975_v9 }
0x1993   :  { %v5972_v26 = vunpack.i.h.bf16 %v5970_v10  ;;  %v5971_v27 = vunpack.i.l.bf16 %v5970_v10 }
0x1994   :  { %v5747_v29 = vpack.c.bf16 %v5977_v11, %v5976_v25 }
0x1995   :  { %v5743_v28 = vpack.c.bf16 %v5972_v26, %v5971_v27  ;;  %v2927_v34 = vpop.permute.xlu1 %2926  ;;  %v6903_v27 = vpack.i.bf16 %v6811_v21, %v6807_v5 }
0x1996   :  { %v5980_v61 = vpop.permute.xlu0 %5979 }
0x1997   :  { %5744 = vmatprep.subr.bf16.mxu0 %v5743_v28  ;;  %v5982_v32 = vunpack.i.h.bf16 %v5980_v61  ;;  %v5981_v33 = vunpack.i.l.bf16 %v5980_v61 }
0x1998   :  { %v6196_v57 = vpop.eup %6195  ;;  %5746 = vmatpush3.bf16.msra.mxu0 %v5743_v28 }
0x1999   :  { %v6198_v58 = vpop.eup %6197  ;;  %5749 = vmatprep.subr.msk.bf16.mxu0 %vm6504_vm1, %v5747_v29  ;;  %v2838_v31 = vmul.f32 %v6196_v57, %v6192_v17  ;;  %v5757_v35 = vpack.c.bf16 %v5982_v32, %v5981_v33  ;;  %v2929_v36 = vpop.permute.xlu1 %2928 }
0x199a   :  { %v2836_v14 = vmul.f32 %v6198_v58, %v6194_v6  ;;  %v3129_v37 = vpop.permute.xlu0 %3128 }
0x199c   :  { %5468 = vmatprep.mubr.msk.f32.mxu0 %vm311_vm2, %v2836_v14 }
0x199d   :  { %5469 = vmatmul.mubr.msk.f32.vlgmr.msra.gmra.mrb[32].mxu0 %vm311_vm2, %v2838_v31  ;;  %v3131_v38 = vpop.permute.xlu1 %3130 }
0x199e   :  { %5475 = vmatprep.mubr.msk.f32.mxu0 %vm225_vm0, %v2927_v34 }
0x19a1   :  { %5752 = vmatpush3.bf16.xpose.msk.msra.mxu0 %vm6504_vm1, %v5747_v29 }
0x19a2   :  { %5759 = vmatprep.subr.msk.bf16.mxu0 %vm6504_vm1, %v5757_v35 }
0x19a8   :  { %5476 = vmatmul.mubr.msk.f32.vlgmr.msra.gmra.mrb[34].mxu0 %vm225_vm0, %v2929_v36 }
0x19a9   :  { %5762 = vmatpush3.bf16.xpose.msk.msra.mxu0 %vm6504_vm1, %v5757_v35  ;;  %5489 = vmatprep.mubr.msk.f32.mxu0 %vm225_vm0, %v3129_v37 }
0x19b0   :  { %5490 = vmatmul.mubr.msk.f32.vlgmr.msra.gmra.mrb[36].mxu0 %vm225_vm0, %v3131_v38 }
0x1a70   :  { %v6885_v39 = vpop.f32.mrb[32].mxu0 }
0x1a71   :  { %v6887_v12 = vpop.f32.mrb[33].mxu0 }
0x1a72   :  { %v6033_v40 = vpack.i.bf16 %v6885_v39, %v6887_v12 }
0x1a7b   :  { %v5477_v16 = vpop.f32.mrb[34].mxu0 }
0x1a7c   :  { %v3018_v18 = vmul.f32 0.35355338, %v5477_v16  ;;  %v3008_v19 = vpop.f32.mrb[35].mxu0 }
0x1a7d   :  { %v3017_v41 = vmul.f32 0.35355338, %v3008_v19 }
0x1a7e   :  { %v3022_v42 = vsel %vm311_vm2, %v3018_v18, -inf }
0x1a7f   :  { %3023 = vmax.xlane.f32.xlu1 %v3022_v42  ;;  %v3019_v43 = vsel %vm311_vm2, %v3017_v41, -inf }
0x1a80   :  { %3020 = vmax.xlane.f32.xlu0 %v3019_v43 }
0x1a83   :  { %v5491_v47 = vpop.f32.mrb[36].mxu0 }
0x1a84   :  { %v3210_v48 = vpop.f32.mrb[37].mxu0  ;;  %v3220_v22 = vmul.f32 0.35355338, %v5491_v47 }
0x1a85   :  { %v3219_v49 = vmul.f32 0.35355338, %v3210_v48 }
0x1a86   :  { %v3224_v50 = vsel %vm311_vm2, %v3220_v22, -inf }
0x1a87   :  { %v3221_v24 = vsel %vm311_vm2, %v3219_v49, -inf }
0x1a88   :  { %3222 = vmax.xlane.f32.xlu0 %v3221_v24 }
0x1a8c   :  { %3225 = vmax.xlane.f32.xlu0 %v3224_v50 }
0x1a90   :  { %5984 = vrot.lane.b32.xlu1 %v6819_v62, %s6369_s18 }
0x1b0c   :  { %v3024_v51 = vpop.xlane.xlu1 %3023 }
0x1b0d   :  { %v3026_v54 = vsub.f32 %v3018_v18, %v3024_v51  ;;  %v3021_v55 = vpop.xlane.xlu0 %3020 }
0x1b0e   :  { %v3025_v56 = vsub.f32 %v3017_v41, %v3021_v55 }
0x1b0f   :  { %v3029_v59 = vmul.f32 1.442695, %v3026_v54 }
0x1b10   :  { %v3027_v60 = vmul.f32 1.442695, %v3025_v56  ;;  %v5985_v0 = vpop.permute.xlu1 %5984 }
0x1b11   :  { %6199 = vpow2.f32 %v3029_v59  ;;  %v5987_v2 = vunpack.i.h.bf16 %v5985_v0  ;;  %v5986_v4 = vunpack.i.l.bf16 %v5985_v0 }
0x1b12   :  { %6201 = vpow2.f32 %v3027_v60 }
0x1b13   :  { %v5753_v44 = vpack.c.bf16 %v5987_v2, %v5986_v4 }
0x1b15   :  { %5754 = vmatprep.subr.bf16.mxu1 %v5753_v44  ;;  %v3223_v46 = vpop.xlane.xlu0 %3222 }
0x1b16   :  { %v3227_v30 = vsub.f32 %v3219_v49, %v3223_v46  ;;  %5756 = vmatpush3.bf16.msra.mxu1 %v5753_v44 }
0x1b18   :  { %v3229_v15 = vmul.f32 1.442695, %v3227_v30 }
0x1b19   :  { %v3226_v17 = vpop.xlane.xlu0 %3225 }
0x1b1a   :  { %6203 = vpow2.f32 %v3229_v15  ;;  %v3228_v6 = vsub.f32 %v3220_v22, %v3226_v17 }
0x1b1b   :  { %v6200_v20 = vpop.eup %6199 }
0x1b1c   :  { %v6202_v7 = vpop.eup %6201  ;;  %v3231_v63 = vmul.f32 1.442695, %v3228_v6  ;;  %v3034_v8 = vsel %vm311_vm2, %v6200_v20, 0.0 }
0x1b1d   :  { %3035 = vadd.xlane.f32.xlu0 %v3034_v8  ;;  %v3031_v9 = vsel %vm311_vm2, %v6202_v7, 0.0 }
0x1b1e   :  { %6205 = vpow2.f32 %v3231_v63  ;;  %3032 = vadd.xlane.f32.xlu1 %v3031_v9 }
0x1b24   :  { %v6204_v10 = vpop.eup %6203 }
0x1b25   :  { %v3233_v11 = vsel %vm311_vm2, %v6204_v10, 0.0 }
0x1b26   :  { %3234 = vadd.xlane.f32.xlu1 %v3233_v11 }
0x1b28   :  { %v6206_v25 = vpop.eup %6205 }
0x1b29   :  { %v3236_v26 = vsel %vm311_vm2, %v6206_v25, 0.0 }
0x1b2a   :  { %3237 = vadd.xlane.f32.xlu0 %v3236_v26 }
0x1b37   :  { %5994 = vrot.lane.b32.xlu1 %v6903_v27, %s6360_s30 }
0x1b40   :  { %5989 = vrot.lane.b32.xlu0 %v6819_v62, %s6368_s17 }
0x1baa   :  { %v3036_v28 = vpop.xlane.xlu0 %3035 }
0x1bab   :  { %6207 = vrcp.f32 %v3036_v28  ;;  %v3033_v29 = vpop.xlane.xlu1 %3032 }
0x1bac   :  { %6209 = vrcp.f32 %v3033_v29 }
0x1bb3   :  { %v3235_v57 = vpop.xlane.xlu1 %3234 }
0x1bb4   :  { %6211 = vrcp.f32 %v3235_v57 }
0x1bb5   :  { %v6208_v58 = vpop.eup %6207 }
0x1bb6   :  { %v6210_v61 = vpop.eup %6209  ;;  %v3040_v32 = vmul.f32 %v6208_v58, %v6200_v20 }
0x1bb7   :  { %v3238_v14 = vpop.xlane.xlu0 %3237  ;;  %v3038_v31 = vmul.f32 %v6210_v61, %v6202_v7  ;;  %v5995_v33 = vpop.permute.xlu1 %5994 }
0x1bb8   :  { %6213 = vrcp.f32 %v3238_v14  ;;  %v5997_v35 = vunpack.i.h.bf16 %v5995_v33  ;;  %v5996_v62 = vunpack.i.l.bf16 %v5995_v33 }
0x1bb9   :  { %5482 = vmatprep.mubr.msk.f32.mxu1 %vm311_vm2, %v3038_v31 }
0x1bba   :  { %5483 = vmatmul.mubr.msk.f32.vlgmr.msra.gmra.mrb[26].mxu1 %vm311_vm2, %v3040_v32  ;;  %v5767_v19 = vpack.c.bf16 %v5997_v35, %v5996_v62 }
0x1bbb   :  { %v5990_v34 = vpop.permute.xlu0 %5989 }
0x1bbc   :  { %v5992_v36 = vunpack.i.h.bf16 %v5990_v34  ;;  %v5991_v37 = vunpack.i.l.bf16 %v5990_v34 }
0x1bbe   :  { %v6212_v38 = vpop.eup %6211  ;;  %v5763_v16 = vpack.c.bf16 %v5992_v36, %v5991_v37 }
0x1bbf   :  { %v3240_v18 = vmul.f32 %v6212_v38, %v6204_v10 }
0x1bc0   :  { %5764 = vmatprep.subr.bf16.mxu1 %v5763_v16 }
0x1bc1   :  { %5766 = vmatpush3.bf16.msra.mxu1 %v5763_v16  ;;  %5496 = vmatprep.mubr.msk.f32.mxu1 %vm311_vm2, %v3240_v18 }
0x1bc2   :  { %v6214_v41 = vpop.eup %6213  ;;  %5769 = vmatprep.subr.msk.bf16.mxu1 %vm6504_vm1, %v5767_v19 }
0x1bc3   :  { %v3242_v42 = vmul.f32 %v6214_v41, %v6206_v25 }
0x1bc5   :  { %5497 = vmatmul.mubr.msk.f32.vlgmr.msra.gmra.mrb[36].mxu1 %vm311_vm2, %v3242_v42 }
0x1bc6   :  { %5503 = vmatprep.mubr.msk.f32.mxu1 %vm225_vm0, %v6807_v5 }
0x1bca   :  { %5772 = vmatpush3.bf16.xpose.msk.msra.mxu1 %vm6504_vm1, %v5767_v19 }
0x1bd1   :  { %5504 = vmatmul.mubr.msk.f32.vlgmr.msra.gmra.mrb[38].mxu1 %vm225_vm0, %v6811_v21 }
0x1c8d   :  { %v6921_v43 = vpop.f32.mrb[26].mxu1 }
0x1c8e   :  { %v6923_v47 = vpop.f32.mrb[27].mxu1 }
0x1c8f   :  { %v6038_v48 = vpack.i.bf16 %v6921_v43, %v6923_v47 }
0x1c98   :  { %v6927_v49 = vpop.f32.mrb[36].mxu1 }
0x1c99   :  { %v6929_v22 = vpop.f32.mrb[37].mxu1 }
0x1c9a   :  { %v6048_v24 = vpack.i.bf16 %v6927_v49, %v6929_v22 }
0x1ca4   :  { %v5505_v50 = vpop.f32.mrb[38].mxu1 }
0x1ca5   :  { %v3450_v51 = vmul.f32 0.35355338, %v5505_v50  ;;  %v3440_v54 = vpop.f32.mrb[39].mxu1 }
0x1ca6   :  { %v3449_v55 = vmul.f32 0.35355338, %v3440_v54 }
0x1ca7   :  { %v3454_v56 = vsel %vm311_vm2, %v3450_v51, -inf }
0x1ca8   :  { %3455 = vmax.xlane.f32.xlu0 %v3454_v56  ;;  %v3451_v59 = vsel %vm311_vm2, %v3449_v55, -inf }
0x1ca9   :  { %3452 = vmax.xlane.f32.xlu1 %v3451_v59 }
0x1d35   :  { %v3456_v60 = vpop.xlane.xlu0 %3455 }
0x1d36   :  { %v3458_v0 = vsub.f32 %v3450_v51, %v3456_v60  ;;  %v3453_v2 = vpop.xlane.xlu1 %3452 }
0x1d37   :  { %v3457_v4 = vsub.f32 %v3449_v55, %v3453_v2 }
0x1d38   :  { %v3461_v44 = vmul.f32 1.442695, %v3458_v0 }
0x1d39   :  { %v3459_v46 = vmul.f32 1.442695, %v3457_v4 }
0x1d3a   :  { %6215 = vpow2.f32 %v3461_v44 }
0x1d3b   :  { %6217 = vpow2.f32 %v3459_v46 }
0x1d44   :  { %v6216_v30 = vpop.eup %6215 }
0x1d45   :  { %v6218_v15 = vpop.eup %6217  ;;  %v3466_v17 = vsel %vm311_vm2, %v6216_v30, 0.0 }
0x1d46   :  { %3467 = vadd.xlane.f32.xlu1 %v3466_v17  ;;  %v3463_v6 = vsel %vm311_vm2, %v6218_v15, 0.0 }
0x1d47   :  { %3464 = vadd.xlane.f32.xlu0 %v3463_v6 }
0x1d57   :  { %6004 = vrot.lane.b32.xlu1 %v6903_v27, %s6361_s11 }
0x1d5b   :  { %3560 = vrot.lane.b32.xlu1 %v6807_v5, %s6362_s13 }
0x1d5d   :  { %5999 = vrot.lane.b32.xlu0 %v6903_v27, %s6357_s21 }
0x1d61   :  { %3562 = vrot.lane.b32.xlu0 %v6811_v21, %s6362_s13 }
0x1dd3   :  { %v3468_v20 = vpop.xlane.xlu1 %3467 }
0x1dd4   :  { %6219 = vrcp.f32 %v3468_v20  ;;  %v3465_v7 = vpop.xlane.xlu0 %3464 }
0x1dd5   :  { %6221 = vrcp.f32 %v3465_v7 }
0x1dd7   :  { %v6005_v63 = vpop.permute.xlu1 %6004 }
0x1dd8   :  { %v6000_v8 = vpop.permute.xlu0 %5999  ;;  %v6007_v9 = vunpack.i.h.bf16 %v6005_v63  ;;  %v6006_v10 = vunpack.i.l.bf16 %v6005_v63 }
0x1dd9   :  { %v6002_v11 = vunpack.i.h.bf16 %v6000_v8  ;;  %v6001_v25 = vunpack.i.l.bf16 %v6000_v8 }
0x1dda   :  { %v5777_v28 = vpack.c.bf16 %v6007_v9, %v6006_v10 }
0x1ddb   :  { %v5773_v26 = vpack.c.bf16 %v6002_v11, %v6001_v25  ;;  %v3561_v14 = vpop.permute.xlu1 %3560 }
0x1ddc   :  { %v3563_v31 = vpop.permute.xlu0 %3562 }
0x1ddd   :  { %5774 = vmatprep.subr.bf16.mxu0 %v5773_v26 }
0x1dde   :  { %v6220_v29 = vpop.eup %6219  ;;  %5776 = vmatpush3.bf16.msra.mxu0 %v5773_v26 }
0x1ddf   :  { %v6222_v57 = vpop.eup %6221  ;;  %5779 = vmatprep.subr.msk.bf16.mxu0 %vm6504_vm1, %v5777_v28  ;;  %v3472_v61 = vmul.f32 %v6220_v29, %v6216_v30 }
0x1de0   :  { %v3470_v58 = vmul.f32 %v6222_v57, %v6218_v15 }
0x1de2   :  { %5510 = vmatprep.mubr.msk.f32.mxu0 %vm311_vm2, %v3470_v58 }
0x1de3   :  { %5511 = vmatmul.mubr.msk.f32.vlgmr.msra.gmra.mrb[38].mxu0 %vm311_vm2, %v3472_v61 }
0x1de4   :  { %5517 = vmatprep.mubr.msk.f32.mxu0 %vm225_vm0, %v3561_v14 }
0x1de7   :  { %5782 = vmatpush3.bf16.xpose.msk.msra.mxu0 %vm6504_vm1, %v5777_v28 }
0x1dee   :  { %5518 = vmatmul.mubr.msk.f32.vlgmr.msra.gmra.mrb[40].mxu0 %vm225_vm0, %v3563_v31 }
0x1eb6   :  { %v6953_v32 = vpop.f32.mrb[38].mxu0 }
0x1eb7   :  { %v6955_v33 = vpop.f32.mrb[39].mxu0 }
0x1ec1   :  { %v5519_v34 = vpop.f32.mrb[40].mxu0 }
0x1ec2   :  { %v3652_v35 = vmul.f32 0.35355338, %v5519_v34  ;;  %v3642_v62 = vpop.f32.mrb[41].mxu0 }
0x1ec3   :  { %v3651_v36 = vmul.f32 0.35355338, %v3642_v62 }
0x1ec4   :  { %v3656_v37 = vsel %vm311_vm2, %v3652_v35, -inf }
0x1ec5   :  { %3657 = vmax.xlane.f32.xlu0 %v3656_v37  ;;  %v3653_v38 = vsel %vm311_vm2, %v3651_v36, -inf }
0x1ec6   :  { %3654 = vmax.xlane.f32.xlu1 %v3653_v38 }
0x1f52   :  { %v3658_v16 = vpop.xlane.xlu0 %3657 }
0x1f53   :  { %v3660_v18 = vsub.f32 %v3652_v35, %v3658_v16  ;;  %v3655_v19 = vpop.xlane.xlu1 %3654 }
0x1f54   :  { %v3659_v41 = vsub.f32 %v3651_v36, %v3655_v19 }
0x1f55   :  { %v3663_v42 = vmul.f32 1.442695, %v3660_v18 }
0x1f56   :  { %v3661_v50 = vmul.f32 1.442695, %v3659_v41 }
0x1f57   :  { %6223 = vpow2.f32 %v3663_v42 }
0x1f58   :  { %6225 = vpow2.f32 %v3661_v50 }
0x1f61   :  { %v6224_v51 = vpop.eup %6223 }
0x1f62   :  { %v6226_v54 = vpop.eup %6225  ;;  %v3668_v55 = vsel %vm311_vm2, %v6224_v51, 0.0 }
0x1f63   :  { %3669 = vadd.xlane.f32.xlu1 %v3668_v55  ;;  %v3665_v56 = vsel %vm311_vm2, %v6226_v54, 0.0 }
0x1f64   :  { %3666 = vadd.xlane.f32.xlu0 %v3665_v56 }
0x1f74   :  { %6014 = vrot.lane.b32.xlu1 %v6903_v27, %s6364_s10 }
0x1f78   :  { %3762 = vrot.lane.b32.xlu1 %v6807_v5, %s6367_s16 }
0x1f7a   :  { %6009 = vrot.lane.b32.xlu0 %v6903_v27, %s6363_s4 }
0x1f7e   :  { %3764 = vrot.lane.b32.xlu0 %v6811_v21, %s6367_s16 }
0x1ff0   :  { %v3670_v59 = vpop.xlane.xlu1 %3669 }
0x1ff1   :  { %6227 = vrcp.f32 %v3670_v59  ;;  %v3667_v60 = vpop.xlane.xlu0 %3666 }
0x1ff2   :  { %6229 = vrcp.f32 %v3667_v60 }
0x1ff4   :  { %v6015_v0 = vpop.permute.xlu1 %6014 }
0x1ff5   :  { %v6010_v2 = vpop.permute.xlu0 %6009  ;;  %v6017_v4 = vunpack.i.h.bf16 %v6015_v0  ;;  %v6016_v44 = vunpack.i.l.bf16 %v6015_v0 }
0x1ff6   :  { %v6012_v46 = vunpack.i.h.bf16 %v6010_v2  ;;  %v6011_v30 = vunpack.i.l.bf16 %v6010_v2 }
0x1ff7   :  { %v5787_v17 = vpack.c.bf16 %v6017_v4, %v6016_v44 }
0x1ff8   :  { %v5783_v15 = vpack.c.bf16 %v6012_v46, %v6011_v30  ;;  %v3763_v8 = vpop.permute.xlu1 %3762  ;;  %v7006_v46 = vld [vmem:[%s7122_s6] sm:$0xff] }
0x1ff9   :  { %v3765_v9 = vpop.permute.xlu0 %3764 }
0x1ffa   :  { %5784 = vmatprep.subr.bf16.mxu1 %v5783_v15 }
0x1ffb   :  { %v6228_v6 = vpop.eup %6227  ;;  %5786 = vmatpush3.bf16.msra.mxu1 %v5783_v15 }
0x1ffc   :  { %v6230_v20 = vpop.eup %6229  ;;  %5789 = vmatprep.subr.msk.bf16.mxu1 %vm6504_vm1, %v5787_v17  ;;  %v3674_v63 = vmul.f32 %v6228_v6, %v6224_v51 }
0x1ffd   :  { %v3672_v7 = vmul.f32 %v6230_v20, %v6226_v54 }
0x1fff   :  { %5524 = vmatprep.mubr.msk.f32.mxu1 %vm311_vm2, %v3672_v7 }
0x2000   :  { %5525 = vmatmul.mubr.msk.f32.vlgmr.msra.gmra.mrb[40].mxu1 %vm311_vm2, %v3674_v63 }
0x2001   :  { %5531 = vmatprep.mubr.msk.f32.mxu1 %vm225_vm0, %v3763_v8 }
0x2004   :  { %5792 = vmatpush3.bf16.xpose.msk.msra.mxu1 %vm6504_vm1, %v5787_v17 }
0x200b   :  { %5532 = vmatmul.mubr.msk.f32.vlgmr.msra.gmra.mrb[42].mxu1 %vm225_vm0, %v3765_v9 }
0x20d3   :  { %v6977_v10 = vpop.f32.mrb[40].mxu1 }
0x20d4   :  { %v6979_v11 = vpop.f32.mrb[41].mxu1 }
0x20d5   :  { %v6043_v25 = vpack.i.bf16 %v6977_v10, %v6979_v11 }
0x20de   :  { %v5533_v26 = vpop.f32.mrb[42].mxu1 }
0x20df   :  { %v3854_v28 = vmul.f32 0.35355338, %v5533_v26  ;;  %v3844_v29 = vpop.f32.mrb[43].mxu1 }
0x20e0   :  { %v3853_v57 = vmul.f32 0.35355338, %v3844_v29 }
0x20e1   :  { %v3858_v58 = vsel %vm311_vm2, %v3854_v28, -inf }
0x20e2   :  { %3859 = vmax.xlane.f32.xlu0 %v3858_v58  ;;  %v3855_v61 = vsel %vm311_vm2, %v3853_v57, -inf }
0x20e3   :  { %3856 = vmax.xlane.f32.xlu1 %v3855_v61 }
0x216f   :  { %v3860_v14 = vpop.xlane.xlu0 %3859 }
0x2170   :  { %v3862_v31 = vsub.f32 %v3854_v28, %v3860_v14  ;;  %v3857_v34 = vpop.xlane.xlu1 %3856 }
0x2171   :  { %v3861_v35 = vsub.f32 %v3853_v57, %v3857_v34 }
0x2172   :  { %v3865_v62 = vmul.f32 1.442695, %v3862_v31 }
0x2173   :  { %v3863_v36 = vmul.f32 1.442695, %v3861_v35 }
0x2174   :  { %6231 = vpow2.f32 %v3865_v62 }
0x2175   :  { %6233 = vpow2.f32 %v3863_v36 }
0x217e   :  { %v6232_v37 = vpop.eup %6231 }
0x217f   :  { %v6234_v38 = vpop.eup %6233  ;;  %v3870_v16 = vsel %vm311_vm2, %v6232_v37, 0.0 }
0x2180   :  { %3871 = vadd.xlane.f32.xlu1 %v3870_v16  ;;  %v3867_v18 = vsel %vm311_vm2, %v6234_v38, 0.0 }
0x2181   :  { %3868 = vadd.xlane.f32.xlu0 %v3867_v18 }
0x2191   :  { %6024 = vrot.lane.b32.xlu1 %v6903_v27, %s6365_s14 }
0x2195   :  { %3964 = vrot.lane.b32.xlu1 %v6807_v5, %s6366_s15 }
0x2197   :  { %6019 = vrot.lane.b32.xlu0 %v6903_v27, %s6369_s18 }
0x219b   :  { %3966 = vrot.lane.b32.xlu0 %v6811_v21, %s6366_s15 }
0x220d   :  { %v3872_v19 = vpop.xlane.xlu1 %3871 }
0x220e   :  { %6235 = vrcp.f32 %v3872_v19  ;;  %v3869_v41 = vpop.xlane.xlu0 %3868 }
0x220f   :  { %6237 = vrcp.f32 %v3869_v41 }
0x2211   :  { %v6025_v42 = vpop.permute.xlu1 %6024 }
0x2212   :  { %v6020_v50 = vpop.permute.xlu0 %6019  ;;  %v6027_v51 = vunpack.i.h.bf16 %v6025_v42  ;;  %v6026_v54 = vunpack.i.l.bf16 %v6025_v42 }
0x2213   :  { %v6022_v55 = vunpack.i.h.bf16 %v6020_v50  ;;  %v6021_v56 = vunpack.i.l.bf16 %v6020_v50 }
0x2214   :  { %v5797_v60 = vpack.c.bf16 %v6027_v51, %v6026_v54 }
0x2215   :  { %v5793_v59 = vpack.c.bf16 %v6022_v55, %v6021_v56  ;;  %v3965_v4 = vpop.permute.xlu1 %3964 }
0x2216   :  { %v3967_v44 = vpop.permute.xlu0 %3966 }
0x2217   :  { %5794 = vmatprep.subr.bf16.mxu0 %v5793_v59 }
0x2218   :  { %v6236_v5 = vpop.eup %6235  ;;  %5796 = vmatpush3.bf16.msra.mxu0 %v5793_v59 }
0x2219   :  { %v6238_v0 = vpop.eup %6237  ;;  %5799 = vmatprep.subr.msk.bf16.mxu0 %vm6504_vm1, %v5797_v60  ;;  %v3876_v2 = vmul.f32 %v6236_v5, %v6232_v37 }
0x221a   :  { %v3874_v21 = vmul.f32 %v6238_v0, %v6234_v38 }
0x221c   :  { %5538 = vmatprep.mubr.msk.f32.mxu0 %vm311_vm2, %v3874_v21 }
0x221d   :  { %5539 = vmatmul.mubr.msk.f32.vlgmr.msra.gmra.mrb[42].mxu0 %vm311_vm2, %v3876_v2 }
0x221e   :  { %5545 = vmatprep.mubr.msk.f32.mxu0 %vm225_vm0, %v3965_v4 }
0x2221   :  { %5802 = vmatpush3.bf16.xpose.msk.msra.mxu0 %vm6504_vm1, %v5797_v60 }
0x2228   :  { %5546 = vmatmul.mubr.msk.f32.vlgmr.msra.gmra.mrb[44].mxu0 %vm225_vm0, %v3967_v44 }
0x2229   :  { %5571 = vmatprep.mubr.msk.f32.mxu0 %vm1912_vm4, %v7006_v46 }
0x22f0   :  { %v5540_v30 = vpop.f32.mrb[42].mxu0 }
0x22f1   :  { %v3955_v15 = vpop.f32.mrb[43].mxu0 }
0x22f2   :  { %v6053_v17 = vpack.i.bf16 %v5540_v30, %v3955_v15 }
0x22fb   :  { %v5547_v6 = vpop.f32.mrb[44].mxu0 }
0x22fc   :  { %v4056_v20 = vmul.f32 0.35355338, %v5547_v6  ;;  %v4046_v7 = vpop.f32.mrb[45].mxu0 }
0x22fd   :  { %v4055_v63 = vmul.f32 0.35355338, %v4046_v7 }
0x22fe   :  { %v4060_v23 = vsel %vm311_vm2, %v4056_v20, -inf }
0x22ff   :  { %4061 = vmax.xlane.f32.xlu0 %v4060_v23  ;;  %v4057_v8 = vsel %vm311_vm2, %v4055_v63, -inf }
0x2300   :  { %4058 = vmax.xlane.f32.xlu1 %v4057_v8 }
0x238c   :  { %v4062_v9 = vpop.xlane.xlu0 %4061 }
0x238d   :  { %v4064_v26 = vsub.f32 %v4056_v20, %v4062_v9  ;;  %v4059_v28 = vpop.xlane.xlu1 %4058  ;;  %v6101_v9 = vld [vmem:[#allocation5 + $0x40] sm:$0xff]  }
0x238e   :  { %v4063_v29 = vsub.f32 %v4055_v63, %v4059_v28  ;;  %v6105_v28 = vld [vmem:[#allocation5 + $0x60] sm:$0xff]  }
0x238f   :  { %v4067_v57 = vmul.f32 1.442695, %v4064_v26  ;;  %v6102_v26 = vld [vmem:[#allocation5 + $0x48] sm:$0xff]  }
0x2390   :  { %v4065_v58 = vmul.f32 1.442695, %v4063_v29  ;;  %v6106_v29 = vld [vmem:[#allocation5 + $0x68] sm:$0xff]  }
0x2391   :  { %6239 = vpow2.f32 %v4067_v57 }
0x2392   :  { %6241 = vpow2.f32 %v4065_v58 }
0x239b   :  { %v6240_v61 = vpop.eup %6239 }
0x239c   :  { %v6242_v14 = vpop.eup %6241  ;;  %v4072_v31 = vsel %vm311_vm2, %v6240_v61, 0.0 }
0x239d   :  { %4073 = vadd.xlane.f32.xlu1 %v4072_v31  ;;  %v4069_v34 = vsel %vm311_vm2, %v6242_v14, 0.0 }
0x239e   :  { %4070 = vadd.xlane.f32.xlu0 %v4069_v34 }
0x23ae   :  { %6034 = vrot.lane.b32.xlu1 %v6033_v40, %s6370_s19 }
0x23b2   :  { %6039 = vrot.lane.b32.xlu1 %v6038_v48, %s6371_s20 }
0x23b4   :  { %6029 = vrot.lane.b32.xlu0 %v6903_v27, %s6368_s17 }
0x23b6   :  { %6049 = vrot.lane.b32.xlu1 %v6048_v24, %s6372_s23 }
0x23b8   :  { %6044 = vrot.lane.b32.xlu0 %v6043_v25, %s6370_s19 }
0x23bc   :  { %6054 = vrot.lane.b32.xlu0 %v6053_v17, %s6371_s20 }
0x242a   :  { %v4074_v39 = vpop.xlane.xlu1 %4073 }
0x242b   :  { %6243 = vrcp.f32 %v4074_v39  ;;  %v4071_v12 = vpop.xlane.xlu0 %4070 }
0x242c   :  { %6245 = vrcp.f32 %v4071_v12 }
0x242e   :  { %v6035_v40 = vpop.permute.xlu1 %6034 }
0x242f   :  { %v6030_v43 = vpop.permute.xlu0 %6029  ;;  %v6037_v48 = vunpack.i.h.bf16 %v6035_v40  ;;  %v6036_v49 = vunpack.i.l.bf16 %v6035_v40 }
0x2430   :  { %v6032_v47 = vunpack.i.h.bf16 %v6030_v43  ;;  %v6031_v27 = vunpack.i.l.bf16 %v6030_v43 }
0x2431   :  { %v3355_v11 = vsel %vm225_vm0, %v6849_v52, %v6037_v48  ;;  %v3354_v37 = vsel %vm225_vm0, %v6851_v53, %v6036_v49  ;;  %v6099_v52 = vld [vmem:[%s7119_s3 + $0x10] sm:$0xff]   ;;  %v6100_v53 = vld [vmem:[%s7119_s3 + $0x18] sm:$0xff]   ;;  %v6110_v48 = vld [vmem:[#allocation7 + $0x48] sm:$0xff]  }
0x2432   :  { %v5803_v35 = vpack.c.bf16 %v6032_v47, %v6031_v27  ;;  %v6040_v62 = vpop.permute.xlu1 %6039  ;;  %v7067_v47 = vld [vmem:[%s7122_s6 + $0x8] sm:$0xff]  ;;  %v6109_v27 = vld [vmem:[#allocation7 + $0x40] sm:$0xff]  }
0x2433   :  { %v6042_v22 = vunpack.i.h.bf16 %v6040_v62  ;;  %v6041_v24 = vunpack.i.l.bf16 %v6040_v62  ;;  %v6045_v60 = vpop.permute.xlu0 %6044  ;;  %v6112_v62 = vld [vmem:[#allocation7 + $0x58] sm:$0xff]   ;;  %v6113_v49 = vld [vmem:[#allocation7 + $0x60] sm:$0xff]  }
0x2434   :  { %5804 = vmatprep.subr.bf16.mxu1 %v5803_v35  ;;  %v6047_v0 = vunpack.i.h.bf16 %v6045_v60  ;;  %v6046_v21 = vunpack.i.l.bf16 %v6045_v60 }
0x2435   :  { %v6244_v36 = vpop.eup %6243  ;;  %5806 = vmatpush3.bf16.msra.mxu1 %v5803_v35  ;;  %v3356_v41 = vsel %vm311_vm2, %v3354_v37, %v6041_v24  ;;  %v3357_v42 = vsel %vm311_vm2, %v3355_v11, %v6042_v22  ;;  %v6111_v35 = vld [vmem:[#allocation7 + $0x50] sm:$0xff]   ;;  %v6114_v22 = vld [vmem:[#allocation7 + $0x68] sm:$0xff]  }
0x2436   :  { %v6246_v10 = vpop.eup %6245  ;;  %v6050_v25 = vpop.permute.xlu1 %6049  ;;  %v4078_v19 = vmul.f32 %v6244_v36, %v6240_v61  ;;  %5555 = vmatprep.subr.bf16.mxu1 %v6099_v52  ;;  %v4191_v30 = vsel %vm225_vm0, %v6953_v32, %v6047_v0  ;;  %v4190_v15 = vsel %vm225_vm0, %v6955_v33, %v6046_v21  ;;  %v6103_v32 = vld [vmem:[#allocation5 + $0x50] sm:$0xff]   ;;  %v6104_v33 = vld [vmem:[#allocation5 + $0x58] sm:$0xff]  }
0x2437   :  { %v6052_v38 = vunpack.i.h.bf16 %v6050_v25  ;;  %v6051_v16 = vunpack.i.l.bf16 %v6050_v25  ;;  %v4076_v18 = vmul.f32 %v6246_v10, %v6242_v14  ;;  %v6055_v5 = vpop.permute.xlu0 %6054 }
0x2438   :  { %v6057_v2 = vunpack.i.h.bf16 %v6055_v5  ;;  %v6056_v4 = vunpack.i.l.bf16 %v6055_v5 }
0x2439   :  { %v3358_v50 = vsel %vm1055_vm3, %v3356_v41, %v6051_v16  ;;  %v3359_v51 = vsel %vm1055_vm3, %v3357_v42, %v6052_v38  ;;  %5552 = vmatprep.mubr.msk.f32.mxu1 %vm311_vm2, %v4076_v18  ;;  %v6115_v41 = vld [vmem:[#allocation7 + $0x70] sm:$0xff]   ;;  %v6116_v42 = vld [vmem:[#allocation7 + $0x78] sm:$0xff]  }
0x243a   :  { %v4196_v54 = vpack.c.bf16 %v3359_v51, %v3358_v50  ;;  %5553 = vmatmul.mubr.msk.f32.vlgmr.msra.gmra.mrb[44].mxu1 %vm311_vm2, %v4078_v19  ;;  %v4192_v20 = vsel %vm311_vm2, %v4190_v15, %v6056_v4  ;;  %v4193_v7 = vsel %vm311_vm2, %v4191_v30, %v6057_v2 }
0x243b   :  { %5556 = vmatpush3.bf16.msra.mxu1 %v6099_v52 }
0x243c   :  { %5559 = vmatprep.mubr.msk.bf16.mxu1 %vm1912_vm4, %v4196_v54  ;;  %5557 = vmatprep.subr.bf16.mxu1 %v6100_v53 }
0x243f   :  { %5558 = vmatpush3.bf16.msra.mxu1 %v6100_v53 }
0x2440   :  { %5577 = vmatprep.subr.bf16.mxu1 %v6101_v9 }
0x250d   :  { %v5554_v55 = vpop.f32.mrb[44].mxu1 }
0x250e   :  { %v4157_v56 = vpop.f32.mrb[45].mxu1 }
0x250f   :  { %v6058_v59 = vpack.i.bf16 %v5554_v55, %v4157_v56 }
0x2511   :  { %6059 = vrot.lane.b32.xlu1 %v6058_v59, %s6372_s23 }
0x2583   :  { %v6060_v44 = vpop.permute.xlu1 %6059 }
0x2584   :  { %v6062_v17 = vunpack.i.h.bf16 %v6060_v44  ;;  %v6061_v6 = vunpack.i.l.bf16 %v6060_v44 }
0x2586   :  { %v4195_v63 = vsel %vm1055_vm3, %v4193_v7, %v6062_v17  ;;  %v4194_v23 = vsel %vm1055_vm3, %v4192_v20, %v6061_v6 }
0x2587   :  { %v4197_v8 = vpack.c.bf16 %v4195_v63, %v4194_v23 }
0x2589   :  { %5560 = vmatmul.mubr.msk.bf16.vlgmr.msra.gmra.mrb[48].mxu1 %vm1912_vm4, %v4197_v8 }
0x258a   :  { %5578 = vmatpush3.bf16.msra.mxu1 %v6101_v9 }
0x258b   :  { %5579 = vmatprep.subr.bf16.mxu1 %v6102_v26 }
0x258e   :  { %5580 = vmatpush3.bf16.msra.mxu1 %v6102_v26 }
0x258f   :  { %5581 = vmatprep.subr.bf16.mxu1 %v6103_v32 }
0x2592   :  { %5582 = vmatpush3.bf16.msra.mxu1 %v6103_v32 }
0x2593   :  { %5583 = vmatprep.subr.bf16.mxu1 %v6104_v33 }
0x2596   :  { %5584 = vmatpush3.bf16.msra.mxu1 %v6104_v33  ;;  %v4692_v33 = vlaneseq }
0x2597   :  { %5585 = vmatprep.subr.bf16.mxu1 %v6105_v28 }
0x259a   :  { %5586 = vmatpush3.bf16.msra.mxu1 %v6105_v28  ;;  %v4693_v28 = vand.u32 127, %v4692_v33 }
0x259b   :  { %5587 = vmatprep.subr.bf16.mxu1 %v6106_v29 }
0x259c   :  { %vm4710_vm5 = vcmp.lt.s32.totalorder %v4693_v28, 32 }
0x259e   :  { %5588 = vmatpush3.bf16.msra.mxu1 %v6106_v29 }
0x265c   :  { %v5561_v57 = vpop.f32.mrb[48].mxu1 }
0x265d   :  { %v4255_v58 = vpop.f32.mrb[49].mxu1  ;;  %v4272_v12 = vadd.f32 %v5561_v57, %v6800_v13  ;;  %v6108_v13 = vld [vmem:[#allocation5 + $0x78] sm:$0xff]  }
0x265e   :  { %v5562_v61 = vpop.f32.mrb[50].mxu1  ;;  %v4270_v31 = vadd.f32 %v4255_v58, %v6794_v3  ;;  %v7081_v3 = vld [vmem:[%s7122_s6 + $0x18] sm:$0xff] }
0x265f   :  { %v4258_v14 = vpop.f32.mrb[51].mxu1  ;;  %v4273_v34 = vadd.f32 %v5562_v61, %v6798_v45  ;;  %v6107_v45 = vld [vmem:[#allocation5 + $0x70] sm:$0xff]  }
0x2660   :  { %v4271_v39 = vadd.f32 %v4258_v14, %v6792_v1  ;;  %v7074_v1 = vld [vmem:[%s7122_s6 + $0x10] sm:$0xff]  ;;  %5589 = vmatprep.subr.bf16.mxu1 %v6107_v45 }
0x2661   :  { %v5811_v43 = vpack.c.bf16 %v4273_v34, %v4272_v12  ;;  %5590 = vmatpush3.bf16.msra.mxu1 %v6107_v45 }
0x2662   :  { %v5807_v40 = vpack.c.bf16 %v4271_v39, %v4270_v31  ;;  %5591 = vmatprep.subr.bf16.mxu1 %v6108_v13 }
0x2664   :  { %5808 = vmatprep.subr.bf16.mxu0 %v5807_v40 }
0x2665   :  { %5810 = vmatpush3.bf16.msra.mxu0 %v5807_v40  ;;  %5592 = vmatpush3.bf16.msra.mxu1 %v6108_v13 }
0x2666   :  { %5812 = vmatprep.subr.bf16.mxu0 %v5811_v43 }
0x2669   :  { %5814 = vmatpush3.bf16.msra.mxu0 %v5811_v43 }
0x266a   :  { %5597 = vmatprep.subr.bf16.mxu0 %v6109_v27 }
0x266c   :  { %5572 = vmatmul.mubr.msk.f32.vlgmr.msra.gmra.mrb[46].mxu0 %vm1912_vm4, %v7067_v47 }
0x266d   :  { %5574 = vmatprep.mubr.msk.f32.mxu0 %vm1912_vm4, %v7074_v1  ;;  %5598 = vmatpush3.bf16.msra.mxu0 %v6109_v27 }
0x266e   :  { %5599 = vmatprep.subr.bf16.mxu0 %v6110_v48 }
0x2670   :  { %5575 = vmatmul.mubr.msk.f32.gmra.mrb[48].mxu0 %vm1912_vm4, %v7081_v3 }
0x2671   :  { %5600 = vmatpush3.bf16.msra.mxu0 %v6110_v48 }
0x2672   :  { %5601 = vmatprep.subr.bf16.mxu0 %v6111_v35 }
0x2675   :  { %5602 = vmatpush3.bf16.msra.mxu0 %v6111_v35 }
0x2676   :  { %5603 = vmatprep.subr.bf16.mxu0 %v6112_v62 }
0x2679   :  { %5604 = vmatpush3.bf16.msra.mxu0 %v6112_v62 }
0x267a   :  { %5605 = vmatprep.subr.bf16.mxu0 %v6113_v49 }
0x267d   :  { %5606 = vmatpush3.bf16.msra.mxu0 %v6113_v49 }
0x267e   :  { %5607 = vmatprep.subr.bf16.mxu0 %v6114_v22 }
0x2681   :  { %5608 = vmatpush3.bf16.msra.mxu0 %v6114_v22 }
0x2682   :  { %5609 = vmatprep.subr.bf16.mxu0 %v6115_v41 }
0x2685   :  { %5610 = vmatpush3.bf16.msra.mxu0 %v6115_v41 }
0x2686   :  { %5611 = vmatprep.subr.bf16.mxu0 %v6116_v42 }
0x2689   :  { %5612 = vmatpush3.bf16.msra.mxu0 %v6116_v42  ;;  %v4985_v42 = vld [vmem:[%s7123_s7] ss:$0 sm:$0xff]  ;;  %s6373_s7 = smov [#allocation8]  }
0x273f   :  { %v5573_v24 = vpop.f32.mrb[46].mxu0 }
0x2740   :  { %v4360_v36 = vsub.f32 %v4271_v39, %v5573_v24  ;;  %v4340_v10 = vpop.f32.mrb[47].mxu0 }
0x2741   :  { %v4359_v11 = vsub.f32 %v4270_v31, %v4340_v10 }
0x2743   :  { %v4363_v25 = vpack.c.bf16 %v4360_v36, %v4359_v11  ;;  %v5576_v37 = vpop.f32.mrb[48].mxu0 }
0x2744   :  { %v4362_v38 = vsub.f32 %v4273_v34, %v5576_v37  ;;  %v4350_v16 = vpop.f32.mrb[49].mxu0 }
0x2745   :  { %v4361_v18 = vsub.f32 %v4272_v12, %v4350_v16  ;;  %5593 = vmatprep.mubr.bf16.mxu1 %v4363_v25 }
0x2747   :  { %v4364_v19 = vpack.c.bf16 %v4362_v38, %v4361_v18 }
0x2749   :  { %5594 = vmatmul.mubr.bf16.vlgmr.msra.gmra.mrb[52].mxu1 %v4364_v19 }
0x274a   :  { %5625 = vmatprep.mubr.msk.f32.mxu1 %vm1912_vm4, %v7006_v46 }
0x281c   :  { %v5595_v50 = vpop.f32.mrb[52].mxu1 }
0x281d   :  { %v4464_v51 = vpop.f32.mrb[53].mxu1  ;;  %v4481_v52 = vmax.f32 %v5595_v50, 0.0 }
0x281e   :  { %v5596_v54 = vpop.f32.mrb[54].mxu1  ;;  %v4479_v56 = vmax.f32 %v4464_v51, 0.0 }
0x281f   :  { %v4482_v53 = vmax.f32 %v5596_v54, 0.0  ;;  %v4467_v55 = vpop.f32.mrb[55].mxu1  ;;  %v4986_v54 = vld [vmem:[%s7124_s8] ss:$0 sm:$0xff]  ;;  %s4795_s8 = sshll.u32 %s6373_s7, 4  ;;  %s4796_s8 = int_to_ptr.vmem [resolvable:$true] %s4795_s8 }
0x2820   :  { %v4480_v59 = vmax.f32 %v4467_v55, 0.0  ;;  %s6327_s22 = scalar_lea.vmem %s4796_s8, 512  ;;  %p6332_p11 = scmp.lt.s32.totalorder %s4796_s8, %s4796_s8 }
0x2821   :  { %v4484_v60 = vpack.c.bf16 %v4482_v53, %v4481_v52  ;;  %p6328_p10 = scmp.ne.s32.totalorder %s4796_s8, %s6327_s22  ;;  %p6333_p12 = scmp.lt.s32.totalorder %s6327_s22, %s6327_s22 }
0x2822   :  { %v4483_v5 = vpack.c.bf16 %v4480_v59, %v4479_v56 }
0x2823   :  { %p6334_p13 = por %p6333_p12, %p6332_p11 }
0x2824   :  { %5613 = vmatprep.mubr.bf16.mxu0 %v4483_v5 }
0x2825   :  { %5614 = vmatmul.mubr.bf16.vlgmr.msra.gmra.mrb[52].mxu0 %v4484_v60  ;;  %p6335_p0 = pnand %p6334_p13, %p6328_p10 }
0x28f8   :  { %v5615_v0 = vpop.f32.mrb[52].mxu0 }
0x28f9   :  { %v4584_v46 = vpop.f32.mrb[53].mxu0  ;;  %v4601_v15 = vadd.f32 %v5615_v0, %v4361_v18 }
0x28fa   :  { %v5616_v21 = vpop.f32.mrb[54].mxu0  ;;  %v4599_v4 = vadd.f32 %v4584_v46, %v4359_v11 }
0x28fb   :  { %v4587_v2 = vpop.f32.mrb[55].mxu0  ;;  %v4602_v44 = vadd.f32 %v5616_v21, %v4362_v38 }
0x28fc   :  { %v4600_v30 = vadd.f32 %v4587_v2, %v4360_v36 }
0x28fd   :  { %v5819_v6 = vpack.c.bf16 %v4602_v44, %v4601_v15 }
0x28fe   :  { %v5815_v17 = vpack.c.bf16 %v4600_v30, %v4599_v4 }
0x2900   :  { %5816 = vmatprep.subr.bf16.mxu1 %v5815_v17 }
0x2901   :  { %5818 = vmatpush3.bf16.msra.mxu1 %v5815_v17 }
0x2902   :  { %5820 = vmatprep.subr.bf16.mxu1 %v5819_v6 }
0x2905   :  { %5822 = vmatpush3.bf16.msra.mxu1 %v5819_v6 }
0x2908   :  { %5626 = vmatmul.mubr.msk.f32.vlgmr.msra.gmra.mrb[46].mxu1 %vm1912_vm4, %v7067_v47 }
0x2909   :  { %5628 = vmatprep.mubr.msk.f32.mxu1 %vm1912_vm4, %v7074_v1 }
0x290c   :  { %5629 = vmatmul.mubr.msk.f32.gmra.mrb[56].mxu1 %vm1912_vm4, %v7081_v3 }
0x29db   :  { %v5627_v20 = vpop.f32.mrb[46].mxu1 }
0x29dc   :  { %v4689_v7 = vsub.f32 %v4600_v30, %v5627_v20  ;;  %v4669_v63 = vpop.f32.mrb[47].mxu1 }
0x29dd   :  { %v4688_v23 = vsub.f32 %v4599_v4, %v4669_v63 }
0x29de   :  { %4696 = vadd.xlane.f32.xlu1 %v4689_v7 }
0x29df   :  { %4694 = vadd.xlane.f32.xlu0 %v4688_v23  ;;  %v5630_v8 = vpop.f32.mrb[56].mxu1 }
0x29e0   :  { %v4679_v9 = vpop.f32.mrb[57].mxu1  ;;  %v4691_v32 = vsub.f32 %v4602_v44, %v5630_v8 }
0x29e1   :  { %v4690_v26 = vsub.f32 %v4601_v15, %v4679_v9 }
0x29e3   :  { %4698 = vadd.xlane.f32.xlu0 %v4690_v26 }
0x29e7   :  { %4700 = vadd.xlane.f32.xlu0 %v4691_v32 }
0x2a6b   :  { %v4697_v29 = vpop.xlane.xlu1 %4696 }
0x2a6c   :  { %v4703_v57 = vmul.f32 0.03125, %v4697_v29  ;;  %v4695_v58 = vpop.xlane.xlu0 %4694 }
0x2a6d   :  { %v4702_v61 = vmul.f32 0.03125, %v4695_v58 }
0x2a6e   :  { %v4707_v14 = vsub.f32 %v4689_v7, %v4703_v57 }
0x2a6f   :  { %v4706_v31 = vsub.f32 %v4688_v23, %v4702_v61 }
0x2a70   :  { %v4699_v34 = vpop.xlane.xlu0 %4698  ;;  %v4712_v39 = vsel %vm4710_vm5, %v4707_v14, 0.0 }
0x2a71   :  { %v4704_v12 = vmul.f32 0.03125, %v4699_v34  ;;  %v4716_v40 = vmul.f32 %v4712_v39, %v4712_v39  ;;  %v4711_v43 = vsel %vm4710_vm5, %v4706_v31, 0.0 }
0x2a72   :  { %v4715_v47 = vmul.f32 %v4711_v43, %v4711_v43 }
0x2a73   :  { %v4708_v1 = vsub.f32 %v4690_v26, %v4704_v12  ;;  %4721 = vadd.xlane.f32.xlu0 %v4716_v40 }
0x2a74   :  { %4719 = vadd.xlane.f32.xlu1 %v4715_v47  ;;  %v4701_v3 = vpop.xlane.xlu0 %4700 }
0x2a75   :  { %v4705_v45 = vmul.f32 0.03125, %v4701_v3  ;;  %v4713_v13 = vsel %vm4710_vm5, %v4708_v1, 0.0 }
0x2a76   :  { %v4717_v27 = vmul.f32 %v4713_v13, %v4713_v13 }
0x2a77   :  { %v4709_v48 = vsub.f32 %v4691_v32, %v4705_v45 }
0x2a78   :  { %4723 = vadd.xlane.f32.xlu1 %v4717_v27 }
0x2a79   :  { %v4714_v35 = vsel %vm4710_vm5, %v4709_v48, 0.0 }
0x2a7a   :  { %v4718_v62 = vmul.f32 %v4714_v35, %v4714_v35 }
0x2a7c   :  { %4725 = vadd.xlane.f32.xlu0 %v4718_v62 }
0x2b00   :  { %v4722_v49 = vpop.xlane.xlu0 %4721 }
0x2b01   :  { %v4728_v22 = vmul.f32 0.03125, %v4722_v49  ;;  %v4720_v24 = vpop.xlane.xlu1 %4719 }
0x2b02   :  { %v4727_v36 = vmul.f32 0.03125, %v4720_v24 }
0x2b03   :  { %v4732_v10 = vadd.f32 1e-05, %v4728_v22 }
0x2b04   :  { %v4731_v11 = vadd.f32 1e-05, %v4727_v36 }
0x2b05   :  { %6247 = vrsqrt.f32 %v4732_v10  ;;  %v4724_v25 = vpop.xlane.xlu1 %4723 }
0x2b06   :  { %6249 = vrsqrt.f32 %v4731_v11  ;;  %v4729_v37 = vmul.f32 0.03125, %v4724_v25 }
0x2b08   :  { %v4733_v38 = vadd.f32 1e-05, %v4729_v37 }
0x2b09   :  { %v4726_v16 = vpop.xlane.xlu0 %4725 }
0x2b0a   :  { %6251 = vrsqrt.f32 %v4733_v38  ;;  %v4730_v18 = vmul.f32 0.03125, %v4726_v16 }
0x2b0c   :  { %v4734_v19 = vadd.f32 1e-05, %v4730_v18 }
0x2b0e   :  { %6253 = vrsqrt.f32 %v4734_v19 }
0x2b0f   :  { %v6248_v41 = vpop.eup %6247 }
0x2b10   :  { %v6250_v50 = vpop.eup %6249  ;;  %v4740_v51 = vmul.f32 %v6248_v41, %v4707_v14 }
0x2b11   :  { %v4739_v52 = vmul.f32 %v6250_v50, %v4706_v31 }
0x2b12   :  { %v4751_v53 = vmul.f32 %v4985_v42, %v4740_v51 }
0x2b13   :  { %v4750_v55 = vmul.f32 %v4985_v42, %v4739_v52 }
0x2b14   :  { %v6252_v56 = vpop.eup %6251  ;;  %v4762_v59 = vadd.f32 %v4986_v54, %v4751_v53 }
0x2b15   :  { %v4761_v60 = vadd.f32 %v4986_v54, %v4750_v55  ;;  %v4741_v5 = vmul.f32 %v6252_v56, %v4708_v1 }
0x2b17   :  { %v4765_v0 = vadd.f32 %v4762_v59, %v4761_v60  ;;  %v4752_v2 = vmul.f32 %v4985_v42, %v4741_v5 }
0x2b18   :  { %v6254_v46 = vpop.eup %6253 }
0x2b19   :  { %v4766_v21 = vrot.slane %v4765_v0, 4  ;;  %v4742_v4 = vmul.f32 %v6254_v46, %v4709_v48  ;;  %v4763_v17 = vadd.f32 %v4986_v54, %v4752_v2 }
0x2b1b   :  { %v4767_v44 = vadd.f32 %v4766_v21, %v4765_v0  ;;  %v4753_v30 = vmul.f32 %v4985_v42, %v4742_v4 }
0x2b1d   :  { %v4768_v15 = vrot.slane %v4767_v44, 2  ;;  %v4764_v6 = vadd.f32 %v4986_v54, %v4753_v30 }
0x2b1f   :  { %v4776_v20 = vadd.f32 %v4764_v6, %v4763_v17  ;;  %v4769_v7 = vadd.f32 %v4768_v15, %v4767_v44 }
0x2b21   :  { %v4777_v63 = vrot.slane %v4776_v20, 4  ;;  %v4770_v23 = vrot.slane %v4769_v7, 1 }
0x2b23   :  { %v4778_v8 = vadd.f32 %v4777_v63, %v4776_v20  ;;  %v4771_v9 = vadd.f32 %v4770_v23, %v4769_v7 }
0x2b25   :  { %v4779_v26 = vrot.slane %v4778_v8, 2  ;;  %v4773_v32 = vmul.f32 0.0625, %v4771_v9 }
0x2b27   :  { %v4780_v33 = vadd.f32 %v4779_v26, %v4778_v8  ;;  %v4774_v28 = vsub.f32 %v4761_v60, %v4773_v32  ;;  %v4775_v29 = vsub.f32 %v4762_v59, %v4773_v32 }
0x2b29   :  { %v4781_v57 = vrot.slane %v4780_v33, 1  ;;  %4786 = vst [vmem:[#allocation8] sm:$0xff] %v4774_v28  ;;  %4787 = vst [vmem:[#allocation8 + $0x8] sm:$0xff] %v4775_v29 }
0x2b2b   :  { %v4782_v58 = vadd.f32 %v4781_v57, %v4780_v33 }
0x2b2d   :  { %v4783_v61 = vmul.f32 0.0625, %v4782_v58 }
0x2b2f   :  { %v4784_v14 = vsub.f32 %v4763_v17, %v4783_v61  ;;  %v4785_v31 = vsub.f32 %v4764_v6, %v4783_v61 }
0x2b31   :  { %4788 = vst [vmem:[#allocation8 + $0x10] sm:$0xff] %v4784_v14  ;;  %4789 = vst [vmem:[#allocation8 + $0x18] sm:$0xff] %v4785_v31 }
0x2b32   :  { %6338 = shalt.err (!%p6335_p0)
}
0x2b33   :  { %s6339_s24 = scalar_lea.hbm %s7125_s9, 512 }
0x2b34   :  { %p6340_p1 = scmp.ne.s32.totalorder %s7125_s9, %s6339_s24  ;;  %p6343_p2 = scmp.lt.u32.totalorder %s6339_s24, %s7125_s9 }
0x2b36   :  { %p6345_p3 = pnand %p6343_p2, %p6340_p1 }
0x2b38   :  { %6348 = shalt.err (!%p6345_p3)
}
0x2b39   :  { %s6374_s26 = smov 128  }
0x2b3a   :  { %4801 = dma.vmem_to_hbm [thread:$0]  %s4796_s8, 512, %s7125_s9, [#allocation4], %s6374_s26, %s6374_s26, %s6370_s19  }
0x2b3b   :  { %6353 = dma.done.wait [#allocation4], 512  }
0x2b3c   :  { %6354 = vsyncadd [#allocation4], 4294966784 }
0x2b3d   :  { %4805 = vsyncpa [#allocation3], 1 }
0x2b3e   :  { %4806 = vsyncpa [#allocation6], 1 }
0x2b3f   :  { %4807 = vsyncpa [#allocation4], 1 }

</bundles_post_ra>
